<compile_context>
chip_gen: v7x
topology: tpu7x:2x2x1
jax: 0.10.0
libtpu: 0.0.40
codegen_flags: <defaults>
</compile_context>

<pallas_src>
import functools

import jax
import jax.numpy as jnp
from jax.experimental import pallas as pl
from jax.experimental.pallas import tpu as pltpu

IN_FEATURES = 48
LANE = 128


def _round_up(x, m):
    return (x + m - 1) // m * m


def _mlp_kernel(n_hidden_layers, *refs):
    # refs layout:
    #   x_ref,
    #   w0, b0,                       (input layer)
    #   [w_i, b_i] * n_hidden_layers, (hidden layers)
    #   w_out,                        (final linear, no bias, padded to 128 lanes)
    #   base_ref,                     (base_acc scalar, (1,1) in SMEM)
    #   o_ref                         (output, (block_batch, 128))
    x_ref = refs[0]
    idx = 1
    w0_ref, b0_ref = refs[idx], refs[idx + 1]
    idx += 2
    hidden_refs = []
    for _ in range(n_hidden_layers):
        hidden_refs.append((refs[idx], refs[idx + 1]))
        idx += 2
    wout_ref = refs[idx]
    idx += 1
    base_ref = refs[idx]
    idx += 1
    o_ref = refs[idx]

    # Input layer: Linear(48, H) + ReLU.  bf16 operands -> MXU, f32 accumulate.
    h = jnp.dot(x_ref[...].astype(jnp.bfloat16), w0_ref[...],
                preferred_element_type=jnp.float32)
    h = jnp.maximum(h + b0_ref[...], 0.0)

    # Hidden layers: Linear(H, H) + ReLU.
    for w_ref, b_ref in hidden_refs:
        h = jnp.dot(h.astype(jnp.bfloat16), w_ref[...],
                    preferred_element_type=jnp.float32)
        h = jnp.maximum(h + b_ref[...], 0.0)

    # Output layer: w_out is zero-padded to 128 lanes so this store is a full,
    # unmasked lane-dense vst (only column 0 carries the real result).
    y = jnp.dot(h.astype(jnp.bfloat16), wout_ref[...],
                preferred_element_type=jnp.float32)
    o_ref[...] = y + base_ref[0, 0]


def init_params(key, hidden_size=400, n_layers=3):
    """Deterministic synthetic parameters, logical shapes matching the PyTorch module."""
    keys = jax.random.split(key, 2 * (n_layers + 1) + 1)
    ki = 0

    def nrm(k, shape, scale):
        return jax.random.normal(k, shape, dtype=jnp.float32) * scale

    params = {}
    params["w0"] = nrm(keys[ki], (IN_FEATURES, hidden_size), 1.0 / jnp.sqrt(IN_FEATURES)); ki += 1
    params["b0"] = nrm(keys[ki], (hidden_size,), 0.01); ki += 1
    params["w_h"], params["b_h"] = [], []
    for _ in range(n_layers):
        params["w_h"].append(nrm(keys[ki], (hidden_size, hidden_size), 1.0 / jnp.sqrt(hidden_size))); ki += 1
        params["b_h"].append(nrm(keys[ki], (hidden_size,), 0.01)); ki += 1
    params["w_out"] = nrm(keys[ki], (hidden_size, 1), 1.0 / jnp.sqrt(hidden_size)); ki += 1
    params["base_acc"] = jnp.zeros((1,), dtype=jnp.float32)  # zeros(1) in the module
    return params


def prepare_params(params, weight_dtype=jnp.bfloat16):
    """Pad hidden dim to a multiple of 128, pad w_out to 128 lanes, cast weights to bf16.

    Zero padding is exact: padded hidden units produce ReLU(0)=0 and padded w_out
    columns are zero, so the math is identical to the unpadded f32 module (up to
    the bf16 weight cast).
    """
    H = params["w0"].shape[1]
    H_pad = _round_up(H, LANE)

    kp = {}
    kp["w0"] = jnp.zeros((IN_FEATURES, H_pad), weight_dtype).at[:, :H].set(
        params["w0"].astype(weight_dtype))
    kp["b0"] = jnp.zeros((1, H_pad), jnp.float32).at[0, :H].set(
        params["b0"].astype(jnp.float32))
    kp["w_h"], kp["b_h"] = [], []
    for w, b in zip(params["w_h"], params["b_h"]):
        kp["w_h"].append(jnp.zeros((H_pad, H_pad), weight_dtype).at[:H, :H].set(
            w.astype(weight_dtype)))
        kp["b_h"].append(jnp.zeros((1, H_pad), jnp.float32).at[0, :H].set(
            b.astype(jnp.float32)))
    kp["w_out"] = jnp.zeros((H_pad, LANE), weight_dtype).at[:H, :1].set(
        params["w_out"].astype(weight_dtype))
    kp["base_acc"] = params["base_acc"].reshape(1, 1).astype(jnp.float32)
    return kp


def accuracy_predictor_forward(x, kp, *, block_batch=128):
    """Full MLP forward in one Pallas kernel.

    x:  [B, 48] float32
    kp: params from prepare_params (bf16 weights, padded hidden dim)
    returns: [B] float32  (squeezed, + base_acc)
    """
    B = x.shape[0]
    H_pad = kp["w0"].shape[1]
    n_hidden = len(kp["w_h"])

    B_pad = _round_up(max(B, 1), block_batch)
    x = x.astype(jnp.float32)
    if B_pad != B:
        x = jnp.pad(x, ((0, B_pad - B), (0, 0)))

    inputs = [x, kp["w0"], kp["b0"]]
    for w, b in zip(kp["w_h"], kp["b_h"]):
        inputs += [w, b]
    inputs += [kp["w_out"], kp["base_acc"]]

    def resident_vmem_spec(shape):
        # Whole array, constant block index across the batch grid -> fetched once
        # and kept VMEM-resident for all grid steps (no closure over a loop var).
        return pl.BlockSpec(shape, lambda i: (0,) * len(shape),
                            memory_space=pltpu.MemorySpace.VMEM)

    in_specs = [pl.BlockSpec((block_batch, IN_FEATURES), lambda i: (i, 0),
                             memory_space=pltpu.MemorySpace.VMEM)]
    in_specs.append(resident_vmem_spec(kp["w0"].shape))
    in_specs.append(resident_vmem_spec(kp["b0"].shape))
    for w, b in zip(kp["w_h"], kp["b_h"]):
        in_specs.append(resident_vmem_spec(w.shape))
        in_specs.append(resident_vmem_spec(b.shape))
    in_specs.append(resident_vmem_spec(kp["w_out"].shape))
    # base_acc as a tiny SMEM scalar (no padded VMEM tile / DMA double-buffer).
    in_specs.append(pl.BlockSpec((1, 1), lambda i: (0, 0),
                                 memory_space=pltpu.MemorySpace.SMEM))

    out_spec = pl.BlockSpec((block_batch, LANE), lambda i: (i, 0),
                            memory_space=pltpu.MemorySpace.VMEM)

    flops = 2 * B_pad * (IN_FEATURES * H_pad + n_hidden * H_pad * H_pad + H_pad * LANE)
    bytes_accessed = (B_pad * IN_FEATURES * 4
                      + sum(int(a.size) * int(a.dtype.itemsize) for a in inputs[1:])
                      + B_pad * LANE * 4)

    kernel = functools.partial(_mlp_kernel, n_hidden)
    y = pl.pallas_call(
        kernel,
        out_shape=jax.ShapeDtypeStruct((B_pad, LANE), jnp.float32),
        grid=(B_pad // block_batch,),
        in_specs=in_specs,
        out_specs=out_spec,
        compiler_params=pltpu.CompilerParams(
            dimension_semantics=("parallel",),      # megacore: split batch across TCs
            vmem_limit_bytes=64 * 1024 * 1024,      # explicit budget (v5e/v7x scoped defaults)
        ),
        cost_estimate=pl.CostEstimate(flops=int(flops), transcendentals=0,
                                      bytes_accessed=int(bytes_accessed)),
    )(*inputs)

    # .squeeze(): take the single real output lane; drop batch padding.
    return y[:B, 0]


def reference_forward(x, kp):
    """Pure-JAX reference with identical numerics (bf16 weights, f32 accumulate)."""
    h = jnp.dot(x.astype(jnp.bfloat16), kp["w0"], preferred_element_type=jnp.float32)
    h = jnp.maximum(h + kp["b0"], 0.0)
    for w, b in zip(kp["w_h"], kp["b_h"]):
        h = jnp.dot(h.astype(jnp.bfloat16), w, preferred_element_type=jnp.float32)
        h = jnp.maximum(h + b, 0.0)
    y = jnp.dot(h.astype(jnp.bfloat16), kp["w_out"], preferred_element_type=jnp.float32)
    return y[:, 0] + kp["base_acc"][0, 0]


if __name__ == "__main__":
    key = jax.random.PRNGKey(0)
    k_param, k_x = jax.random.split(key)

    hidden_size = 400   # module default; padded to 512 internally
    n_layers = 3
    batch = 512         # exercises the batch grid (4 steps of 128)

    params = init_params(k_param, hidden_size=hidden_size, n_layers=n_layers)
    kp = prepare_params(params)
    x = jax.random.normal(k_x, (batch, IN_FEATURES), dtype=jnp.float32)

    y = accuracy_predictor_forward(x, kp, block_batch=128)
    y = jax.block_until_ready(y)

    y_ref = reference_forward(x, kp)
    assert y.shape == (batch,)
    assert jnp.allclose(y, y_ref, atol=1e-2, rtol=1e-2), float(jnp.max(jnp.abs(y - y_ref)))

    print("KERNEL_OK")
</pallas_src>

<mosaic_0001>
module attributes {stable_mosaic.version = 11 : i64} {
  func.func @_mlp_kernel(%arg0: i32, %arg1: memref<128x48xf32, #tpu.memory_space<vmem>>, %arg2: memref<48x512xbf16, #tpu.memory_space<vmem>>, %arg3: memref<1x512xf32, #tpu.memory_space<vmem>>, %arg4: memref<512x512xbf16, #tpu.memory_space<vmem>>, %arg5: memref<1x512xf32, #tpu.memory_space<vmem>>, %arg6: memref<512x512xbf16, #tpu.memory_space<vmem>>, %arg7: memref<1x512xf32, #tpu.memory_space<vmem>>, %arg8: memref<512x512xbf16, #tpu.memory_space<vmem>>, %arg9: memref<1x512xf32, #tpu.memory_space<vmem>>, %arg10: memref<512x128xbf16, #tpu.memory_space<vmem>>, %arg11: memref<1x1xf32, #tpu.memory_space<smem>>, %arg12: memref<128x128xf32, #tpu.memory_space<vmem>>) attributes {dimension_semantics = [#tpu.dimension_semantics<parallel>], iteration_bounds = array<i64: 4>, scalar_prefetch = 0 : i64, scratch_operands = 0 : i64, tpu.core_type = #tpu.core_type<tc>, window_params = [{transform_indices = @transform_0, window_bounds = array<i64: 128, 48>}, {pipeline_mode = #tpu.pipeline_mode<synchronous>, transform_indices = @transform_1, window_bounds = array<i64: 48, 512>}, {pipeline_mode = #tpu.pipeline_mode<synchronous>, transform_indices = @transform_2, window_bounds = array<i64: 1, 512>}, {pipeline_mode = #tpu.pipeline_mode<synchronous>, transform_indices = @transform_3, window_bounds = array<i64: 512, 512>}, {pipeline_mode = #tpu.pipeline_mode<synchronous>, transform_indices = @transform_4, window_bounds = array<i64: 1, 512>}, {pipeline_mode = #tpu.pipeline_mode<synchronous>, transform_indices = @transform_5, window_bounds = array<i64: 512, 512>}, {pipeline_mode = #tpu.pipeline_mode<synchronous>, transform_indices = @transform_6, window_bounds = array<i64: 1, 512>}, {pipeline_mode = #tpu.pipeline_mode<synchronous>, transform_indices = @transform_7, window_bounds = array<i64: 512, 512>}, {pipeline_mode = #tpu.pipeline_mode<synchronous>, transform_indices = @transform_8, window_bounds = array<i64: 1, 512>}, {pipeline_mode = #tpu.pipeline_mode<synchronous>, transform_indices = @transform_9, window_bounds = array<i64: 512, 128>}, {transform_indices = @transform_10, window_bounds = array<i64: 1, 1>}, {transform_indices = @transform_11, window_bounds = array<i64: 128, 128>}]} {
    %c0 = arith.constant 0 : index
    %c0_0 = arith.constant 0 : index
    %0 = vector.load %arg1[%c0, %c0_0] : memref<128x48xf32, #tpu.memory_space<vmem>>, vector<128x48xf32>
    %1 = arith.truncf %0 : vector<128x48xf32> to vector<128x48xbf16>
    %c0_1 = arith.constant 0 : index
    %c0_2 = arith.constant 0 : index
    %2 = vector.load %arg2[%c0_1, %c0_2] : memref<48x512xbf16, #tpu.memory_space<vmem>>, vector<48x512xbf16>
    %cst = arith.constant dense<0.000000e+00> : vector<128x512xf32>
    %3 = tpu.matmul %1, %2, %cst {dimension_numbers = #tpu.dot_dimension_numbers<[1], [0], [0], [1], [0, 0, 1, 1], [], []>} : vector<128x48xbf16>, vector<48x512xbf16>, vector<128x512xf32> -> vector<128x512xf32>
    %c0_3 = arith.constant 0 : index
    %c0_4 = arith.constant 0 : index
    %4 = vector.load %arg3[%c0_3, %c0_4] : memref<1x512xf32, #tpu.memory_space<vmem>>, vector<1x512xf32>
    %5 = vector.broadcast %4 : vector<1x512xf32> to vector<128x512xf32>
    %6 = arith.addf %3, %5 : vector<128x512xf32>
    %cst_5 = arith.constant 0.000000e+00 : f32
    %7 = vector.broadcast %cst_5 : f32 to vector<128x512xf32>
    %8 = arith.maximumf %6, %7 : vector<128x512xf32>
    %9 = arith.truncf %8 : vector<128x512xf32> to vector<128x512xbf16>
    %c0_6 = arith.constant 0 : index
    %c0_7 = arith.constant 0 : index
    %10 = vector.load %arg4[%c0_6, %c0_7] : memref<512x512xbf16, #tpu.memory_space<vmem>>, vector<512x512xbf16>
    %cst_8 = arith.constant dense<0.000000e+00> : vector<128x512xf32>
    %11 = tpu.matmul %9, %10, %cst_8 {dimension_numbers = #tpu.dot_dimension_numbers<[1], [0], [0], [1], [0, 0, 1, 1], [], []>} : vector<128x512xbf16>, vector<512x512xbf16>, vector<128x512xf32> -> vector<128x512xf32>
    %c0_9 = arith.constant 0 : index
    %c0_10 = arith.constant 0 : index
    %12 = vector.load %arg5[%c0_9, %c0_10] : memref<1x512xf32, #tpu.memory_space<vmem>>, vector<1x512xf32>
    %13 = vector.broadcast %12 : vector<1x512xf32> to vector<128x512xf32>
    %14 = arith.addf %11, %13 : vector<128x512xf32>
    %cst_11 = arith.constant 0.000000e+00 : f32
    %15 = vector.broadcast %cst_11 : f32 to vector<128x512xf32>
    %16 = arith.maximumf %14, %15 : vector<128x512xf32>
    %17 = arith.truncf %16 : vector<128x512xf32> to vector<128x512xbf16>
    %c0_12 = arith.constant 0 : index
    %c0_13 = arith.constant 0 : index
    %18 = vector.load %arg6[%c0_12, %c0_13] : memref<512x512xbf16, #tpu.memory_space<vmem>>, vector<512x512xbf16>
    %cst_14 = arith.constant dense<0.000000e+00> : vector<128x512xf32>
    %19 = tpu.matmul %17, %18, %cst_14 {dimension_numbers = #tpu.dot_dimension_numbers<[1], [0], [0], [1], [0, 0, 1, 1], [], []>} : vector<128x512xbf16>, vector<512x512xbf16>, vector<128x512xf32> -> vector<128x512xf32>
    %c0_15 = arith.constant 0 : index
    %c0_16 = arith.constant 0 : index
    %20 = vector.load %arg7[%c0_15, %c0_16] : memref<1x512xf32, #tpu.memory_space<vmem>>, vector<1x512xf32>
    %21 = vector.broadcast %20 : vector<1x512xf32> to vector<128x512xf32>
    %22 = arith.addf %19, %21 : vector<128x512xf32>
    %cst_17 = arith.constant 0.000000e+00 : f32
    %23 = vector.broadcast %cst_17 : f32 to vector<128x512xf32>
    %24 = arith.maximumf %22, %23 : vector<128x512xf32>
    %25 = arith.truncf %24 : vector<128x512xf32> to vector<128x512xbf16>
    %c0_18 = arith.constant 0 : index
    %c0_19 = arith.constant 0 : index
    %26 = vector.load %arg8[%c0_18, %c0_19] : memref<512x512xbf16, #tpu.memory_space<vmem>>, vector<512x512xbf16>
    %cst_20 = arith.constant dense<0.000000e+00> : vector<128x512xf32>
    %27 = tpu.matmul %25, %26, %cst_20 {dimension_numbers = #tpu.dot_dimension_numbers<[1], [0], [0], [1], [0, 0, 1, 1], [], []>} : vector<128x512xbf16>, vector<512x512xbf16>, vector<128x512xf32> -> vector<128x512xf32>
    %c0_21 = arith.constant 0 : index
    %c0_22 = arith.constant 0 : index
    %28 = vector.load %arg9[%c0_21, %c0_22] : memref<1x512xf32, #tpu.memory_space<vmem>>, vector<1x512xf32>
    %29 = vector.broadcast %28 : vector<1x512xf32> to vector<128x512xf32>
    %30 = arith.addf %27, %29 : vector<128x512xf32>
    %cst_23 = arith.constant 0.000000e+00 : f32
    %31 = vector.broadcast %cst_23 : f32 to vector<128x512xf32>
    %32 = arith.maximumf %30, %31 : vector<128x512xf32>
    %33 = arith.truncf %32 : vector<128x512xf32> to vector<128x512xbf16>
    %c0_24 = arith.constant 0 : index
    %c0_25 = arith.constant 0 : index
    %34 = vector.load %arg10[%c0_24, %c0_25] : memref<512x128xbf16, #tpu.memory_space<vmem>>, vector<512x128xbf16>
    %cst_26 = arith.constant dense<0.000000e+00> : vector<128x128xf32>
    %35 = tpu.matmul %33, %34, %cst_26 {dimension_numbers = #tpu.dot_dimension_numbers<[1], [0], [0], [1], [0, 0, 1, 1], [], []>} : vector<128x512xbf16>, vector<512x128xbf16>, vector<128x128xf32> -> vector<128x128xf32>
    %c0_27 = arith.constant 0 : index
    %c0_28 = arith.constant 0 : index
    %36 = memref.load %arg11[%c0_27, %c0_28] : memref<1x1xf32, #tpu.memory_space<smem>>
    %37 = vector.broadcast %36 : f32 to vector<128x128xf32>
    %38 = arith.addf %35, %37 : vector<128x128xf32>
    %c0_29 = arith.constant 0 : index
    %c0_30 = arith.constant 0 : index
    %39 = vector.load %arg12[%c0_29, %c0_30] : memref<128x128xf32, #tpu.memory_space<vmem>>, vector<128x128xf32>
    tpu.vector_store %arg12[%c0_29, %c0_30], %38 {strides = array<i32>} : memref<128x128xf32, #tpu.memory_space<vmem>>, vector<128x128xf32>,
    return
  }
  func.func @transform_0(%arg0: i32) -> (i32, i32) {
    %c0_i32 = arith.constant 0 : i32
    %c0_i32_0 = arith.constant 0 : i32
    return %arg0, %c0_i32 : i32, i32
  }
  func.func @transform_1(%arg0: i32) -> (i32, i32) {
    %c0_i32 = arith.constant 0 : i32
    %c0_i32_0 = arith.constant 0 : i32
    %c0_i32_1 = arith.constant 0 : i32
    return %c0_i32, %c0_i32_0 : i32, i32
  }
  func.func @transform_2(%arg0: i32) -> (i32, i32) {
    %c0_i32 = arith.constant 0 : i32
    %c0_i32_0 = arith.constant 0 : i32
    %c0_i32_1 = arith.constant 0 : i32
    return %c0_i32, %c0_i32_0 : i32, i32
  }
  func.func @transform_3(%arg0: i32) -> (i32, i32) {
    %c0_i32 = arith.constant 0 : i32
    %c0_i32_0 = arith.constant 0 : i32
    %c0_i32_1 = arith.constant 0 : i32
    return %c0_i32, %c0_i32_0 : i32, i32
  }
  func.func @transform_4(%arg0: i32) -> (i32, i32) {
    %c0_i32 = arith.constant 0 : i32
    %c0_i32_0 = arith.constant 0 : i32
    %c0_i32_1 = arith.constant 0 : i32
    return %c0_i32, %c0_i32_0 : i32, i32
  }
  func.func @transform_5(%arg0: i32) -> (i32, i32) {
    %c0_i32 = arith.constant 0 : i32
    %c0_i32_0 = arith.constant 0 : i32
    %c0_i32_1 = arith.constant 0 : i32
    return %c0_i32, %c0_i32_0 : i32, i32
  }
  func.func @transform_6(%arg0: i32) -> (i32, i32) {
    %c0_i32 = arith.constant 0 : i32
    %c0_i32_0 = arith.constant 0 : i32
    %c0_i32_1 = arith.constant 0 : i32
    return %c0_i32, %c0_i32_0 : i32, i32
  }
  func.func @transform_7(%arg0: i32) -> (i32, i32) {
    %c0_i32 = arith.constant 0 : i32
    %c0_i32_0 = arith.constant 0 : i32
    %c0_i32_1 = arith.constant 0 : i32
    return %c0_i32, %c0_i32_0 : i32, i32
  }
  func.func @transform_8(%arg0: i32) -> (i32, i32) {
    %c0_i32 = arith.constant 0 : i32
    %c0_i32_0 = arith.constant 0 : i32
    %c0_i32_1 = arith.constant 0 : i32
    return %c0_i32, %c0_i32_0 : i32, i32
  }
  func.func @transform_9(%arg0: i32) -> (i32, i32) {
    %c0_i32 = arith.constant 0 : i32
    %c0_i32_0 = arith.constant 0 : i32
    %c0_i32_1 = arith.constant 0 : i32
    return %c0_i32, %c0_i32_0 : i32, i32
  }
  func.func @transform_10(%arg0: i32) -> (i32, i32) {
    %c0_i32 = arith.constant 0 : i32
    %c0_i32_0 = arith.constant 0 : i32
    %c0_i32_1 = arith.constant 0 : i32
    return %c0_i32, %c0_i32_0 : i32, i32
  }
  func.func @transform_11(%arg0: i32) -> (i32, i32) {
    %c0_i32 = arith.constant 0 : i32
    %c0_i32_0 = arith.constant 0 : i32
    return %arg0, %c0_i32 : i32, i32
  }
}

</mosaic_0001>

<bundles_post_ra>
// kernel: tpu_custom_call.1
= control target key start
LH: loop header
LB: loop body
LE: loop exit
PB: predicated region body
PF: predicated region fallthrough
CT: control target
= control target key end

     0   :  { %s8853_s0 = inlined_call_operand.hbm [shape: f32[512,48], index: 0, kind: input, shape index: {}]   ;;  %s8854_s1 = inlined_call_operand.hbm [shape: bf16[48,512], index: 1, kind: input, shape index: {}]   ;;  %s8855_s2 = inlined_call_operand.hbm [shape: f32[1,512], index: 2, kind: input, shape index: {}]   ;;  %s8856_s3 = inlined_call_operand.hbm [shape: bf16[512,512], index: 3, kind: input, shape index: {}]   ;;  %s8857_s4 = inlined_call_operand.hbm [shape: f32[1,512], index: 4, kind: input, shape index: {}]   ;;  %s8858_s5 = inlined_call_operand.hbm [shape: bf16[512,512], index: 5, kind: input, shape index: {}]   ;;  %s8859_s6 = inlined_call_operand.hbm [shape: f32[1,512], index: 6, kind: input, shape index: {}]   ;;  %s8860_s7 = inlined_call_operand.hbm [shape: bf16[512,512], index: 7, kind: input, shape index: {}]   ;;  %s8861_s8 = inlined_call_operand.hbm [shape: f32[1,512], index: 8, kind: input, shape index: {}]   ;;  %s8862_s9 = inlined_call_operand.hbm [shape: bf16[512,128], index: 9, kind: input, shape index: {}]   ;;  %s8863_s10 = inlined_call_operand.<no memory space> [shape: f32[1,1], index: 10, kind: input, shape index: {}]   ;;  %s8864_s11 = inlined_call_operand.hbm [shape: f32[512,128], index: 11, kind: output, shape index: {}]  }
   0x1   :  { %8870 = sst [smem:[#allocation29_spill]] %s8854_s1 }
   0x2   :  { %8871 = sst [smem:[#allocation30_spill]] %s8864_s11 }
   0x3   :  { %16 = sst [smem:[#allocation2]] %s8863_s10 }
   0x4   :  { %17 = vsyncpa [#allocation4], 0 }
   0x5   :  { %19 = vsyncpa [#allocation4 + $0x1], 0 }
   0x6   :  { %20 = vsyncpa [#allocation7], 0 }
   0x7   :  { %21 = vsyncpa [#allocation10], 0 }
   0x8   :  { %22 = vsyncpa [#allocation13], 0 }
   0x9   :  { %23 = vsyncpa [#allocation16], 0 }
   0xa   :  { %24 = vsyncpa [#allocation19], 0 }
   0xb   :  { %25 = vsyncpa [#allocation5], 0 }
   0xc   :  { %27 = vsyncpa [#allocation5 + $0x1], 0  ;;  %s7867_s19 = smov 0   ;;  %s7869_s20 = smov 0  }
   0xd   :  { %s7871_s21 = smov 0   ;;  %s7873_s22 = smov 0  }
   0xe LB: > { %s7784_s10 = smov [#allocation6]   ;;  %s7888_s24 = sadd.s32 4294967295, %s7782_s22   ;;  %s7782_s22 = sphi %s7873_s22, %s8900_s22   ;;  %s7778_s21 = sphi %s7871_s21, %s8899_s21   ;;  %s7774_s20 = sphi %s7869_s20, %s8898_s20   ;;  %s7770_s19 = sphi %s7867_s19, %s8897_s19  }
   0xf   : > { %s312_s23 = sshll.u32 %s7784_s10, 4  ;;  %p5653_p0 = scmp.ge.s32.totalorder %s7782_s22, 1  ;;  %s7893_s23 = int_to_ptr.vmem [resolvable:$true] %s312_s23 }
  0x10   : > { %p8867_p1 = scmp.eq.s32.totalorder %s7888_s24, 0  ;;  %p300_p2 = scmp.lt.s32.totalorder %s7782_s22, 5 }
  0x11   : > { %s7785_s26 = smov [#allocation9]   ;;  %s7786_s29 = smov [#allocation12]  }
  0x12   : > { %p7895_p3 = pnand %p5653_p0, %p300_p2  ;;  %s336_s27 = sshll.u32 %s7785_s26, 4  ;;  %s7907_s27 = int_to_ptr.vmem [resolvable:$true] %s336_s27 }
  0x13   : > { %s360_s30 = sshll.u32 %s7786_s29, 4  ;;  %s8875_s1 = sld [smem:[#allocation29_spill]]  ;;  %s7909_s30 = int_to_ptr.vmem [resolvable:$true] %s360_s30 }
  0x14   : > { %s8872_s25 = scalar_select %p7895_p3, 1, 0 }
  0x15   : > { %p6682_p4 = pneg %p7895_p3 }
  0x16   : > { %8873 = sst [smem:[#allocation28_spill]] %s8872_s25 }
  0x17   : > { %p7903_p5 = pnand %p6682_p4, %p8867_p1 }
  0x19   : > { %s7414_s14 = scalar_lea.hbm %s8875_s1, 1536  ;;  %p7919_p7 = pneg %p7903_p5 }
  0x1a   : > { %p7415_p6 = scmp.ne.s32.totalorder %s8875_s1, %s7414_s14  ;;  %p7421_p10 = scmp.lt.u32.totalorder %s7414_s14, %s8875_s1 }
  0x1c   : > { %p7417_p8 = pnand %p7919_p7, %p7415_p6 }
  0x1e   : > { %p7418_p9 = pneg %p7417_p8 }
  0x20   : > { %p7423_p11 = pnand %p7421_p10, %p7418_p9 }
  0x22   : > { %7426 = shalt.err (!%p7423_p11)
}
  0x23   : > { %s7427_s26 = scalar_lea.vmem %s7893_s23, 1536  ;;  %p7435_p2 = scmp.lt.s32.totalorder %s7893_s23, %s7893_s23 }
  0x24   : > { %p7428_p12 = scmp.ne.s32.totalorder %s7893_s23, %s7427_s26  ;;  %p7436_p4 = scmp.lt.s32.totalorder %s7427_s26, %s7427_s26 }
  0x26   : > { %p7430_p13 = pnand %p7428_p12, %p7919_p7  ;;  %p7437_p6 = por %p7436_p4, %p7435_p2 }
  0x28   : > { %p7431_p0 = pneg %p7430_p13 }
  0x2a   : > { %p7438_p8 = pnand %p7437_p6, %p7431_p0 }
  0x2c   : > { %7441 = shalt.err (!%p7438_p8)
}
  0x2d   : > { %s7787_s29 = smov 256   ;;  %s7788_s12 = smov 16  }
  0x2e   : > { %6685 = dma.hbm_to_vmem [thread:$0]  (!%p7903_p5), %s8875_s1, 1536, %s7893_s23, [#allocation7], %s7787_s29, %s7787_s29, %s7788_s12  }
  0x2f   : > { %s7442_s18 = scalar_lea.hbm %s8856_s3, 16384 }
  0x30   : > { %p7443_p9 = scmp.ne.s32.totalorder %s8856_s3, %s7442_s18  ;;  %p7449_p12 = scmp.lt.u32.totalorder %s7442_s18, %s8856_s3 }
  0x32   : > { %p7445_p10 = pnand %p7443_p9, %p7919_p7 }
  0x34   : > { %p7446_p11 = pneg %p7445_p10 }
  0x36   : > { %p7451_p13 = pnand %p7449_p12, %p7446_p11 }
  0x38   : > { %7454 = shalt.err (!%p7451_p13)
}
  0x39   : > { %s7455_s23 = scalar_lea.vmem %s7907_s27, 16384  ;;  %p7463_p6 = scmp.lt.s32.totalorder %s7907_s27, %s7907_s27 }
  0x3a   : > { %p7456_p0 = scmp.ne.s32.totalorder %s7907_s27, %s7455_s23  ;;  %p7464_p8 = scmp.lt.s32.totalorder %s7455_s23, %s7455_s23 }
  0x3c   : > { %p7458_p2 = pnand %p7456_p0, %p7919_p7  ;;  %p7465_p9 = por %p7464_p8, %p7463_p6 }
  0x3e   : > { %p7459_p4 = pneg %p7458_p2 }
  0x40   : > { %p7466_p10 = pnand %p7465_p9, %p7459_p4 }
  0x42   : > { %7469 = shalt.err (!%p7466_p10)
}
  0x43   : > { %6691 = dma.hbm_to_vmem [thread:$0]  (!%p7903_p5), %s8856_s3, 16384, %s7907_s27, [#allocation10], %s7787_s29, %s7787_s29, %s7788_s12  }
  0x44   : > { %s7470_s15 = scalar_lea.hbm %s8858_s5, 16384 }
  0x45   : > { %p7471_p11 = scmp.ne.s32.totalorder %s8858_s5, %s7470_s15  ;;  %p7477_p0 = scmp.lt.u32.totalorder %s7470_s15, %s8858_s5 }
  0x47   : > { %p7473_p12 = pnand %p7471_p11, %p7919_p7 }
  0x49   : > { %p7474_p13 = pneg %p7473_p12 }
  0x4b   : > { %p7479_p2 = pnand %p7477_p0, %p7474_p13 }
  0x4d   : > { %7482 = shalt.err (!%p7479_p2)
}
  0x4e   : > { %s7483_s27 = scalar_lea.vmem %s7909_s30, 16384  ;;  %p7491_p9 = scmp.lt.s32.totalorder %s7909_s30, %s7909_s30 }
  0x4f   : > { %p7484_p4 = scmp.ne.s32.totalorder %s7909_s30, %s7483_s27  ;;  %p7492_p10 = scmp.lt.s32.totalorder %s7483_s27, %s7483_s27 }
  0x51   : > { %p7486_p6 = pnand %p7484_p4, %p7919_p7  ;;  %p7493_p11 = por %p7492_p10, %p7491_p9 }
  0x53   : > { %p7487_p8 = pneg %p7486_p6 }
  0x55   : > { %p7494_p12 = pnand %p7493_p11, %p7487_p8 }
  0x57   : > { %7497 = shalt.err (!%p7494_p12)
}
  0x58   : > { %6697 = dma.hbm_to_vmem [thread:$0]  (!%p7903_p5), %s8858_s5, 16384, %s7909_s30, [#allocation13], %s7787_s29, %s7787_s29, %s7788_s12  }
  0x59   : > { %s7789_s25 = smov [#allocation15]   ;;  %s7790_s14 = smov [#allocation8]  }
  0x5a   : > { %s384_s13 = sshll.u32 %s7789_s25, 4  ;;  %s326_s15 = sshll.u32 %s7790_s14, 4  ;;  %s385_s13 = int_to_ptr.vmem [resolvable:$true] %s384_s13  ;;  %s327_s15 = int_to_ptr.vmem [resolvable:$true] %s326_s15 }
  0x5b   : > { %s7498_s10 = scalar_lea.hbm %s8860_s7, 16384 }
  0x5c   : > { %p7499_p13 = scmp.ne.s32.totalorder %s8860_s7, %s7498_s10  ;;  %p7505_p4 = scmp.lt.u32.totalorder %s7498_s10, %s8860_s7 }
  0x5e   : > { %p7501_p0 = pnand %p7499_p13, %p7919_p7 }
  0x60   : > { %p7502_p2 = pneg %p7501_p0 }
  0x62   : > { %p7507_p6 = pnand %p7505_p4, %p7502_p2 }
  0x64   : > { %7510 = shalt.err (!%p7507_p6)
}
  0x65   : > { %s7511_s30 = scalar_lea.vmem %s385_s13, 16384  ;;  %p7519_p11 = scmp.lt.s32.totalorder %s385_s13, %s385_s13 }
  0x66   : > { %p7512_p8 = scmp.ne.s32.totalorder %s385_s13, %s7511_s30  ;;  %p7520_p12 = scmp.lt.s32.totalorder %s7511_s30, %s7511_s30 }
  0x68   : > { %p7514_p9 = pnand %p7512_p8, %p7919_p7  ;;  %p7521_p1 = por %p7520_p12, %p7519_p11 }
  0x6a   : > { %p7515_p10 = pneg %p7514_p9 }
  0x6c   : > { %p7522_p3 = pnand %p7521_p1, %p7515_p10 }
  0x6e   : > { %7525 = shalt.err (!%p7522_p3)
}
  0x6f   : > { %6703 = dma.hbm_to_vmem [thread:$0]  (!%p7903_p5), %s8860_s7, 16384, %s385_s13, [#allocation16], %s7787_s29, %s7787_s29, %s7788_s12  }
  0x70   : > { %s7526_s16 = scalar_lea.hbm %s8855_s2, 64 }
  0x71   : > { %p7527_p1 = scmp.ne.s32.totalorder %s8855_s2, %s7526_s16  ;;  %p7533_p0 = scmp.lt.u32.totalorder %s7526_s16, %s8855_s2 }
  0x73   : > { %p7529_p3 = pnand %p7527_p1, %p7919_p7 }
  0x75   : > { %p7530_p13 = pneg %p7529_p3 }
  0x77   : > { %p7535_p2 = pnand %p7533_p0, %p7530_p13 }
  0x79   : > { %7538 = shalt.err (!%p7535_p2)
}
  0x7a   : > { %s7539_s23 = scalar_lea.vmem %s327_s15, 64  ;;  %p7547_p9 = scmp.lt.s32.totalorder %s327_s15, %s327_s15 }
  0x7b   : > { %p7540_p4 = scmp.ne.s32.totalorder %s327_s15, %s7539_s23  ;;  %p7548_p10 = scmp.lt.s32.totalorder %s7539_s23, %s7539_s23 }
  0x7d   : > { %p7542_p6 = pnand %p7540_p4, %p7919_p7  ;;  %p7549_p11 = por %p7548_p10, %p7547_p9 }
  0x7f   : > { %p7543_p8 = pneg %p7542_p6 }
  0x81   : > { %p7550_p12 = pnand %p7549_p11, %p7543_p8 }
  0x83   : > { %7553 = shalt.err (!%p7550_p12)
}
  0x84   : > { %6688 = dma.hbm_to_vmem [thread:$0]  (!%p7903_p5), %s8855_s2, 64, %s327_s15, [#allocation7]  }
  0x85   : > { %s7791_s13 = smov [#allocation11]   ;;  %s7792_s1 = smov [#allocation14]  }
  0x86   : > { %s350_s30 = sshll.u32 %s7791_s13, 4  ;;  %s374_s11 = sshll.u32 %s7792_s1, 4  ;;  %s351_s30 = int_to_ptr.vmem [resolvable:$true] %s350_s30  ;;  %s375_s11 = int_to_ptr.vmem [resolvable:$true] %s374_s11 }
  0x87   : > { %s7554_s16 = scalar_lea.hbm %s8857_s4, 64 }
  0x88   : > { %p7555_p1 = scmp.ne.s32.totalorder %s8857_s4, %s7554_s16  ;;  %p7561_p0 = scmp.lt.u32.totalorder %s7554_s16, %s8857_s4 }
  0x8a   : > { %p7557_p3 = pnand %p7555_p1, %p7919_p7 }
  0x8c   : > { %p7558_p13 = pneg %p7557_p3 }
  0x8e   : > { %p7563_p2 = pnand %p7561_p0, %p7558_p13 }
  0x90   : > { %7566 = shalt.err (!%p7563_p2)
}
  0x91   : > { %s7567_s15 = scalar_lea.vmem %s351_s30, 64  ;;  %p7575_p9 = scmp.lt.s32.totalorder %s351_s30, %s351_s30 }
  0x92   : > { %p7568_p4 = scmp.ne.s32.totalorder %s351_s30, %s7567_s15  ;;  %p7576_p10 = scmp.lt.s32.totalorder %s7567_s15, %s7567_s15 }
  0x94   : > { %p7570_p6 = pnand %p7568_p4, %p7919_p7  ;;  %p7577_p11 = por %p7576_p10, %p7575_p9 }
  0x96   : > { %p7571_p8 = pneg %p7570_p6 }
  0x98   : > { %p7578_p12 = pnand %p7577_p11, %p7571_p8 }
  0x9a   : > { %7581 = shalt.err (!%p7578_p12)
}
  0x9b   : > { %6694 = dma.hbm_to_vmem [thread:$0]  (!%p7903_p5), %s8857_s4, 64, %s351_s30, [#allocation10]  }
  0x9c   : > { %s7582_s1 = scalar_lea.hbm %s8859_s6, 64 }
  0x9d   : > { %p7583_p1 = scmp.ne.s32.totalorder %s8859_s6, %s7582_s1  ;;  %p7589_p0 = scmp.lt.u32.totalorder %s7582_s1, %s8859_s6 }
  0x9f   : > { %p7585_p3 = pnand %p7583_p1, %p7919_p7 }
  0xa1   : > { %p7586_p13 = pneg %p7585_p3 }
  0xa3   : > { %p7591_p2 = pnand %p7589_p0, %p7586_p13 }
  0xa5   : > { %7594 = shalt.err (!%p7591_p2)
}
  0xa6   : > { %s7595_s10 = scalar_lea.vmem %s375_s11, 64  ;;  %p7603_p9 = scmp.lt.s32.totalorder %s375_s11, %s375_s11 }
  0xa7   : > { %p7596_p4 = scmp.ne.s32.totalorder %s375_s11, %s7595_s10  ;;  %p7604_p10 = scmp.lt.s32.totalorder %s7595_s10, %s7595_s10 }
  0xa9   : > { %p7598_p6 = pnand %p7596_p4, %p7919_p7  ;;  %p7605_p11 = por %p7604_p10, %p7603_p9 }
  0xab   : > { %p7599_p8 = pneg %p7598_p6 }
  0xad   : > { %p7606_p12 = pnand %p7605_p11, %p7599_p8 }
  0xaf   : > { %7609 = shalt.err (!%p7606_p12)
}
  0xb0   : > { %6700 = dma.hbm_to_vmem [thread:$0]  (!%p7903_p5), %s8859_s6, 64, %s375_s11, [#allocation13]  }
  0xb1   : > { %s7793_s27 = smov [#allocation17]   ;;  %s7794_s23 = smov [#allocation18]  }
  0xb2   : > { %s398_s15 = sshll.u32 %s7793_s27, 4  ;;  %s408_s29 = sshll.u32 %s7794_s23, 4  ;;  %s399_s15 = int_to_ptr.vmem [resolvable:$true] %s398_s15  ;;  %s409_s29 = int_to_ptr.vmem [resolvable:$true] %s408_s29 }
  0xb3   : > { %s7610_s1 = scalar_lea.hbm %s8861_s8, 64 }
  0xb4   : > { %p7611_p1 = scmp.ne.s32.totalorder %s8861_s8, %s7610_s1  ;;  %p7617_p0 = scmp.lt.u32.totalorder %s7610_s1, %s8861_s8 }
  0xb6   : > { %p7613_p3 = pnand %p7611_p1, %p7919_p7 }
  0xb8   : > { %p7614_p13 = pneg %p7613_p3 }
  0xba   : > { %p7619_p2 = pnand %p7617_p0, %p7614_p13 }
  0xbc   : > { %7622 = shalt.err (!%p7619_p2)
}
  0xbd   : > { %s7623_s11 = scalar_lea.vmem %s399_s15, 64  ;;  %p7631_p9 = scmp.lt.s32.totalorder %s399_s15, %s399_s15 }
  0xbe   : > { %p7624_p4 = scmp.ne.s32.totalorder %s399_s15, %s7623_s11  ;;  %p7632_p10 = scmp.lt.s32.totalorder %s7623_s11, %s7623_s11 }
  0xc0   : > { %p7626_p6 = pnand %p7624_p4, %p7919_p7  ;;  %p7633_p11 = por %p7632_p10, %p7631_p9 }
  0xc2   : > { %p7627_p8 = pneg %p7626_p6 }
  0xc4   : > { %p7634_p12 = pnand %p7633_p11, %p7627_p8 }
  0xc6   : > { %7637 = shalt.err (!%p7634_p12)
}
  0xc7   : > { %6706 = dma.hbm_to_vmem [thread:$0]  (!%p7903_p5), %s8861_s8, 64, %s399_s15, [#allocation16]  }
  0xc8   : > { %s7638_s23 = scalar_lea.hbm %s8862_s9, 4096 }
  0xc9   : > { %p7639_p1 = scmp.ne.s32.totalorder %s8862_s9, %s7638_s23  ;;  %p7645_p0 = scmp.lt.u32.totalorder %s7638_s23, %s8862_s9 }
  0xcb   : > { %p7641_p3 = pnand %p7639_p1, %p7919_p7 }
  0xcd   : > { %p7642_p13 = pneg %p7641_p3 }
  0xcf   : > { %p7647_p2 = pnand %p7645_p0, %p7642_p13 }
  0xd1   : > { %7650 = shalt.err (!%p7647_p2)
}
  0xd2   : > { %s7651_s14 = scalar_lea.vmem %s409_s29, 4096  ;;  %p7659_p9 = scmp.lt.s32.totalorder %s409_s29, %s409_s29 }
  0xd3   : > { %p7652_p4 = scmp.ne.s32.totalorder %s409_s29, %s7651_s14  ;;  %p7660_p10 = scmp.lt.s32.totalorder %s7651_s14, %s7651_s14 }
  0xd5   : > { %p7654_p6 = pnand %p7652_p4, %p7919_p7  ;;  %p7661_p11 = por %p7660_p10, %p7659_p9 }
  0xd7   : > { %p7655_p8 = pneg %p7654_p6 }
  0xd9   : > { %p7662_p12 = pnand %p7661_p11, %p7655_p8 }
  0xdb   : > { %7665 = shalt.err (!%p7662_p12)
}
  0xdc   : > { %s7795_s15 = smov 64   ;;  %s7796_s17 = smov 4  }
  0xdd   : > { %6709 = dma.hbm_to_vmem [thread:$0]  (!%p7903_p5), %s8862_s9, 4096, %s409_s29, [#allocation19], %s7795_s15, %s7795_s15, %s7796_s17  }
  0xde   : > { %s5652_s11 = sadd.s32 4294967294, %s7782_s22   ;;  %s8108_s10 = sadd.s32 1, %s7782_s22  }
  0xdf   : > { %s40_s30 = sadd.s32 1, %s7778_s21  ;;  %s37_s26 = ssub.s32 %s7782_s22, %s8108_s10 }
  0xe0   : > { %p47_p7 = scmp.ne.s32.totalorder %s7778_s21, %s7774_s20  ;;  %p38_p1 = scmp.eq.s32.totalorder %s37_s26, 0 }
  0xe1   : > { %p48_p3 = scmp.eq.s32.totalorder %s7782_s22, 0  ;;  %p53_p13 = scmp.ne.s32.totalorder %s7774_s20, %s7770_s19 }
  0xe2   : > { %p287_p0 = scmp.eq.s32.totalorder %s7888_s24, 3  ;;  %p8877_p4 = scmp.eq.s32.totalorder %s7888_s24, 0 }
  0xe3   : > { %s8120_s27 = scalar_select %p38_p1, %s7778_s21, %s40_s30  }
  0xe4   : > { %p49_p2 = por %p48_p3, %p47_p7  ;;  %p8124_p6 = por %p8877_p4, %p53_p13 }
  0xe5   : > { %p8128_p5 = por %p287_p0, %p47_p7  ;;  %p293_p8 = scmp.eq.s32.totalorder %s5652_s11, 3 }
  0xe6   : > { %p6727_p9 = scmp.lt.s32.totalorder %s7782_s22, 4  ;;  %s425_s23 = sand.u32 1, %s7778_s21  }
  0xe7   : > { %s8879_s29 = scalar_select %p8128_p5, 1, 0 }
  0xe8   : > { %p8134_p10 = por %p293_p8, %p53_p13  ;;  %s5664_s13 = sshll.u32 %s425_s23, 7 }
  0xe9   : > { %s6128_s1 = sshll.u32 %s7782_s22, 11  ;;  %s429_s17 = scalar_lea.vmem [#allocation3], %s5664_s13 }
  0xea   : > { %s8880_s12 = scalar_select %p8134_p10, 1, 0 }
  0xeb   : > { %s8142_s15 = scalar_lea.hbm %s8853_s0, %s6128_s1  ;;  %s436_s16 = sshll.u32 %s429_s17, 4  ;;  %s8148_s16 = int_to_ptr.vmem [resolvable:$true] %s436_s16 }
  0xec   : > { %p8144_p11 = pnand %p6727_p9, %p49_p2  ;;  %s8150_s11 = scalar_lea.sflag [#allocation4], %s425_s23 }
  0xed   : > { %s7666_s30 = scalar_lea.hbm %s8142_s15, 2048  ;;  %s7671_s1 = scalar_lea.hbm %s8853_s0, 8192 }
  0xee   : > { %p7667_p12 = scmp.ne.s32.totalorder %s8142_s15, %s7666_s30  ;;  %p7668_p7 = pneg %p8144_p11 }
  0xef   : > { %p7672_p13 = scmp.lt.u32.totalorder %s8142_s15, %s8853_s0  ;;  %p7673_p0 = scmp.lt.u32.totalorder %s7671_s1, %s7666_s30 }
  0xf0   : > { %p7669_p1 = pnand %p7668_p7, %p7667_p12  ;;  %p7675_p4 = scmp.lt.u32.totalorder %s7666_s30, %s8142_s15 }
  0xf1   : > { %p7674_p2 = por %p7673_p0, %p7672_p13 }
  0xf2   : > { %p7670_p3 = pneg %p7669_p1 }
  0xf3   : > { %p7676_p8 = por %p7675_p4, %p7674_p2 }
  0xf5   : > { %p7677_p9 = pnand %p7676_p8, %p7670_p3 }
  0xf7   : > { %7680 = shalt.err (!%p7677_p9)
}
  0xf8   : > { %s7681_s23 = scalar_lea.vmem %s8148_s16, 2048  ;;  %s7797_s17 = smov [#allocation3]  }
  0xf9   : > { %p7682_p12 = scmp.ne.s32.totalorder %s8148_s16, %s7681_s23  ;;  %s7686_s26 = sshll.u32 %s7797_s17, 4  ;;  %s7687_s26 = int_to_ptr.vmem [resolvable:$false] %s7686_s26 }
  0xfa   : > { %s7688_s13 = scalar_lea.vmem %s7687_s26, 4096  ;;  %p7689_p5 = scmp.lt.s32.totalorder %s8148_s16, %s7687_s26 }
  0xfb   : > { %p7684_p1 = pnand %p7682_p12, %p7668_p7  ;;  %p7690_p13 = scmp.lt.s32.totalorder %s7688_s13, %s7681_s23 }
  0xfd   : > { %p7685_p10 = pneg %p7684_p1  ;;  %p7691_p0 = por %p7690_p13, %p7689_p5 }
  0xff   : > { %p7692_p2 = pnand %p7691_p0, %p7685_p10 }
 0x101   : > { %7695 = shalt.err (!%p7692_p2)
}
 0x102   : > { %s7798_s30 = smov 128   ;;  %s7799_s1 = smov 8  }
 0x103   : > { %6713 = dma.hbm_to_vmem [thread:$0]  (!%p8144_p11), %s8142_s15, 2048, %s8148_s16, %s8150_s11, %s7798_s30, %s7798_s30, %s7799_s1  }
 0x104   : > { %s8882_s25 = sld [smem:[#allocation28_spill]] }
 0x10a   : > { %p8883_p7 = scmp.ne.s32.totalorder %s8882_s25, 0 }
 0x10b   : > { %s8181_s14 = sand.u32 (!%p8883_p7), 1, %s7774_s20  }
 0x10c   : > { %448 = sbr.rel (%p8883_p7) target bundleno = 1678 (0x68e), region = 64  ;;  %s5668_s23 = sshll.u32 (!%p8883_p7), %s8181_s14, 7 }
 0x10d   : > { %s451_s17 = scalar_lea.sflag (!%p8883_p7), [#allocation4], %s8181_s14  ;;  %s8187_s26 = scalar_lea.vmem (!%p8883_p7), [#allocation3], %s5668_s23 }
 0x113   : > { %7741 = dma.done.wait (%p8124_p6), %s451_s17, 2048  }
 0x114   : > { %7743 = vsyncadd (%p8124_p6), %s451_s17, 4294965248  ;;  %p8884_p5 = scmp.eq.s32.totalorder %s7888_s24, 0 }
 0x116   : > { %7745 = dma.done.wait (%p8884_p5), [#allocation7], 1600   ;;  %p8885_p10 = pmov %p8884_p5 }
 0x117   : > { %p8886_p11 = pmov %p8884_p5 }
 0x118   : > { %7747 = vsyncadd (%p8885_p10), [#allocation7], 4294965696 }
 0x119   : > { %7749 = dma.done.wait (%p8886_p11), [#allocation10], 16448   ;;  %p8887_p3 = pmov %p8884_p5 }
 0x11b   : > { %7751 = vsyncadd (%p8887_p3), [#allocation10], 4294950848  ;;  %p8888_p4 = pmov %p8887_p3 }
 0x11c   : > { %p8889_p8 = pmov %p8887_p3 }
 0x11d   : > { %7753 = dma.done.wait (%p8888_p4), [#allocation13], 16448  }
 0x11e   : > { %7755 = vsyncadd (%p8889_p8), [#allocation13], 4294950848  ;;  %p8890_p6 = pmov %p8887_p3 }
 0x11f   : > { %p8891_p9 = pmov %p8887_p3 }
 0x120   : > { %7757 = dma.done.wait (%p8890_p6), [#allocation16], 16448  }
 0x121   : > { %7759 = vsyncadd (%p8891_p9), [#allocation16], 4294950848  ;;  %p8892_p12 = pmov %p8887_p3 }
 0x122   : > { %p8893_p1 = pmov %p8887_p3 }
 0x123   : > { %7761 = dma.done.wait (%p8892_p12), [#allocation19], 4096  }
 0x124   : > { %7763 = vsyncadd (%p8893_p1), [#allocation19], 4294963200  ;;  %v7800_v0 = vmov 0   ;;  %v6788_v1 = vld [vmem:[#allocation6 + $0x4] ss:$16 sps:$4 sm:$0xff]   ;;  %v533_v8 = vld [vmem:[%s8187_s26 + $0x8] sm:$0xff] }
 0x125   : > { %707 = vmatprep.mubr.bf16.mxu0 %v7800_v0  ;;  %820 = vmatprep.mubr.bf16.mxu1 %v7800_v0  ;;  %v6790_v2 = vld [vmem:[#allocation6] ss:$16 sps:$4 sm:$0xff]   ;;  %v6791_v3 = vld [vmem:[#allocation6 + $0x24] ss:$16 sps:$4 sm:$0xff]   ;;  %v6797_v9 = vld [vmem:[#allocation6 + $0xc] ss:$16 sps:$4 sm:$0xff]  }
 0x126   : > { %675 = vmatprep.subr.bf16.mxu0 %v6788_v1  ;;  %v6793_v4 = vld [vmem:[#allocation6 + $0x20] ss:$16 sps:$4 sm:$0xff]   ;;  %v6794_v5 = vld [vmem:[#allocation6 + $0x44] ss:$16 sps:$4 sm:$0xff]   ;;  %v6799_v10 = vld [vmem:[#allocation6 + $0x8] ss:$16 sps:$4 sm:$0xff]   ;;  %788 = vmatprep.subr.bf16.mxu1 %v6797_v9 }
 0x127   : > { %676 = vmatpush1.bf16.msra.mxu0 %v6790_v2  ;;  %v6796_v6 = vld [vmem:[#allocation6 + $0x40] ss:$16 sps:$4 sm:$0xff]   ;;  %v6800_v12 = vld [vmem:[#allocation6 + $0x2c] ss:$16 sps:$4 sm:$0xff]   ;;  %vm650_vm0 = vcmask 392192   ;;  %789 = vmatpush1.bf16.msra.mxu1 %v6799_v10  ;;  %s5075_s28 = sld [smem:[#allocation2]] }
 0x128   : > { %677 = vmatprep.subr.bf16.mxu0 %v6791_v3  ;;  %v532_v7 = vld [vmem:[%s8187_s26] sm:$0xff]  ;;  %v6802_v13 = vld [vmem:[#allocation6 + $0x28] ss:$16 sps:$4 sm:$0xff]   ;;  %v534_v14 = vld [vmem:[%s8187_s26 + $0x10] sm:$0xff]  ;;  %790 = vmatprep.subr.bf16.mxu1 %v6800_v12  ;;  %s8771_s15 = scalar_lea.vmem [#allocation20], %s5668_s23  ;;  %s6129_s16 = sshll.u32 %s7888_s24, 11 }
 0x129   : > { %v548_v11 = vpack.c.bf16 %v533_v8, %v532_v7  ;;  %v535_v15 = vld [vmem:[%s8187_s26 + $0x18] sm:$0xff]  ;;  %v6806_v17 = vld [vmem:[#allocation9] ss:$16 sps:$4 sm:$0xff]   ;;  %v6811_v20 = vld [vmem:[#allocation9 + $0xc] ss:$16 sps:$4 sm:$0xff]   ;;  %s5493_s18 = sshll.u32 %s8771_s15, 4  ;;  %s8808_s18 = int_to_ptr.vmem [resolvable:$true] %s5493_s18 }
 0x12a   : > { %v6803_v16 = vld [vmem:[#allocation6 + $0x4c] ss:$16 sps:$4 sm:$0xff]   ;;  %v6808_v18 = vld [vmem:[#allocation9 + $0x4] ss:$16 sps:$4 sm:$0xff]   ;;  %v6812_v21 = vld [vmem:[#allocation9 + $0x20] ss:$16 sps:$4 sm:$0xff]   ;;  %v549_v23 = vpack.c.bf16 %v535_v15, %v534_v14 }
 0x12b   : > { %678 = vmatpush1.bf16.msra.mxu0 %v6793_v4  ;;  %v6805_v19 = vld [vmem:[#allocation6 + $0x48] ss:$16 sps:$4 sm:$0xff]   ;;  %791 = vmatpush1.bf16.msra.mxu1 %v6802_v13  ;;  %v6809_v24 = vld [vmem:[#allocation9 + $0x8] ss:$16 sps:$4 sm:$0xff]   ;;  %v6817_v26 = vld [vmem:[#allocation9 + $0x2c] ss:$16 sps:$4 sm:$0xff]  }
 0x12c   : > { %679 = vmatprep.subr.bf16.mxu0 %v6794_v5  ;;  %792 = vmatprep.subr.bf16.mxu1 %v6803_v16  ;;  %v6814_v22 = vld [vmem:[#allocation9 + $0x24] ss:$16 sps:$4 sm:$0xff]   ;;  %v6818_v27 = vld [vmem:[#allocation9 + $0x40] ss:$16 sps:$4 sm:$0xff]   ;;  %v6815_v31 = vld [vmem:[#allocation9 + $0x28] ss:$16 sps:$4 sm:$0xff]  }
 0x12d   : > { %v6820_v25 = vld [vmem:[#allocation9 + $0x44] ss:$16 sps:$4 sm:$0xff]   ;;  %v536_v28 = vld [vmem:[%s8187_s26 + $0x20] sm:$0xff]  ;;  %v6821_v36 = vld [vmem:[#allocation9 + $0x48] ss:$16 sps:$4 sm:$0xff]   ;;  %s8894_s30 = sld [smem:[#allocation30_spill]] }
 0x12e   : > { %v6826_v29 = vld [vmem:[#allocation9 + $0x64] ss:$16 sps:$4 sm:$0xff]   ;;  %v6823_v32 = vld [vmem:[#allocation9 + $0x4c] ss:$16 sps:$4 sm:$0xff]   ;;  %v6824_v33 = vld [vmem:[#allocation9 + $0x60] ss:$16 sps:$4 sm:$0xff]  }
 0x12f   : > { %680 = vmatpush1.bf16.msra.mxu0 %v6796_v6  ;;  %793 = vmatpush1.bf16.msra.mxu1 %v6805_v19  ;;  %v537_v30 = vld [vmem:[%s8187_s26 + $0x28] sm:$0xff]  ;;  %v6829_v37 = vld [vmem:[#allocation9 + $0x6c] ss:$16 sps:$4 sm:$0xff]   ;;  %v6830_v38 = vld [vmem:[#allocation9 + $0x80] ss:$16 sps:$4 sm:$0xff]   ;;  %s5480_s25 = scalar_lea.sflag [#allocation5], %s8181_s14 }
 0x130   : > { %1787 = vmatprep.subr.bf16.mxu0 %v6808_v18  ;;  %2013 = vmatprep.subr.bf16.mxu1 %v6811_v20  ;;  %v550_v34 = vpack.c.bf16 %v537_v30, %v536_v28  ;;  %v6832_v35 = vld [vmem:[#allocation9 + $0x84] ss:$16 sps:$4 sm:$0xff]   ;;  %v538_v39 = vld [vmem:[%s8187_s26 + $0x30] sm:$0xff]  ;;  %v6827_v42 = vld [vmem:[#allocation9 + $0x68] ss:$16 sps:$4 sm:$0xff]   ;;  %s7696_s24 = scalar_lea.vmem %s8808_s18, 2048 }
 0x131   : > { %v6838_v40 = vld [vmem:[#allocation9 + $0xa4] ss:$16 sps:$4 sm:$0xff]   ;;  %v6835_v43 = vld [vmem:[#allocation9 + $0x8c] ss:$16 sps:$4 sm:$0xff]   ;;  %v6836_v44 = vld [vmem:[#allocation9 + $0xa0] ss:$16 sps:$4 sm:$0xff]   ;;  %p7697_p13 = scmp.ne.s32.totalorder %s8808_s18, %s7696_s24 }
 0x132   : > { %5691 = vmatmul.mubr.msk.bf16.vlgmr.msra.gmra.mrb[0].mxu0 %vm650_vm0, %v548_v11  ;;  %5699 = vmatmul.mubr.msk.bf16.vlgmr.msra.gmra.mrb[0].mxu1 %vm650_vm0, %v548_v11  ;;  %v539_v41 = vld [vmem:[%s8187_s26 + $0x38] sm:$0xff]  ;;  %v6841_v48 = vld [vmem:[#allocation9 + $0xac] ss:$16 sps:$4 sm:$0xff]   ;;  %v6842_v49 = vld [vmem:[#allocation9 + $0xc0] ss:$16 sps:$4 sm:$0xff]   ;;  %p8895_p0 = scmp.ne.s32.totalorder %s8879_s29, 0 }
 0x133   : > { %717 = vmatprep.mubr.bf16.mxu0 %v7800_v0  ;;  %1788 = vmatpush1.bf16.msra.mxu0 %v6806_v17  ;;  %v551_v45 = vpack.c.bf16 %v539_v41, %v538_v39  ;;  %v6844_v46 = vld [vmem:[#allocation9 + $0xc4] ss:$16 sps:$4 sm:$0xff]   ;;  %v6833_v47 = vld [vmem:[#allocation9 + $0x88] ss:$16 sps:$4 sm:$0xff]   ;;  %v540_v50 = vld [vmem:[%s8187_s26 + $0x40] sm:$0xff]  ;;  %v570_v39 = vlaneseq  ;;  %s8806_s1 = scalar_lea.hbm %s8894_s30, %s6129_s16  ;;  %s7801_s23 = smov [#allocation20]  }
 0x134   : > { %1789 = vmatprep.subr.bf16.mxu0 %v6814_v22  ;;  %830 = vmatprep.mubr.bf16.mxu1 %v7800_v0  ;;  %v6850_v51 = vld [vmem:[#allocation9 + $0xe4] ss:$16 sps:$4 sm:$0xff]   ;;  %v6839_v53 = vld [vmem:[#allocation9 + $0xa8] ss:$16 sps:$4 sm:$0xff]   ;;  %v6847_v54 = vld [vmem:[#allocation9 + $0xcc] ss:$16 sps:$4 sm:$0xff]   ;;  %p7698_p2 = pnand %p7697_p13, %p8895_p0 }
 0x135   : > { %2014 = vmatpush1.bf16.msra.mxu1 %v6809_v24  ;;  %v541_v52 = vld [vmem:[%s8187_s26 + $0x48] sm:$0xff]  ;;  %v6848_v55 = vld [vmem:[#allocation9 + $0xe0] ss:$16 sps:$4 sm:$0xff]   ;;  %v6853_v59 = vld [vmem:[#allocation9 + $0xec] ss:$16 sps:$4 sm:$0xff]   ;;  %s7700_s17 = sshll.u32 %s7801_s23, 4  ;;  %s7701_s17 = int_to_ptr.vmem [resolvable:$false] %s7700_s17 }
 0x136   : > { %2015 = vmatprep.subr.bf16.mxu1 %v6817_v26  ;;  %v552_v56 = vpack.c.bf16 %v541_v52, %v540_v50  ;;  %v6856_v57 = vld [vmem:[#allocation9 + $0x104] ss:$16 sps:$4 sm:$0xff]   ;;  %v6845_v58 = vld [vmem:[#allocation9 + $0xc8] ss:$16 sps:$4 sm:$0xff]   ;;  %v6854_v60 = vld [vmem:[#allocation9 + $0x100] ss:$16 sps:$4 sm:$0xff]   ;;  %p7699_p7 = pneg %p7698_p2  ;;  %p7703_p5 = scmp.lt.s32.totalorder %s8808_s18, %s7701_s17 }
 0x137   : > { %1790 = vmatpush1.bf16.msra.mxu0 %v6812_v21  ;;  %v542_v61 = vld [vmem:[%s8187_s26 + $0x50] sm:$0xff]  ;;  %v6862_v62 = vld [vmem:[#allocation9 + $0x124] ss:$16 sps:$4 sm:$0xff]   ;;  %v6851_v1 = vld [vmem:[#allocation9 + $0xe8] ss:$16 sps:$4 sm:$0xff]  }
 0x138   : > { %1791 = vmatprep.subr.bf16.mxu0 %v6820_v25  ;;  %v543_v63 = vld [vmem:[%s8187_s26 + $0x58] sm:$0xff]  ;;  %v6859_v2 = vld [vmem:[#allocation9 + $0x10c] ss:$16 sps:$4 sm:$0xff]   ;;  %v6860_v3 = vld [vmem:[#allocation9 + $0x120] ss:$16 sps:$4 sm:$0xff]  }
 0x139   : > { %2016 = vmatpush1.bf16.msra.mxu1 %v6815_v31  ;;  %v553_v4 = vpack.c.bf16 %v543_v63, %v542_v61  ;;  %v6857_v5 = vld [vmem:[#allocation9 + $0x108] ss:$16 sps:$4 sm:$0xff]   ;;  %v6868_v6 = vld [vmem:[#allocation9 + $0x144] ss:$16 sps:$4 sm:$0xff]   ;;  %v6865_v7 = vld [vmem:[#allocation9 + $0x12c] ss:$16 sps:$4 sm:$0xff]  }
 0x13a   : > { %5692 = vmatmul.mubr.msk.bf16.gmra.mrb[4].mxu0 %vm650_vm0, %v549_v23  ;;  %2017 = vmatprep.subr.bf16.mxu1 %v6823_v32  ;;  %v6866_v8 = vld [vmem:[#allocation9 + $0x140] ss:$16 sps:$4 sm:$0xff]   ;;  %v6874_v9 = vld [vmem:[#allocation9 + $0x164] ss:$16 sps:$4 sm:$0xff]   ;;  %v6863_v12 = vld [vmem:[#allocation9 + $0x128] ss:$16 sps:$4 sm:$0xff]  }
 0x13b   : > { %727 = vmatprep.mubr.bf16.mxu0 %v7800_v0  ;;  %1792 = vmatpush1.bf16.msra.mxu0 %v6818_v27  ;;  %v544_v10 = vld [vmem:[%s8187_s26 + $0x60] sm:$0xff]  ;;  %v545_v11 = vld [vmem:[%s8187_s26 + $0x68] sm:$0xff]  ;;  %v546_v21 = vld [vmem:[%s8187_s26 + $0x70] sm:$0xff] }
 0x13c   : > { %1793 = vmatprep.subr.bf16.mxu0 %v6826_v29  ;;  %5700 = vmatmul.mubr.msk.bf16.gmra.mrb[4].mxu1 %vm650_vm0, %v549_v23  ;;  %v6871_v13 = vld [vmem:[#allocation9 + $0x14c] ss:$16 sps:$4 sm:$0xff]   ;;  %v6872_v14 = vld [vmem:[#allocation9 + $0x160] ss:$16 sps:$4 sm:$0xff]   ;;  %v6880_v15 = vld [vmem:[#allocation9 + $0x184] ss:$16 sps:$4 sm:$0xff]   ;;  %v554_v16 = vpack.c.bf16 %v545_v11, %v544_v10 }
 0x13d   : > { %840 = vmatprep.mubr.bf16.mxu1 %v7800_v0  ;;  %2018 = vmatpush1.bf16.msra.mxu1 %v6821_v36  ;;  %v6869_v17 = vld [vmem:[#allocation9 + $0x148] ss:$16 sps:$4 sm:$0xff]   ;;  %v6877_v18 = vld [vmem:[#allocation9 + $0x16c] ss:$16 sps:$4 sm:$0xff]   ;;  %v6878_v19 = vld [vmem:[#allocation9 + $0x180] ss:$16 sps:$4 sm:$0xff]  }
 0x13e   : > { %2019 = vmatprep.subr.bf16.mxu1 %v6829_v37  ;;  %v6886_v20 = vld [vmem:[#allocation9 + $0x1a4] ss:$16 sps:$4 sm:$0xff]   ;;  %v6875_v23 = vld [vmem:[#allocation9 + $0x168] ss:$16 sps:$4 sm:$0xff]   ;;  %v6883_v24 = vld [vmem:[#allocation9 + $0x18c] ss:$16 sps:$4 sm:$0xff]  }
 0x13f   : > { %1794 = vmatpush1.bf16.msra.mxu0 %v6824_v33  ;;  %v547_v22 = vld [vmem:[%s8187_s26 + $0x78] sm:$0xff]  ;;  %v6884_v25 = vld [vmem:[#allocation9 + $0x1a0] ss:$16 sps:$4 sm:$0xff]   ;;  %v6889_v28 = vld [vmem:[#allocation9 + $0x1ac] ss:$16 sps:$4 sm:$0xff]   ;;  %s7702_s26 = scalar_lea.vmem %s7701_s17, 4096 }
 0x140   : > { %1795 = vmatprep.subr.bf16.mxu0 %v6832_v35  ;;  %v555_v26 = vpack.c.bf16 %v547_v22, %v546_v21  ;;  %v6881_v27 = vld [vmem:[#allocation9 + $0x188] ss:$16 sps:$4 sm:$0xff]   ;;  %v6892_v30 = vld [vmem:[#allocation9 + $0x1c4] ss:$16 sps:$4 sm:$0xff]   ;;  %v6895_v31 = vld [vmem:[#allocation9 + $0x1cc] ss:$16 sps:$4 sm:$0xff]   ;;  %p7704_p10 = scmp.lt.s32.totalorder %s7702_s26, %s7696_s24 }
 0x141   : > { %2020 = vmatpush1.bf16.msra.mxu1 %v6827_v42  ;;  %v6887_v29 = vld [vmem:[#allocation9 + $0x1a8] ss:$16 sps:$4 sm:$0xff]   ;;  %v6890_v32 = vld [vmem:[#allocation9 + $0x1c0] ss:$16 sps:$4 sm:$0xff]   ;;  %v6901_v35 = vld [vmem:[#allocation9 + $0x1ec] ss:$16 sps:$4 sm:$0xff]  }
 0x142   : > { %5693 = vmatmul.mubr.msk.bf16.gmra.mrb[8].mxu0 %vm650_vm0, %v550_v34  ;;  %2021 = vmatprep.subr.bf16.mxu1 %v6835_v43  ;;  %v6893_v33 = vld [vmem:[#allocation9 + $0x1c8] ss:$16 sps:$4 sm:$0xff]   ;;  %v6896_v36 = vld [vmem:[#allocation9 + $0x1e0] ss:$16 sps:$4 sm:$0xff]   ;;  %v568_v42 = vld [vmem:[#allocation8] sm:$0xf]  ;;  %p7705_p11 = por %p7704_p10, %p7703_p5 }
 0x143   : > { %737 = vmatprep.mubr.bf16.mxu0 %v7800_v0  ;;  %1796 = vmatpush1.bf16.msra.mxu0 %v6830_v38  ;;  %v6899_v37 = vld [vmem:[#allocation9 + $0x1e8] ss:$16 sps:$4 sm:$0xff]   ;;  %v6907_v38 = vld [vmem:[#allocation9 + $0x20c] ss:$16 sps:$4 sm:$0xff]  }
 0x144   : > { %1797 = vmatprep.subr.bf16.mxu0 %v6838_v40  ;;  %5701 = vmatmul.mubr.msk.bf16.gmra.mrb[8].mxu1 %vm650_vm0, %v550_v34  ;;  %v6898_v34 = vld [vmem:[#allocation9 + $0x1e4] ss:$16 sps:$4 sm:$0xff]   ;;  %v571_v40 = vshrl.u32 %v570_v39, 7  ;;  %p7706_p3 = pnand %p7705_p11, %p7699_p7 }
 0x145   : > { %850 = vmatprep.mubr.bf16.mxu1 %v7800_v0  ;;  %2022 = vmatpush1.bf16.msra.mxu1 %v6833_v47 }
 0x146   : > { %2023 = vmatprep.subr.bf16.mxu1 %v6841_v48  ;;  %v8261_v41 = vsub.s32 0, %v571_v40  ;;  %v8263_v43 = vsub.s32 1, %v571_v40 }
 0x147   : > { %1798 = vmatpush1.bf16.msra.mxu0 %v6836_v44 }
 0x148   : > { %1799 = vmatprep.subr.bf16.mxu0 %v6844_v46  ;;  %v8266_v44 = vrot.slane %v568_v42, %v8261_v41 }
 0x149   : > { %2024 = vmatpush1.bf16.msra.mxu1 %v6839_v53 }
 0x14a   : > { %5694 = vmatmul.mubr.msk.bf16.gmra.mrb[12].mxu0 %vm650_vm0, %v551_v45  ;;  %2025 = vmatprep.subr.bf16.mxu1 %v6847_v54  ;;  %v8276_v54 = vsub.s32 3, %v571_v40 }
 0x14b   : > { %747 = vmatprep.mubr.bf16.mxu0 %v7800_v0  ;;  %1800 = vmatpush1.bf16.msra.mxu0 %v6842_v49 }
 0x14c   : > { %1801 = vmatprep.subr.bf16.mxu0 %v6850_v51  ;;  %5702 = vmatmul.mubr.msk.bf16.gmra.mrb[12].mxu1 %vm650_vm0, %v551_v45  ;;  %v8269_v45 = vrot.slane %v568_v42, %v8263_v43  ;;  %v8273_v51 = vsub.s32 2, %v571_v40  ;;  %v6922_v40 = vld [vmem:[#allocation9 + $0x264] ss:$16 sps:$4 sm:$0xff]  }
 0x14d   : > { %860 = vmatprep.mubr.bf16.mxu1 %v7800_v0  ;;  %2026 = vmatpush1.bf16.msra.mxu1 %v6845_v58 }
 0x14e   : > { %2027 = vmatprep.subr.bf16.mxu1 %v6853_v59 }
 0x14f   : > { %1802 = vmatpush1.bf16.msra.mxu0 %v6848_v55 }
 0x150   : > { %1803 = vmatprep.subr.bf16.mxu0 %v6856_v57 }
 0x151   : > { %2028 = vmatpush1.bf16.msra.mxu1 %v6851_v1 }
 0x152   : > { %5695 = vmatmul.mubr.msk.bf16.gmra.mrb[16].mxu0 %vm650_vm0, %v552_v56  ;;  %2029 = vmatprep.subr.bf16.mxu1 %v6859_v2  ;;  %v6902_v2 = vld [vmem:[#allocation9 + $0x200] ss:$16 sps:$4 sm:$0xff]  }
 0x153   : > { %757 = vmatprep.mubr.bf16.mxu0 %v7800_v0  ;;  %1804 = vmatpush1.bf16.msra.mxu0 %v6854_v60  ;;  %v8280_v60 = vrot.slane %v568_v42, %v8273_v51 }
 0x154   : > { %1805 = vmatprep.subr.bf16.mxu0 %v6862_v62  ;;  %5703 = vmatmul.mubr.msk.bf16.gmra.mrb[16].mxu1 %vm650_vm0, %v552_v56  ;;  %v8283_v62 = vrot.slane %v568_v42, %v8276_v54  ;;  %v6925_v42 = vld [vmem:[#allocation9 + $0x26c] ss:$16 sps:$4 sm:$0xff]  }
 0x155   : > { %870 = vmatprep.mubr.bf16.mxu1 %v7800_v0  ;;  %2030 = vmatpush1.bf16.msra.mxu1 %v6857_v5 }
 0x156   : > { %2031 = vmatprep.subr.bf16.mxu1 %v6865_v7  ;;  %v6913_v7 = vld [vmem:[#allocation9 + $0x22c] ss:$16 sps:$4 sm:$0xff]  }
 0x157   : > { %1806 = vmatpush1.bf16.msra.mxu0 %v6860_v3  ;;  %v6905_v3 = vld [vmem:[#allocation9 + $0x208] ss:$16 sps:$4 sm:$0xff]  }
 0x158   : > { %1807 = vmatprep.subr.bf16.mxu0 %v6868_v6  ;;  %v6910_v6 = vld [vmem:[#allocation9 + $0x224] ss:$16 sps:$4 sm:$0xff]  }
 0x159   : > { %2032 = vmatpush1.bf16.msra.mxu1 %v6863_v12 }
 0x15a   : > { %5696 = vmatmul.mubr.msk.bf16.gmra.mrb[20].mxu0 %vm650_vm0, %v553_v4  ;;  %2033 = vmatprep.subr.bf16.mxu1 %v6871_v13 }
 0x15b   : > { %767 = vmatprep.mubr.bf16.mxu0 %v7800_v0  ;;  %1808 = vmatpush1.bf16.msra.mxu0 %v6866_v8 }
 0x15c   : > { %1809 = vmatprep.subr.bf16.mxu0 %v6874_v9  ;;  %5704 = vmatmul.mubr.msk.bf16.gmra.mrb[20].mxu1 %vm650_vm0, %v553_v4 }
 0x15d   : > { %880 = vmatprep.mubr.bf16.mxu1 %v7800_v0  ;;  %2034 = vmatpush1.bf16.msra.mxu1 %v6869_v17 }
 0x15e   : > { %2035 = vmatprep.subr.bf16.mxu1 %v6877_v18 }
 0x15f   : > { %1810 = vmatpush1.bf16.msra.mxu0 %v6872_v14 }
 0x160   : > { %1811 = vmatprep.subr.bf16.mxu0 %v6880_v15  ;;  %v6908_v15 = vld [vmem:[#allocation9 + $0x220] ss:$16 sps:$4 sm:$0xff]  }
 0x161   : > { %2036 = vmatpush1.bf16.msra.mxu1 %v6875_v23 }
 0x162   : > { %5697 = vmatmul.mubr.msk.bf16.gmra.mrb[24].mxu0 %vm650_vm0, %v554_v16  ;;  %2037 = vmatprep.subr.bf16.mxu1 %v6883_v24 }
 0x163   : > { %777 = vmatprep.mubr.bf16.mxu0 %v7800_v0  ;;  %1812 = vmatpush1.bf16.msra.mxu0 %v6878_v19  ;;  %v6911_v19 = vld [vmem:[#allocation9 + $0x228] ss:$16 sps:$4 sm:$0xff]  }
 0x164   : > { %1813 = vmatprep.subr.bf16.mxu0 %v6886_v20  ;;  %5705 = vmatmul.mubr.msk.bf16.gmra.mrb[24].mxu1 %vm650_vm0, %v554_v16  ;;  %v6916_v20 = vld [vmem:[#allocation9 + $0x244] ss:$16 sps:$4 sm:$0xff]  }
 0x165   : > { %890 = vmatprep.mubr.bf16.mxu1 %v7800_v0  ;;  %2038 = vmatpush1.bf16.msra.mxu1 %v6881_v27  ;;  %v6904_v0 = vld [vmem:[#allocation9 + $0x204] ss:$16 sps:$4 sm:$0xff]  }
 0x166   : > { %2039 = vmatprep.subr.bf16.mxu1 %v6889_v28 }
 0x167   : > { %1814 = vmatpush1.bf16.msra.mxu0 %v6884_v25 }
 0x168   : > { %1815 = vmatprep.subr.bf16.mxu0 %v6892_v30 }
 0x169   : > { %2040 = vmatpush1.bf16.msra.mxu1 %v6887_v29 }
 0x16a   : > { %5698 = vmatmul.mubr.msk.bf16.gmra.mrb[28].mxu0 %vm650_vm0, %v555_v26  ;;  %2041 = vmatprep.subr.bf16.mxu1 %v6895_v31 }
 0x16b   : > { %1816 = vmatpush1.bf16.msra.mxu0 %v6890_v32 }
 0x16c   : > { %5706 = vmatmul.mubr.msk.bf16.gmra.mrb[28].mxu1 %vm650_vm0, %v555_v26  ;;  %1817 = vmatprep.subr.bf16.mxu0 %v6898_v34  ;;  %v6919_v26 = vld [vmem:[#allocation9 + $0x24c] ss:$16 sps:$4 sm:$0xff]  }
 0x16d   : > { %2042 = vmatpush1.bf16.msra.mxu1 %v6893_v33 }
 0x16e   : > { %2043 = vmatprep.subr.bf16.mxu1 %v6901_v35 }
 0x16f   : > { %1818 = vmatpush1.bf16.msra.mxu0 %v6896_v36  ;;  %v6914_v36 = vld [vmem:[#allocation9 + $0x240] ss:$16 sps:$4 sm:$0xff]  }
 0x170   : > { %1900 = vmatprep.subr.bf16.mxu0 %v6904_v0 }
 0x171   : > { %2044 = vmatpush1.bf16.msra.mxu1 %v6899_v37  ;;  %v6917_v37 = vld [vmem:[#allocation9 + $0x248] ss:$16 sps:$4 sm:$0xff]  }
 0x172   : > { %2126 = vmatprep.subr.bf16.mxu1 %v6907_v38 }
 0x205   : > { %v709_v46 = vpop.f32.mrb[0].mxu0  ;;  %v822_v8 = vpop.f32.mrb[0].mxu1 }
 0x206   : > { %v710_v47 = vadd.f32 %v709_v46, %v8266_v44  ;;  %v711_v48 = vpop.f32.mrb[1].mxu0  ;;  %v823_v11 = vadd.f32 %v822_v8, %v8280_v60  ;;  %v824_v12 = vpop.f32.mrb[1].mxu1 }
 0x207   : > { %v712_v49 = vadd.f32 %v711_v48, %v8269_v45  ;;  %v713_v50 = vpop.f32.mrb[2].mxu0  ;;  %v825_v16 = vadd.f32 %v824_v12, %v8283_v62  ;;  %v826_v17 = vpop.f32.mrb[2].mxu1 }
 0x208   : > { %v714_v52 = vadd.f32 %v713_v50, %v8266_v44  ;;  %v715_v53 = vpop.f32.mrb[3].mxu0  ;;  %v901_v56 = vmax.f32 %v710_v47, 0.0  ;;  %v903_v21 = vmax.f32 %v823_v11, 0.0  ;;  %v827_v22 = vadd.f32 %v826_v17, %v8280_v60  ;;  %v828_v23 = vpop.f32.mrb[3].mxu1  ;;  %v6929_v17 = vld [vmem:[#allocation9 + $0x288] ss:$16 sps:$4 sm:$0xff]  }
 0x209   : > { %v716_v55 = vadd.f32 %v715_v53, %v8269_v45  ;;  %v902_v58 = vmax.f32 %v712_v49, 0.0  ;;  %v904_v27 = vmax.f32 %v825_v16, 0.0  ;;  %v829_v28 = vadd.f32 %v828_v23, %v8283_v62  ;;  %v6926_v16 = vld [vmem:[#allocation9 + $0x280] ss:$16 sps:$4 sm:$0xff]  }
 0x20a   : > { %v905_v57 = vmax.f32 %v714_v52, 0.0  ;;  %v907_v31 = vmax.f32 %v827_v22, 0.0  ;;  %v6937_v22 = vld [vmem:[#allocation9 + $0x2ac] ss:$16 sps:$4 sm:$0xff]  }
 0x20b   : > { %v906_v59 = vmax.f32 %v716_v55, 0.0  ;;  %v908_v33 = vmax.f32 %v829_v28, 0.0 }
 0x20c   : > { %v965_v61 = vpack.c.bf16 %v905_v57, %v901_v56  ;;  %v8293_v0 = vpack.c.bf16 %v907_v31, %v903_v21  ;;  %v6920_v56 = vld [vmem:[#allocation9 + $0x260] ss:$16 sps:$4 sm:$0xff]   ;;  %v6934_v21 = vld [vmem:[#allocation9 + $0x2a4] ss:$16 sps:$4 sm:$0xff]  }
 0x20d   : > { %v966_v63 = vpack.c.bf16 %v906_v59, %v902_v58  ;;  %v719_v1 = vpop.f32.mrb[4].mxu0  ;;  %v8296_v46 = vpack.c.bf16 %v908_v33, %v904_v27  ;;  %v6932_v31 = vld [vmem:[#allocation9 + $0x2a0] ss:$16 sps:$4 sm:$0xff]  }
 0x20e   : > { %v720_v4 = vadd.f32 %v719_v1, %v8266_v44  ;;  %v721_v5 = vpop.f32.mrb[5].mxu0 }
 0x20f   : > { %v722_v9 = vadd.f32 %v721_v5, %v8269_v45  ;;  %v723_v10 = vpop.f32.mrb[6].mxu0  ;;  %1819 = vmatprep.mubr.bf16.mxu0 %v966_v63  ;;  %2045 = vmatprep.mubr.bf16.mxu1 %v966_v63  ;;  %v832_v47 = vpop.f32.mrb[4].mxu1  ;;  %v6928_v63 = vld [vmem:[#allocation9 + $0x284] ss:$16 sps:$4 sm:$0xff]  }
 0x210   : > { %v724_v13 = vadd.f32 %v723_v10, %v8266_v44  ;;  %v725_v14 = vpop.f32.mrb[7].mxu0  ;;  %1820 = vmatmul.mubr.bf16.vlgmr.msra.gmra.mrb[32].mxu0 %v965_v61  ;;  %2046 = vmatmul.mubr.bf16.vlgmr.msra.gmra.mrb[32].mxu1 %v965_v61  ;;  %v909_v24 = vmax.f32 %v720_v4, 0.0  ;;  %v833_v50 = vadd.f32 %v832_v47, %v8280_v60  ;;  %v834_v52 = vpop.f32.mrb[5].mxu1  ;;  %v6923_v61 = vld [vmem:[#allocation9 + $0x268] ss:$16 sps:$4 sm:$0xff]  }
 0x211   : > { %v726_v18 = vadd.f32 %v725_v14, %v8269_v45  ;;  %1901 = vmatpush1.bf16.msra.mxu0 %v6902_v2  ;;  %2127 = vmatpush1.bf16.msra.mxu1 %v6905_v3  ;;  %v910_v29 = vmax.f32 %v722_v9, 0.0  ;;  %v835_v57 = vadd.f32 %v834_v52, %v8283_v62  ;;  %v836_v58 = vpop.f32.mrb[6].mxu1  ;;  %v6943_v47 = vld [vmem:[#allocation9 + $0x2cc] ss:$16 sps:$4 sm:$0xff]  }
 0x212   : > { %v913_v25 = vmax.f32 %v724_v13, 0.0  ;;  %1902 = vmatprep.subr.bf16.mxu0 %v6910_v6  ;;  %2128 = vmatprep.subr.bf16.mxu1 %v6913_v7  ;;  %v911_v1 = vmax.f32 %v833_v50, 0.0  ;;  %v837_v2 = vadd.f32 %v836_v58, %v8280_v60  ;;  %v838_v3 = vpop.f32.mrb[7].mxu1  ;;  %v6931_v6 = vld [vmem:[#allocation9 + $0x28c] ss:$16 sps:$4 sm:$0xff]  }
 0x213   : > { %v914_v30 = vmax.f32 %v726_v18, 0.0  ;;  %v912_v7 = vmax.f32 %v835_v57, 0.0  ;;  %v839_v8 = vadd.f32 %v838_v3, %v8283_v62  ;;  %v6946_v3 = vld [vmem:[#allocation9 + $0x2e4] ss:$16 sps:$4 sm:$0xff]  }
 0x214   : > { %v969_v32 = vpack.c.bf16 %v913_v25, %v909_v24  ;;  %v915_v11 = vmax.f32 %v837_v2, 0.0 }
 0x215   : > { %v970_v34 = vpack.c.bf16 %v914_v30, %v910_v29  ;;  %1903 = vmatpush1.bf16.msra.mxu0 %v6908_v15  ;;  %v729_v35 = vpop.f32.mrb[8].mxu0  ;;  %2129 = vmatpush1.bf16.msra.mxu1 %v6911_v19  ;;  %v916_v13 = vmax.f32 %v839_v8, 0.0 }
 0x216   : > { %v730_v38 = vadd.f32 %v729_v35, %v8266_v44  ;;  %v731_v39 = vpop.f32.mrb[9].mxu0  ;;  %1904 = vmatprep.subr.bf16.mxu0 %v6916_v20  ;;  %2130 = vmatprep.subr.bf16.mxu1 %v6919_v26  ;;  %v8305_v18 = vpack.c.bf16 %v915_v11, %v911_v1  ;;  %v6935_v35 = vld [vmem:[#allocation9 + $0x2a8] ss:$16 sps:$4 sm:$0xff]  }
 0x217   : > { %v732_v48 = vadd.f32 %v731_v39, %v8269_v45  ;;  %v733_v49 = vpop.f32.mrb[10].mxu0  ;;  %1829 = vmatprep.mubr.bf16.mxu0 %v970_v34  ;;  %2055 = vmatprep.mubr.bf16.mxu1 %v970_v34  ;;  %v8308_v23 = vpack.c.bf16 %v916_v13, %v912_v7  ;;  %v842_v24 = vpop.f32.mrb[8].mxu1  ;;  %v6944_v13 = vld [vmem:[#allocation9 + $0x2e0] ss:$16 sps:$4 sm:$0xff]  }
 0x218   : > { %v734_v53 = vadd.f32 %v733_v49, %v8266_v44  ;;  %v735_v55 = vpop.f32.mrb[11].mxu0  ;;  %1830 = vmatmul.mubr.bf16.gmra.mrb[36].mxu0 %v969_v32  ;;  %2056 = vmatmul.mubr.bf16.gmra.mrb[36].mxu1 %v969_v32  ;;  %v917_v4 = vmax.f32 %v730_v38, 0.0  ;;  %v843_v27 = vadd.f32 %v842_v24, %v8280_v60  ;;  %v844_v28 = vpop.f32.mrb[9].mxu1 }
 0x219   : > { %v736_v59 = vadd.f32 %v735_v55, %v8269_v45  ;;  %1905 = vmatpush1.bf16.msra.mxu0 %v6914_v36  ;;  %2131 = vmatpush1.bf16.msra.mxu1 %v6917_v37  ;;  %v918_v9 = vmax.f32 %v732_v48, 0.0  ;;  %v845_v32 = vadd.f32 %v844_v28, %v8283_v62  ;;  %v846_v33 = vpop.f32.mrb[10].mxu1  ;;  %v6940_v36 = vld [vmem:[#allocation9 + $0x2c4] ss:$16 sps:$4 sm:$0xff]  }
 0x21a   : > { %v921_v5 = vmax.f32 %v734_v53, 0.0  ;;  %1906 = vmatprep.subr.bf16.mxu0 %v6922_v40  ;;  %2132 = vmatprep.subr.bf16.mxu1 %v6925_v42  ;;  %v919_v37 = vmax.f32 %v843_v27, 0.0  ;;  %v847_v38 = vadd.f32 %v846_v33, %v8280_v60  ;;  %v848_v39 = vpop.f32.mrb[11].mxu1 }
 0x21b   : > { %v922_v10 = vmax.f32 %v736_v59, 0.0  ;;  %v920_v48 = vmax.f32 %v845_v32, 0.0  ;;  %v849_v49 = vadd.f32 %v848_v39, %v8283_v62  ;;  %v6938_v59 = vld [vmem:[#allocation9 + $0x2c0] ss:$16 sps:$4 sm:$0xff]  }
 0x21c   : > { %v973_v12 = vpack.c.bf16 %v921_v5, %v917_v4  ;;  %v923_v53 = vmax.f32 %v847_v38, 0.0  ;;  %v6949_v4 = vld [vmem:[#allocation9 + $0x2ec] ss:$16 sps:$4 sm:$0xff]  }
 0x21d   : > { %v974_v14 = vpack.c.bf16 %v922_v10, %v918_v9  ;;  %1907 = vmatpush1.bf16.msra.mxu0 %v6920_v56  ;;  %v739_v15 = vpop.f32.mrb[12].mxu0  ;;  %2133 = vmatpush1.bf16.msra.mxu1 %v6923_v61  ;;  %v924_v56 = vmax.f32 %v849_v49, 0.0  ;;  %v6941_v61 = vld [vmem:[#allocation9 + $0x2c8] ss:$16 sps:$4 sm:$0xff]  }
 0x21e   : > { %v740_v19 = vadd.f32 %v739_v15, %v8266_v44  ;;  %v741_v20 = vpop.f32.mrb[13].mxu0  ;;  %1908 = vmatprep.subr.bf16.mxu0 %v6928_v63  ;;  %2134 = vmatprep.subr.bf16.mxu1 %v6931_v6  ;;  %v8317_v63 = vpack.c.bf16 %v923_v53, %v919_v37  ;;  %v6953_v37 = vld [vmem:[#allocation9 + $0x308] ss:$16 sps:$4 sm:$0xff]  }
 0x21f   : > { %v742_v25 = vadd.f32 %v741_v20, %v8269_v45  ;;  %v743_v26 = vpop.f32.mrb[14].mxu0  ;;  %1839 = vmatprep.mubr.bf16.mxu0 %v974_v14  ;;  %2065 = vmatprep.mubr.bf16.mxu1 %v974_v14  ;;  %v8320_v5 = vpack.c.bf16 %v924_v56, %v920_v48  ;;  %v852_v6 = vpop.f32.mrb[12].mxu1 }
 0x220   : > { %v744_v29 = vadd.f32 %v743_v26, %v8266_v44  ;;  %v745_v30 = vpop.f32.mrb[15].mxu0  ;;  %1840 = vmatmul.mubr.bf16.gmra.mrb[40].mxu0 %v973_v12  ;;  %2066 = vmatmul.mubr.bf16.gmra.mrb[40].mxu1 %v973_v12  ;;  %v925_v40 = vmax.f32 %v740_v19, 0.0  ;;  %v853_v9 = vadd.f32 %v852_v6, %v8280_v60  ;;  %v854_v10 = vpop.f32.mrb[13].mxu1  ;;  %v6952_v19 = vld [vmem:[#allocation9 + $0x304] ss:$16 sps:$4 sm:$0xff]  }
 0x221   : > { %v746_v34 = vadd.f32 %v745_v30, %v8269_v45  ;;  %1909 = vmatpush1.bf16.msra.mxu0 %v6926_v16  ;;  %2135 = vmatpush1.bf16.msra.mxu1 %v6929_v17  ;;  %v926_v50 = vmax.f32 %v742_v25, 0.0  ;;  %v855_v14 = vadd.f32 %v854_v10, %v8283_v62  ;;  %v856_v15 = vpop.f32.mrb[14].mxu1  ;;  %v6947_v17 = vld [vmem:[#allocation9 + $0x2e8] ss:$16 sps:$4 sm:$0xff]   ;;  %v6955_v26 = vld [vmem:[#allocation9 + $0x30c] ss:$16 sps:$4 sm:$0xff]  }
 0x222   : > { %v929_v42 = vmax.f32 %v744_v29, 0.0  ;;  %1910 = vmatprep.subr.bf16.mxu0 %v6934_v21  ;;  %2136 = vmatprep.subr.bf16.mxu1 %v6937_v22  ;;  %v927_v20 = vmax.f32 %v853_v9, 0.0  ;;  %v857_v21 = vadd.f32 %v856_v15, %v8280_v60  ;;  %v858_v22 = vpop.f32.mrb[15].mxu1  ;;  %v6967_v10 = vld [vmem:[#allocation9 + $0x34c] ss:$16 sps:$4 sm:$0xff]  }
 0x223   : > { %v930_v52 = vmax.f32 %v746_v34, 0.0  ;;  %v928_v27 = vmax.f32 %v855_v14, 0.0  ;;  %v859_v28 = vadd.f32 %v858_v22, %v8283_v62  ;;  %v6965_v22 = vld [vmem:[#allocation9 + $0x348] ss:$16 sps:$4 sm:$0xff]  }
 0x224   : > { %v977_v55 = vpack.c.bf16 %v929_v42, %v925_v40  ;;  %v6958_v42 = vld [vmem:[#allocation9 + $0x324] ss:$16 sps:$4 sm:$0xff]  }
 0x225   : > { %v978_v57 = vpack.c.bf16 %v930_v52, %v926_v50  ;;  %1911 = vmatpush1.bf16.msra.mxu0 %v6932_v31  ;;  %v749_v58 = vpop.f32.mrb[16].mxu0  ;;  %2137 = vmatpush1.bf16.msra.mxu1 %v6935_v35  ;;  %v931_v31 = vmax.f32 %v857_v21, 0.0  ;;  %v932_v33 = vmax.f32 %v859_v28, 0.0  ;;  %v6962_v21 = vld [vmem:[#allocation9 + $0x340] ss:$16 sps:$4 sm:$0xff]  }
 0x226   : > { %v750_v1 = vadd.f32 %v749_v58, %v8266_v44  ;;  %v751_v2 = vpop.f32.mrb[17].mxu0  ;;  %1912 = vmatprep.subr.bf16.mxu0 %v6940_v36  ;;  %2138 = vmatprep.subr.bf16.mxu1 %v6943_v47  ;;  %v6950_v36 = vld [vmem:[#allocation9 + $0x300] ss:$16 sps:$4 sm:$0xff]   ;;  %v6961_v47 = vld [vmem:[#allocation9 + $0x32c] ss:$16 sps:$4 sm:$0xff]  }
 0x227   : > { %v752_v7 = vadd.f32 %v751_v2, %v8269_v45  ;;  %v753_v8 = vpop.f32.mrb[18].mxu0  ;;  %1849 = vmatprep.mubr.bf16.mxu0 %v978_v57  ;;  %2075 = vmatprep.mubr.bf16.mxu1 %v978_v57  ;;  %v8329_v38 = vpack.c.bf16 %v931_v31, %v927_v20  ;;  %v8332_v48 = vpack.c.bf16 %v932_v33, %v928_v27  ;;  %v862_v49 = vpop.f32.mrb[16].mxu1  ;;  %v6956_v58 = vld [vmem:[#allocation9 + $0x320] ss:$16 sps:$4 sm:$0xff]   ;;  %v6959_v2 = vld [vmem:[#allocation9 + $0x328] ss:$16 sps:$4 sm:$0xff]  }
 0x228   : > { %v754_v11 = vadd.f32 %v753_v8, %v8266_v44  ;;  %v755_v12 = vpop.f32.mrb[19].mxu0  ;;  %1850 = vmatmul.mubr.bf16.gmra.mrb[44].mxu0 %v977_v55  ;;  %2076 = vmatmul.mubr.bf16.gmra.mrb[44].mxu1 %v977_v55  ;;  %v933_v24 = vmax.f32 %v750_v1, 0.0  ;;  %v863_v53 = vadd.f32 %v862_v49, %v8280_v60  ;;  %v864_v55 = vpop.f32.mrb[17].mxu1  ;;  %v6970_v27 = vld [vmem:[#allocation9 + $0x364] ss:$16 sps:$4 sm:$0xff]  }
 0x229   : > { %v756_v16 = vadd.f32 %v755_v12, %v8269_v45  ;;  %1913 = vmatpush1.bf16.msra.mxu0 %v6938_v59  ;;  %2139 = vmatpush1.bf16.msra.mxu1 %v6941_v61  ;;  %v934_v29 = vmax.f32 %v752_v7, 0.0  ;;  %v865_v59 = vadd.f32 %v864_v55, %v8283_v62  ;;  %v866_v61 = vpop.f32.mrb[18].mxu1  ;;  %v6973_v28 = vld [vmem:[#allocation9 + $0x36c] ss:$16 sps:$4 sm:$0xff]   ;;  %v6976_v49 = vld [vmem:[#allocation9 + $0x384] ss:$16 sps:$4 sm:$0xff]  }
 0x22a   : > { %v937_v25 = vmax.f32 %v754_v11, 0.0  ;;  %1914 = vmatprep.subr.bf16.mxu0 %v6946_v3  ;;  %2140 = vmatprep.subr.bf16.mxu1 %v6949_v4  ;;  %v6964_v3 = vld [vmem:[#allocation9 + $0x344] ss:$16 sps:$4 sm:$0xff]   ;;  %v935_v4 = vmax.f32 %v863_v53, 0.0  ;;  %v867_v6 = vadd.f32 %v866_v61, %v8280_v60  ;;  %v868_v7 = vpop.f32.mrb[19].mxu1 }
 0x22b   : > { %v938_v30 = vmax.f32 %v756_v16, 0.0  ;;  %v936_v11 = vmax.f32 %v865_v59, 0.0  ;;  %v869_v12 = vadd.f32 %v868_v7, %v8283_v62 }
 0x22c   : > { %v981_v32 = vpack.c.bf16 %v937_v25, %v933_v24  ;;  %v939_v15 = vmax.f32 %v867_v6, 0.0 }
 0x22d   : > { %v982_v34 = vpack.c.bf16 %v938_v30, %v934_v29  ;;  %1915 = vmatpush1.bf16.msra.mxu0 %v6944_v13  ;;  %v759_v35 = vpop.f32.mrb[20].mxu0  ;;  %2141 = vmatpush1.bf16.msra.mxu1 %v6947_v17  ;;  %v940_v17 = vmax.f32 %v869_v12, 0.0 }
 0x22e   : > { %v760_v39 = vadd.f32 %v759_v35, %v8266_v44  ;;  %v761_v40 = vpop.f32.mrb[21].mxu0  ;;  %1916 = vmatprep.subr.bf16.mxu0 %v6952_v19  ;;  %2142 = vmatprep.subr.bf16.mxu1 %v6955_v26  ;;  %v8341_v24 = vpack.c.bf16 %v939_v15, %v935_v4 }
 0x22f   : > { %v762_v50 = vadd.f32 %v761_v40, %v8269_v45  ;;  %v763_v52 = vpop.f32.mrb[22].mxu0  ;;  %1859 = vmatprep.mubr.bf16.mxu0 %v982_v34  ;;  %2085 = vmatprep.mubr.bf16.mxu1 %v982_v34  ;;  %v8344_v29 = vpack.c.bf16 %v940_v17, %v936_v11  ;;  %v872_v30 = vpop.f32.mrb[20].mxu1 }
 0x230   : > { %v764_v56 = vadd.f32 %v763_v52, %v8266_v44  ;;  %v765_v57 = vpop.f32.mrb[23].mxu0  ;;  %1860 = vmatmul.mubr.bf16.gmra.mrb[48].mxu0 %v981_v32  ;;  %2086 = vmatmul.mubr.bf16.gmra.mrb[48].mxu1 %v981_v32  ;;  %v941_v8 = vmax.f32 %v760_v39, 0.0  ;;  %v873_v33 = vadd.f32 %v872_v30, %v8280_v60  ;;  %v874_v34 = vpop.f32.mrb[21].mxu1 }
 0x231   : > { %v766_v1 = vadd.f32 %v765_v57, %v8269_v45  ;;  %1917 = vmatpush1.bf16.msra.mxu0 %v6950_v36  ;;  %2143 = vmatpush1.bf16.msra.mxu1 %v6953_v37  ;;  %v942_v13 = vmax.f32 %v762_v50, 0.0  ;;  %v6968_v37 = vld [vmem:[#allocation9 + $0x360] ss:$16 sps:$4 sm:$0xff]   ;;  %v875_v39 = vadd.f32 %v874_v34, %v8283_v62  ;;  %v876_v40 = vpop.f32.mrb[22].mxu1  ;;  %v6979_v57 = vld [vmem:[#allocation9 + $0x38c] ss:$16 sps:$4 sm:$0xff]  }
 0x232   : > { %v945_v9 = vmax.f32 %v764_v56, 0.0  ;;  %1918 = vmatprep.subr.bf16.mxu0 %v6958_v42  ;;  %2144 = vmatprep.subr.bf16.mxu1 %v6961_v47  ;;  %v6971_v47 = vld [vmem:[#allocation9 + $0x368] ss:$16 sps:$4 sm:$0xff]   ;;  %v943_v50 = vmax.f32 %v873_v33, 0.0  ;;  %v877_v52 = vadd.f32 %v876_v40, %v8280_v60  ;;  %v878_v53 = vpop.f32.mrb[23].mxu1 }
 0x233   : > { %v946_v14 = vmax.f32 %v766_v1, 0.0  ;;  %v879_v59 = vadd.f32 %v878_v53, %v8283_v62  ;;  %v6986_v53 = vld [vmem:[#allocation9 + $0x3c0] ss:$16 sps:$4 sm:$0xff]  }
 0x234   : > { %v985_v16 = vpack.c.bf16 %v945_v9, %v941_v8  ;;  %v6974_v8 = vld [vmem:[#allocation9 + $0x380] ss:$16 sps:$4 sm:$0xff]   ;;  %v6977_v9 = vld [vmem:[#allocation9 + $0x388] ss:$16 sps:$4 sm:$0xff]  }
 0x235   : > { %v986_v19 = vpack.c.bf16 %v946_v14, %v942_v13  ;;  %1919 = vmatpush1.bf16.msra.mxu0 %v6956_v58  ;;  %v769_v20 = vpop.f32.mrb[24].mxu0  ;;  %2145 = vmatpush1.bf16.msra.mxu1 %v6959_v2  ;;  %v944_v58 = vmax.f32 %v875_v39, 0.0  ;;  %v947_v2 = vmax.f32 %v877_v52, 0.0  ;;  %v948_v4 = vmax.f32 %v879_v59, 0.0  ;;  %v6982_v13 = vld [vmem:[#allocation9 + $0x3a4] ss:$16 sps:$4 sm:$0xff]  }
 0x236   : > { %v770_v25 = vadd.f32 %v769_v20, %v8266_v44  ;;  %v771_v26 = vpop.f32.mrb[25].mxu0  ;;  %1920 = vmatprep.subr.bf16.mxu0 %v6964_v3  ;;  %2146 = vmatprep.subr.bf16.mxu1 %v6967_v10  ;;  %v6985_v14 = vld [vmem:[#allocation9 + $0x3ac] ss:$16 sps:$4 sm:$0xff]  }
 0x237   : > { %v772_v31 = vadd.f32 %v771_v26, %v8269_v45  ;;  %v773_v32 = vpop.f32.mrb[26].mxu0  ;;  %1869 = vmatprep.mubr.bf16.mxu0 %v986_v19  ;;  %2095 = vmatprep.mubr.bf16.mxu1 %v986_v19  ;;  %v8353_v10 = vpack.c.bf16 %v947_v2, %v943_v50  ;;  %v8356_v15 = vpack.c.bf16 %v948_v4, %v944_v58  ;;  %v6980_v26 = vld [vmem:[#allocation9 + $0x3a0] ss:$16 sps:$4 sm:$0xff]  }
 0x238   : > { %v774_v35 = vadd.f32 %v773_v32, %v8266_v44  ;;  %v775_v36 = vpop.f32.mrb[27].mxu0  ;;  %1870 = vmatmul.mubr.bf16.gmra.mrb[52].mxu0 %v985_v16  ;;  %2096 = vmatmul.mubr.bf16.gmra.mrb[52].mxu1 %v985_v16  ;;  %v949_v55 = vmax.f32 %v770_v25, 0.0  ;;  %v882_v16 = vpop.f32.mrb[24].mxu1  ;;  %v6988_v32 = vld [vmem:[#allocation9 + $0x3c4] ss:$16 sps:$4 sm:$0xff]  }
 0x239   : > { %v776_v42 = vadd.f32 %v775_v36, %v8269_v45  ;;  %1921 = vmatpush1.bf16.msra.mxu0 %v6962_v21  ;;  %2147 = vmatpush1.bf16.msra.mxu1 %v6965_v22  ;;  %v950_v61 = vmax.f32 %v772_v31, 0.0  ;;  %v883_v20 = vadd.f32 %v882_v16, %v8280_v60  ;;  %v884_v21 = vpop.f32.mrb[25].mxu1  ;;  %v6983_v31 = vld [vmem:[#allocation9 + $0x3a8] ss:$16 sps:$4 sm:$0xff]   ;;  %v7003_v16 = vld [vmem:[#allocation12 + $0xc] ss:$16 sps:$4 sm:$0xff]  }
 0x23a   : > { %v953_v56 = vmax.f32 %v774_v35, 0.0  ;;  %1922 = vmatprep.subr.bf16.mxu0 %v6970_v27  ;;  %2148 = vmatprep.subr.bf16.mxu1 %v6973_v28  ;;  %v885_v27 = vadd.f32 %v884_v21, %v8283_v62  ;;  %v886_v28 = vpop.f32.mrb[26].mxu1 }
 0x23b   : > { %v954_v1 = vmax.f32 %v776_v42, 0.0  ;;  %v951_v33 = vmax.f32 %v883_v20, 0.0  ;;  %v887_v34 = vadd.f32 %v886_v28, %v8280_v60  ;;  %v888_v35 = vpop.f32.mrb[27].mxu1  ;;  %v7015_v28 = vld [vmem:[#allocation12 + $0x4c] ss:$16 sps:$4 sm:$0xff]  }
 0x23c   : > { %v989_v3 = vpack.c.bf16 %v953_v56, %v949_v55  ;;  %v952_v39 = vmax.f32 %v885_v27, 0.0  ;;  %v889_v40 = vadd.f32 %v888_v35, %v8283_v62  ;;  %v6989_v55 = vld [vmem:[#allocation9 + $0x3c8] ss:$16 sps:$4 sm:$0xff]   ;;  %v7027_v35 = vld [vmem:[#allocation12 + $0x8c] ss:$16 sps:$4 sm:$0xff]  }
 0x23d   : > { %v990_v6 = vpack.c.bf16 %v954_v1, %v950_v61  ;;  %1923 = vmatpush1.bf16.msra.mxu0 %v6968_v37  ;;  %v779_v7 = vpop.f32.mrb[28].mxu0  ;;  %2149 = vmatpush1.bf16.msra.mxu1 %v6971_v47  ;;  %v6997_v61 = vld [vmem:[#allocation9 + $0x3ec] ss:$16 sps:$4 sm:$0xff]   ;;  %v7012_v27 = vld [vmem:[#allocation12 + $0x44] ss:$16 sps:$4 sm:$0xff]  }
 0x23e   : > { %v780_v11 = vadd.f32 %v779_v7, %v8266_v44  ;;  %v781_v12 = vpop.f32.mrb[29].mxu0  ;;  %1924 = vmatprep.subr.bf16.mxu0 %v6976_v49  ;;  %2150 = vmatprep.subr.bf16.mxu1 %v6979_v57  ;;  %v955_v49 = vmax.f32 %v887_v34, 0.0  ;;  %v956_v50 = vmax.f32 %v889_v40, 0.0  ;;  %v6994_v57 = vld [vmem:[#allocation9 + $0x3e4] ss:$16 sps:$4 sm:$0xff]  }
 0x23f   : > { %v782_v17 = vadd.f32 %v781_v12, %v8269_v45  ;;  %v783_v19 = vpop.f32.mrb[30].mxu0  ;;  %1879 = vmatprep.mubr.bf16.mxu0 %v990_v6  ;;  %2105 = vmatprep.mubr.bf16.mxu1 %v990_v6  ;;  %v892_v59 = vpop.f32.mrb[28].mxu1  ;;  %v6992_v6 = vld [vmem:[#allocation9 + $0x3e0] ss:$16 sps:$4 sm:$0xff]   ;;  %v6995_v7 = vld [vmem:[#allocation9 + $0x3e8] ss:$16 sps:$4 sm:$0xff]  }
 0x240   : > { %v784_v22 = vadd.f32 %v783_v19, %v8266_v44  ;;  %v785_v25 = vpop.f32.mrb[31].mxu0  ;;  %1880 = vmatmul.mubr.bf16.gmra.mrb[56].mxu0 %v989_v3  ;;  %2106 = vmatmul.mubr.bf16.gmra.mrb[56].mxu1 %v989_v3  ;;  %v957_v36 = vmax.f32 %v780_v11, 0.0  ;;  %v6991_v44 = vld [vmem:[#allocation9 + $0x3cc] ss:$16 sps:$4 sm:$0xff]   ;;  %v8365_v56 = vpack.c.bf16 %v955_v49, %v951_v33  ;;  %v8367_v58 = vpack.c.bf16 %v956_v50, %v952_v39  ;;  %v894_v2 = vpop.f32.mrb[29].mxu1 }
 0x241   : > { %v786_v30 = vadd.f32 %v785_v25, %v8269_v45  ;;  %1925 = vmatpush1.bf16.msra.mxu0 %v6974_v8  ;;  %2151 = vmatpush1.bf16.msra.mxu1 %v6977_v9  ;;  %v958_v42 = vmax.f32 %v782_v17, 0.0  ;;  %v893_v1 = vadd.f32 %v892_v59, %v8280_v60  ;;  %v895_v3 = vadd.f32 %v894_v2, %v8283_v62  ;;  %v896_v4 = vpop.f32.mrb[30].mxu1  ;;  %v7006_v25 = vld [vmem:[#allocation12 + $0x24] ss:$16 sps:$4 sm:$0xff]   ;;  %v7019_v33 = vld [vmem:[#allocation12 + $0x68] ss:$16 sps:$4 sm:$0xff]  }
 0x242   : > { %v961_v37 = vmax.f32 %v784_v22, 0.0  ;;  %1926 = vmatprep.subr.bf16.mxu0 %v6982_v13  ;;  %2152 = vmatprep.subr.bf16.mxu1 %v6985_v14  ;;  %v897_v9 = vadd.f32 %v896_v4, %v8280_v60  ;;  %v898_v11 = vpop.f32.mrb[31].mxu1  ;;  %v7000_v14 = vld [vmem:[#allocation12 + $0x4] ss:$16 sps:$4 sm:$0xff]   ;;  %v6998_v60 = vld [vmem:[#allocation12] ss:$16 sps:$4 sm:$0xff]  }
 0x243   : > { %v962_v47 = vmax.f32 %v786_v30, 0.0  ;;  %v959_v8 = vmax.f32 %v893_v1, 0.0  ;;  %v960_v12 = vmax.f32 %v895_v3, 0.0  ;;  %v899_v13 = vadd.f32 %v898_v11, %v8283_v62  ;;  %v7001_v22 = vld [vmem:[#allocation12 + $0x8] ss:$16 sps:$4 sm:$0xff]  }
 0x244   : > { %v993_v45 = vpack.c.bf16 %v961_v37, %v957_v36  ;;  %v963_v17 = vmax.f32 %v897_v9, 0.0  ;;  %v7004_v62 = vld [vmem:[#allocation12 + $0x20] ss:$16 sps:$4 sm:$0xff]   ;;  %v7024_v34 = vld [vmem:[#allocation12 + $0x84] ss:$16 sps:$4 sm:$0xff]  }
 0x245   : > { %v994_v52 = vpack.c.bf16 %v962_v47, %v958_v42  ;;  %1927 = vmatpush1.bf16.msra.mxu0 %v6980_v26  ;;  %2153 = vmatpush1.bf16.msra.mxu1 %v6983_v31  ;;  %v964_v19 = vmax.f32 %v899_v13, 0.0  ;;  %v7009_v26 = vld [vmem:[#allocation12 + $0x2c] ss:$16 sps:$4 sm:$0xff]   ;;  %v7010_v30 = vld [vmem:[#allocation12 + $0x40] ss:$16 sps:$4 sm:$0xff]  }
 0x246   : > { %1928 = vmatprep.subr.bf16.mxu0 %v6988_v32  ;;  %2154 = vmatprep.subr.bf16.mxu1 %v6991_v44  ;;  %v8375_v20 = vpack.c.bf16 %v963_v17, %v959_v8  ;;  %v7013_v31 = vld [vmem:[#allocation12 + $0x48] ss:$16 sps:$4 sm:$0xff]   ;;  %v7018_v32 = vld [vmem:[#allocation12 + $0x64] ss:$16 sps:$4 sm:$0xff]   ;;  %v7022_v36 = vld [vmem:[#allocation12 + $0x80] ss:$16 sps:$4 sm:$0xff]  }
 0x247   : > { %1889 = vmatprep.mubr.bf16.mxu0 %v994_v52  ;;  %2115 = vmatprep.mubr.bf16.mxu1 %v994_v52  ;;  %v8377_v21 = vpack.c.bf16 %v964_v19, %v960_v12  ;;  %v7025_v37 = vld [vmem:[#allocation12 + $0x88] ss:$16 sps:$4 sm:$0xff]   ;;  %v7030_v44 = vld [vmem:[#allocation12 + $0xa4] ss:$16 sps:$4 sm:$0xff]   ;;  %v7039_v42 = vld [vmem:[#allocation12 + $0xcc] ss:$16 sps:$4 sm:$0xff]  }
 0x248   : > { %1890 = vmatmul.mubr.bf16.gmra.mrb[60].mxu0 %v993_v45  ;;  %2116 = vmatmul.mubr.bf16.gmra.mrb[60].mxu1 %v993_v45  ;;  %v7031_v39 = vld [vmem:[#allocation12 + $0xa8] ss:$16 sps:$4 sm:$0xff]   ;;  %v7036_v40 = vld [vmem:[#allocation12 + $0xc4] ss:$16 sps:$4 sm:$0xff]   ;;  %v7034_v47 = vld [vmem:[#allocation12 + $0xc0] ss:$16 sps:$4 sm:$0xff]  }
 0x249   : > { %1929 = vmatpush1.bf16.msra.mxu0 %v6986_v53  ;;  %2155 = vmatpush1.bf16.msra.mxu1 %v6989_v55  ;;  %v7037_v49 = vld [vmem:[#allocation12 + $0xc8] ss:$16 sps:$4 sm:$0xff]   ;;  %v7042_v45 = vld [vmem:[#allocation12 + $0xe4] ss:$16 sps:$4 sm:$0xff]   ;;  %v7051_v53 = vld [vmem:[#allocation12 + $0x10c] ss:$16 sps:$4 sm:$0xff]  }
 0x24a   : > { %1930 = vmatprep.subr.bf16.mxu0 %v6994_v57  ;;  %1932 = vmatprep.mubr.bf16.mxu0 %v8296_v46  ;;  %v7043_v50 = vld [vmem:[#allocation12 + $0xe8] ss:$16 sps:$4 sm:$0xff]   ;;  %v7048_v52 = vld [vmem:[#allocation12 + $0x104] ss:$16 sps:$4 sm:$0xff]   ;;  %v7046_v55 = vld [vmem:[#allocation12 + $0x100] ss:$16 sps:$4 sm:$0xff]  }
 0x24b   : > { %2156 = vmatprep.subr.bf16.mxu1 %v6997_v61  ;;  %2158 = vmatprep.mubr.bf16.mxu1 %v8296_v46  ;;  %v7007_v46 = vld [vmem:[#allocation12 + $0x28] ss:$16 sps:$4 sm:$0xff]   ;;  %v7054_v59 = vld [vmem:[#allocation12 + $0x124] ss:$16 sps:$4 sm:$0xff]   ;;  %v7063_v2 = vld [vmem:[#allocation12 + $0x14c] ss:$16 sps:$4 sm:$0xff]  }
 0x24c   : > { %v7049_v57 = vld [vmem:[#allocation12 + $0x108] ss:$16 sps:$4 sm:$0xff]   ;;  %v7060_v1 = vld [vmem:[#allocation12 + $0x144] ss:$16 sps:$4 sm:$0xff]   ;;  %v7058_v3 = vld [vmem:[#allocation12 + $0x140] ss:$16 sps:$4 sm:$0xff]  }
 0x24d   : > { %1931 = vmatpush1.bf16.msra.mxu0 %v6992_v6  ;;  %2157 = vmatpush1.bf16.msra.mxu1 %v6995_v7  ;;  %v7055_v61 = vld [vmem:[#allocation12 + $0x128] ss:$16 sps:$4 sm:$0xff]   ;;  %v7066_v6 = vld [vmem:[#allocation12 + $0x164] ss:$16 sps:$4 sm:$0xff]   ;;  %v7075_v9 = vld [vmem:[#allocation12 + $0x18c] ss:$16 sps:$4 sm:$0xff]  }
 0x24e   : > { %3125 = vmatprep.subr.bf16.mxu0 %v7000_v14  ;;  %3351 = vmatprep.subr.bf16.mxu1 %v7003_v16  ;;  %v7061_v4 = vld [vmem:[#allocation12 + $0x148] ss:$16 sps:$4 sm:$0xff]   ;;  %v7072_v8 = vld [vmem:[#allocation12 + $0x184] ss:$16 sps:$4 sm:$0xff]   ;;  %v7070_v11 = vld [vmem:[#allocation12 + $0x180] ss:$16 sps:$4 sm:$0xff]  }
 0x24f   : > { %v7067_v7 = vld [vmem:[#allocation12 + $0x168] ss:$16 sps:$4 sm:$0xff]   ;;  %v7078_v13 = vld [vmem:[#allocation12 + $0x1a4] ss:$16 sps:$4 sm:$0xff]   ;;  %v7087_v17 = vld [vmem:[#allocation12 + $0x1cc] ss:$16 sps:$4 sm:$0xff]  }
 0x250   : > { %1933 = vmatmul.mubr.bf16.vlgmr.msra.gmra.mrb[32].mxu0 %v8293_v0  ;;  %2159 = vmatmul.mubr.bf16.vlgmr.msra.gmra.mrb[32].mxu1 %v8293_v0  ;;  %v7021_v0 = vld [vmem:[#allocation12 + $0x6c] ss:$16 sps:$4 sm:$0xff]   ;;  %v7073_v12 = vld [vmem:[#allocation12 + $0x188] ss:$16 sps:$4 sm:$0xff]   ;;  %v7084_v16 = vld [vmem:[#allocation12 + $0x1c4] ss:$16 sps:$4 sm:$0xff]  }
 0x251   : > { %1942 = vmatprep.mubr.bf16.mxu0 %v8308_v23  ;;  %2168 = vmatprep.mubr.bf16.mxu1 %v8308_v23  ;;  %v7016_v23 = vld [vmem:[#allocation12 + $0x60] ss:$16 sps:$4 sm:$0xff]   ;;  %v7079_v14 = vld [vmem:[#allocation12 + $0x1a8] ss:$16 sps:$4 sm:$0xff]  }
 0x252   : > { %3126 = vmatpush1.bf16.msra.mxu0 %v6998_v60  ;;  %3352 = vmatpush1.bf16.msra.mxu1 %v7001_v22  ;;  %v7082_v19 = vld [vmem:[#allocation12 + $0x1c0] ss:$16 sps:$4 sm:$0xff]   ;;  %v7093_v60 = vld [vmem:[#allocation12 + $0x1ec] ss:$16 sps:$4 sm:$0xff]  }
 0x253   : > { %3127 = vmatprep.subr.bf16.mxu0 %v7006_v25  ;;  %3353 = vmatprep.subr.bf16.mxu1 %v7009_v26  ;;  %v7088_v22 = vld [vmem:[#allocation12 + $0x1e0] ss:$16 sps:$4 sm:$0xff]   ;;  %v7091_v25 = vld [vmem:[#allocation12 + $0x1e8] ss:$16 sps:$4 sm:$0xff]   ;;  %v7096_v26 = vld [vmem:[#allocation12 + $0x204] ss:$16 sps:$4 sm:$0xff]  }
 0x256   : > { %3128 = vmatpush1.bf16.msra.mxu0 %v7004_v62  ;;  %3354 = vmatpush1.bf16.msra.mxu1 %v7007_v46  ;;  %v7099_v62 = vld [vmem:[#allocation12 + $0x20c] ss:$16 sps:$4 sm:$0xff]  }
 0x257   : > { %3129 = vmatprep.subr.bf16.mxu0 %v7012_v27  ;;  %3355 = vmatprep.subr.bf16.mxu1 %v7015_v28 }
 0x258   : > { %1943 = vmatmul.mubr.bf16.gmra.mrb[36].mxu0 %v8305_v18  ;;  %2169 = vmatmul.mubr.bf16.gmra.mrb[36].mxu1 %v8305_v18  ;;  %v7033_v18 = vld [vmem:[#allocation12 + $0xac] ss:$16 sps:$4 sm:$0xff]  }
 0x259   : > { %1952 = vmatprep.mubr.bf16.mxu0 %v8320_v5  ;;  %2178 = vmatprep.mubr.bf16.mxu1 %v8320_v5  ;;  %v7028_v5 = vld [vmem:[#allocation12 + $0xa0] ss:$16 sps:$4 sm:$0xff]  }
 0x25a   : > { %3130 = vmatpush1.bf16.msra.mxu0 %v7010_v30  ;;  %3356 = vmatpush1.bf16.msra.mxu1 %v7013_v31 }
 0x25b   : > { %3131 = vmatprep.subr.bf16.mxu0 %v7018_v32  ;;  %3357 = vmatprep.subr.bf16.mxu1 %v7021_v0 }
 0x25e   : > { %3132 = vmatpush1.bf16.msra.mxu0 %v7016_v23  ;;  %3358 = vmatpush1.bf16.msra.mxu1 %v7019_v33 }
 0x25f   : > { %3133 = vmatprep.subr.bf16.mxu0 %v7024_v34  ;;  %3359 = vmatprep.subr.bf16.mxu1 %v7027_v35 }
 0x260   : > { %1953 = vmatmul.mubr.bf16.gmra.mrb[40].mxu0 %v8317_v63  ;;  %2179 = vmatmul.mubr.bf16.gmra.mrb[40].mxu1 %v8317_v63  ;;  %v7045_v63 = vld [vmem:[#allocation12 + $0xec] ss:$16 sps:$4 sm:$0xff]  }
 0x261   : > { %1962 = vmatprep.mubr.bf16.mxu0 %v8332_v48  ;;  %2188 = vmatprep.mubr.bf16.mxu1 %v8332_v48  ;;  %v7040_v48 = vld [vmem:[#allocation12 + $0xe0] ss:$16 sps:$4 sm:$0xff]  }
 0x262   : > { %3134 = vmatpush1.bf16.msra.mxu0 %v7022_v36  ;;  %3360 = vmatpush1.bf16.msra.mxu1 %v7025_v37 }
 0x263   : > { %3135 = vmatprep.subr.bf16.mxu0 %v7030_v44  ;;  %3361 = vmatprep.subr.bf16.mxu1 %v7033_v18 }
 0x266   : > { %3136 = vmatpush1.bf16.msra.mxu0 %v7028_v5  ;;  %3362 = vmatpush1.bf16.msra.mxu1 %v7031_v39 }
 0x267   : > { %3137 = vmatprep.subr.bf16.mxu0 %v7036_v40  ;;  %3363 = vmatprep.subr.bf16.mxu1 %v7039_v42 }
 0x268   : > { %1963 = vmatmul.mubr.bf16.gmra.mrb[44].mxu0 %v8329_v38  ;;  %2189 = vmatmul.mubr.bf16.gmra.mrb[44].mxu1 %v8329_v38  ;;  %v7057_v38 = vld [vmem:[#allocation12 + $0x12c] ss:$16 sps:$4 sm:$0xff]  }
 0x269   : > { %1972 = vmatprep.mubr.bf16.mxu0 %v8344_v29  ;;  %2198 = vmatprep.mubr.bf16.mxu1 %v8344_v29  ;;  %v7052_v29 = vld [vmem:[#allocation12 + $0x120] ss:$16 sps:$4 sm:$0xff]  }
 0x26a   : > { %3138 = vmatpush1.bf16.msra.mxu0 %v7034_v47  ;;  %3364 = vmatpush1.bf16.msra.mxu1 %v7037_v49 }
 0x26b   : > { %3139 = vmatprep.subr.bf16.mxu0 %v7042_v45  ;;  %3365 = vmatprep.subr.bf16.mxu1 %v7045_v63 }
 0x26e   : > { %3140 = vmatpush1.bf16.msra.mxu0 %v7040_v48  ;;  %3366 = vmatpush1.bf16.msra.mxu1 %v7043_v50 }
 0x26f   : > { %3141 = vmatprep.subr.bf16.mxu0 %v7048_v52  ;;  %3367 = vmatprep.subr.bf16.mxu1 %v7051_v53 }
 0x270   : > { %1973 = vmatmul.mubr.bf16.gmra.mrb[48].mxu0 %v8341_v24  ;;  %2199 = vmatmul.mubr.bf16.gmra.mrb[48].mxu1 %v8341_v24  ;;  %v7069_v24 = vld [vmem:[#allocation12 + $0x16c] ss:$16 sps:$4 sm:$0xff]  }
 0x271   : > { %1982 = vmatprep.mubr.bf16.mxu0 %v8356_v15  ;;  %2208 = vmatprep.mubr.bf16.mxu1 %v8356_v15  ;;  %v7064_v15 = vld [vmem:[#allocation12 + $0x160] ss:$16 sps:$4 sm:$0xff]  }
 0x272   : > { %3142 = vmatpush1.bf16.msra.mxu0 %v7046_v55  ;;  %3368 = vmatpush1.bf16.msra.mxu1 %v7049_v57 }
 0x273   : > { %3143 = vmatprep.subr.bf16.mxu0 %v7054_v59  ;;  %3369 = vmatprep.subr.bf16.mxu1 %v7057_v38 }
 0x276   : > { %3144 = vmatpush1.bf16.msra.mxu0 %v7052_v29  ;;  %3370 = vmatpush1.bf16.msra.mxu1 %v7055_v61 }
 0x277   : > { %3145 = vmatprep.subr.bf16.mxu0 %v7060_v1  ;;  %3371 = vmatprep.subr.bf16.mxu1 %v7063_v2  ;;  %v7094_v2 = vld [vmem:[#allocation12 + $0x200] ss:$16 sps:$4 sm:$0xff]  }
 0x278   : > { %1983 = vmatmul.mubr.bf16.gmra.mrb[52].mxu0 %v8353_v10  ;;  %2209 = vmatmul.mubr.bf16.gmra.mrb[52].mxu1 %v8353_v10  ;;  %v7081_v10 = vld [vmem:[#allocation12 + $0x1ac] ss:$16 sps:$4 sm:$0xff]  }
 0x279   : > { %1992 = vmatprep.mubr.bf16.mxu0 %v8367_v58  ;;  %2218 = vmatprep.mubr.bf16.mxu1 %v8367_v58  ;;  %v7076_v58 = vld [vmem:[#allocation12 + $0x1a0] ss:$16 sps:$4 sm:$0xff]  }
 0x27a   : > { %3146 = vmatpush1.bf16.msra.mxu0 %v7058_v3  ;;  %3372 = vmatpush1.bf16.msra.mxu1 %v7061_v4  ;;  %v7097_v3 = vld [vmem:[#allocation12 + $0x208] ss:$16 sps:$4 sm:$0xff]  }
 0x27b   : > { %3147 = vmatprep.subr.bf16.mxu0 %v7066_v6  ;;  %3373 = vmatprep.subr.bf16.mxu1 %v7069_v24 }
 0x27e   : > { %3148 = vmatpush1.bf16.msra.mxu0 %v7064_v15  ;;  %3374 = vmatpush1.bf16.msra.mxu1 %v7067_v7  ;;  %v7102_v7 = vld [vmem:[#allocation12 + $0x224] ss:$16 sps:$4 sm:$0xff]  }
 0x27f   : > { %3149 = vmatprep.subr.bf16.mxu0 %v7072_v8  ;;  %3375 = vmatprep.subr.bf16.mxu1 %v7075_v9  ;;  %v7105_v8 = vld [vmem:[#allocation12 + $0x22c] ss:$16 sps:$4 sm:$0xff]  }
 0x280   : > { %1993 = vmatmul.mubr.bf16.gmra.mrb[56].mxu0 %v8365_v56  ;;  %2219 = vmatmul.mubr.bf16.gmra.mrb[56].mxu1 %v8365_v56  ;;  %v7085_v56 = vld [vmem:[#allocation12 + $0x1c8] ss:$16 sps:$4 sm:$0xff]  }
 0x281   : > { %2002 = vmatprep.mubr.bf16.mxu0 %v8377_v21  ;;  %2228 = vmatprep.mubr.bf16.mxu1 %v8377_v21  ;;  %v7090_v21 = vld [vmem:[#allocation12 + $0x1e4] ss:$16 sps:$4 sm:$0xff]  }
 0x282   : > { %3150 = vmatpush1.bf16.msra.mxu0 %v7070_v11  ;;  %3376 = vmatpush1.bf16.msra.mxu1 %v7073_v12 }
 0x283   : > { %3151 = vmatprep.subr.bf16.mxu0 %v7078_v13  ;;  %3377 = vmatprep.subr.bf16.mxu1 %v7081_v10 }
 0x286   : > { %3152 = vmatpush1.bf16.msra.mxu0 %v7076_v58  ;;  %3378 = vmatpush1.bf16.msra.mxu1 %v7079_v14 }
 0x287   : > { %3153 = vmatprep.subr.bf16.mxu0 %v7084_v16  ;;  %3379 = vmatprep.subr.bf16.mxu1 %v7087_v17 }
 0x288   : > { %2003 = vmatmul.mubr.bf16.gmra.mrb[60].mxu0 %v8375_v20  ;;  %2229 = vmatmul.mubr.bf16.gmra.mrb[60].mxu1 %v8375_v20  ;;  %v1125_v20 = vld [vmem:[#allocation11] sm:$0xf] }
 0x289   : > { %v8410_v46 = vrot.slane %v1125_v20, %v8261_v41  ;;  %v8413_v27 = vrot.slane %v1125_v20, %v8273_v51  ;;  %v8416_v28 = vrot.slane %v1125_v20, %v8263_v43  ;;  %v8419_v30 = vrot.slane %v1125_v20, %v8276_v54  ;;  %v7111_v20 = vld [vmem:[#allocation12 + $0x24c] ss:$16 sps:$4 sm:$0xff]  }
 0x28a   : > { %3154 = vmatpush1.bf16.msra.mxu0 %v7082_v19  ;;  %3380 = vmatpush1.bf16.msra.mxu1 %v7085_v56  ;;  %v7100_v56 = vld [vmem:[#allocation12 + $0x220] ss:$16 sps:$4 sm:$0xff]  }
 0x28b   : > { %3155 = vmatprep.subr.bf16.mxu0 %v7090_v21  ;;  %3381 = vmatprep.subr.bf16.mxu1 %v7093_v60  ;;  %v7103_v21 = vld [vmem:[#allocation12 + $0x228] ss:$16 sps:$4 sm:$0xff]   ;;  %v7108_v60 = vld [vmem:[#allocation12 + $0x244] ss:$16 sps:$4 sm:$0xff]  }
 0x28e   : > { %3156 = vmatpush1.bf16.msra.mxu0 %v7088_v22  ;;  %3382 = vmatpush1.bf16.msra.mxu1 %v7091_v25 }
 0x28f   : > { %3238 = vmatprep.subr.bf16.mxu0 %v7096_v26  ;;  %3464 = vmatprep.subr.bf16.mxu1 %v7099_v62 }
 0x323   : > { %v1934_v31 = vpop.f32.mrb[32].mxu0  ;;  %v2160_v32 = vpop.f32.mrb[32].mxu1 }
 0x324   : > { %v6258_v0 = vadd.f32 %v1934_v31, %v8410_v46  ;;  %v6290_v23 = vadd.f32 %v2160_v32, %v8413_v27  ;;  %v1936_v33 = vpop.f32.mrb[33].mxu0  ;;  %v2162_v34 = vpop.f32.mrb[33].mxu1 }
 0x325   : > { %v6259_v35 = vadd.f32 %v1936_v33, %v8416_v28  ;;  %v6291_v36 = vadd.f32 %v2162_v34, %v8419_v30  ;;  %v1938_v37 = vpop.f32.mrb[34].mxu0  ;;  %v2164_v44 = vpop.f32.mrb[34].mxu1 }
 0x326   : > { %v6260_v18 = vadd.f32 %v1938_v37, %v8410_v46  ;;  %v6292_v5 = vadd.f32 %v2164_v44, %v8413_v27  ;;  %v1940_v39 = vpop.f32.mrb[35].mxu0  ;;  %v2166_v40 = vpop.f32.mrb[35].mxu1  ;;  %v2239_v49 = vmax.f32 %v6258_v0, 0.0  ;;  %v2241_v45 = vmax.f32 %v6290_v23, 0.0 }
 0x327   : > { %v6261_v42 = vadd.f32 %v1940_v39, %v8416_v28  ;;  %v6293_v47 = vadd.f32 %v2166_v40, %v8419_v30  ;;  %v2240_v50 = vmax.f32 %v6259_v35, 0.0  ;;  %v2242_v52 = vmax.f32 %v6291_v36, 0.0 }
 0x328   : > { %v2243_v63 = vmax.f32 %v6260_v18, 0.0  ;;  %v2245_v48 = vmax.f32 %v6292_v5, 0.0  ;;  %v7106_v18 = vld [vmem:[#allocation12 + $0x240] ss:$16 sps:$4 sm:$0xff]   ;;  %v7109_v5 = vld [vmem:[#allocation12 + $0x248] ss:$16 sps:$4 sm:$0xff]  }
 0x329   : > { %v2244_v53 = vmax.f32 %v6261_v42, 0.0  ;;  %v2246_v55 = vmax.f32 %v6293_v47, 0.0 }
 0x32a   : > { %v2303_v57 = vpack.c.bf16 %v2243_v63, %v2239_v49  ;;  %v8429_v59 = vpack.c.bf16 %v2245_v48, %v2241_v45  ;;  %v7114_v49 = vld [vmem:[#allocation12 + $0x264] ss:$16 sps:$4 sm:$0xff]   ;;  %v7117_v45 = vld [vmem:[#allocation12 + $0x26c] ss:$16 sps:$4 sm:$0xff]  }
 0x32b   : > { %v2304_v38 = vpack.c.bf16 %v2244_v53, %v2240_v50  ;;  %v8431_v29 = vpack.c.bf16 %v2246_v55, %v2242_v52  ;;  %v1944_v61 = vpop.f32.mrb[36].mxu0  ;;  %v2170_v1 = vpop.f32.mrb[36].mxu1 }
 0x32c   : > { %v6262_v4 = vadd.f32 %v1944_v61, %v8410_v46  ;;  %v6294_v6 = vadd.f32 %v2170_v1, %v8413_v27  ;;  %v1946_v24 = vpop.f32.mrb[37].mxu0  ;;  %v2172_v15 = vpop.f32.mrb[37].mxu1 }
 0x32d   : > { %v6263_v9 = vadd.f32 %v1946_v24, %v8416_v28  ;;  %v6295_v11 = vadd.f32 %v2172_v15, %v8419_v30  ;;  %v1948_v12 = vpop.f32.mrb[38].mxu0  ;;  %v2174_v13 = vpop.f32.mrb[38].mxu1  ;;  %3157 = vmatprep.mubr.bf16.mxu0 %v2304_v38  ;;  %3383 = vmatprep.mubr.bf16.mxu1 %v2304_v38 }
 0x32e   : > { %v6264_v10 = vadd.f32 %v1948_v12, %v8410_v46  ;;  %v6296_v58 = vadd.f32 %v2174_v13, %v8413_v27  ;;  %v1950_v14 = vpop.f32.mrb[39].mxu0  ;;  %v2176_v16 = vpop.f32.mrb[39].mxu1  ;;  %3158 = vmatmul.mubr.bf16.vlgmr.msra.gmra.mrb[64].mxu0 %v2303_v57  ;;  %3384 = vmatmul.mubr.bf16.vlgmr.msra.gmra.mrb[64].mxu1 %v2303_v57  ;;  %v2247_v22 = vmax.f32 %v6262_v4, 0.0  ;;  %v2249_v25 = vmax.f32 %v6294_v6, 0.0  ;;  %v7120_v4 = vld [vmem:[#allocation12 + $0x284] ss:$16 sps:$4 sm:$0xff]  }
 0x32f   : > { %v6265_v17 = vadd.f32 %v1950_v14, %v8416_v28  ;;  %v6297_v19 = vadd.f32 %v2176_v16, %v8419_v30  ;;  %3239 = vmatpush1.bf16.msra.mxu0 %v7094_v2  ;;  %3465 = vmatpush1.bf16.msra.mxu1 %v7097_v3  ;;  %v2248_v31 = vmax.f32 %v6263_v9, 0.0  ;;  %v2250_v32 = vmax.f32 %v6295_v11, 0.0  ;;  %v7112_v2 = vld [vmem:[#allocation12 + $0x260] ss:$16 sps:$4 sm:$0xff]   ;;  %v7115_v3 = vld [vmem:[#allocation12 + $0x268] ss:$16 sps:$4 sm:$0xff]  }
 0x330   : > { %v2251_v26 = vmax.f32 %v6264_v10, 0.0  ;;  %v2253_v62 = vmax.f32 %v6296_v58, 0.0  ;;  %3240 = vmatprep.subr.bf16.mxu0 %v7102_v7  ;;  %3466 = vmatprep.subr.bf16.mxu1 %v7105_v8  ;;  %v7123_v8 = vld [vmem:[#allocation12 + $0x28c] ss:$16 sps:$4 sm:$0xff]  }
 0x331   : > { %v2252_v0 = vmax.f32 %v6265_v17, 0.0  ;;  %v2254_v23 = vmax.f32 %v6297_v19, 0.0 }
 0x332   : > { %v2307_v33 = vpack.c.bf16 %v2251_v26, %v2247_v22  ;;  %v8441_v34 = vpack.c.bf16 %v2253_v62, %v2249_v25  ;;  %v7126_v62 = vld [vmem:[#allocation12 + $0x2a4] ss:$16 sps:$4 sm:$0xff]  }
 0x333   : > { %v2308_v35 = vpack.c.bf16 %v2252_v0, %v2248_v31  ;;  %v8443_v36 = vpack.c.bf16 %v2254_v23, %v2250_v32  ;;  %3241 = vmatpush1.bf16.msra.mxu0 %v7100_v56  ;;  %v1954_v37 = vpop.f32.mrb[40].mxu0  ;;  %v2180_v44 = vpop.f32.mrb[40].mxu1  ;;  %3467 = vmatpush1.bf16.msra.mxu1 %v7103_v21  ;;  %v7118_v56 = vld [vmem:[#allocation12 + $0x280] ss:$16 sps:$4 sm:$0xff]   ;;  %v7121_v21 = vld [vmem:[#allocation12 + $0x288] ss:$16 sps:$4 sm:$0xff]  }
 0x334   : > { %v6266_v39 = vadd.f32 %v1954_v37, %v8410_v46  ;;  %v6298_v40 = vadd.f32 %v2180_v44, %v8413_v27  ;;  %v1956_v42 = vpop.f32.mrb[41].mxu0  ;;  %v2182_v47 = vpop.f32.mrb[41].mxu1  ;;  %3242 = vmatprep.subr.bf16.mxu0 %v7108_v60  ;;  %3468 = vmatprep.subr.bf16.mxu1 %v7111_v20  ;;  %v7129_v20 = vld [vmem:[#allocation12 + $0x2ac] ss:$16 sps:$4 sm:$0xff]  }
 0x335   : > { %v6267_v63 = vadd.f32 %v1956_v42, %v8416_v28  ;;  %v6299_v48 = vadd.f32 %v2182_v47, %v8419_v30  ;;  %v1958_v50 = vpop.f32.mrb[42].mxu0  ;;  %v2184_v52 = vpop.f32.mrb[42].mxu1  ;;  %3167 = vmatprep.mubr.bf16.mxu0 %v2308_v35  ;;  %3393 = vmatprep.mubr.bf16.mxu1 %v2308_v35  ;;  %v7132_v42 = vld [vmem:[#allocation12 + $0x2c4] ss:$16 sps:$4 sm:$0xff]  }
 0x336   : > { %v6268_v53 = vadd.f32 %v1958_v50, %v8410_v46  ;;  %v6300_v55 = vadd.f32 %v2184_v52, %v8413_v27  ;;  %v1960_v57 = vpop.f32.mrb[43].mxu0  ;;  %v2186_v38 = vpop.f32.mrb[43].mxu1  ;;  %3168 = vmatmul.mubr.bf16.gmra.mrb[68].mxu0 %v2307_v33  ;;  %3394 = vmatmul.mubr.bf16.gmra.mrb[68].mxu1 %v2307_v33  ;;  %v2255_v6 = vmax.f32 %v6266_v39, 0.0  ;;  %v2257_v24 = vmax.f32 %v6298_v40, 0.0  ;;  %v7124_v39 = vld [vmem:[#allocation12 + $0x2a0] ss:$16 sps:$4 sm:$0xff]  }
 0x337   : > { %v6269_v61 = vadd.f32 %v1960_v57, %v8416_v28  ;;  %v6301_v1 = vadd.f32 %v2186_v38, %v8419_v30  ;;  %3243 = vmatpush1.bf16.msra.mxu0 %v7106_v18  ;;  %3469 = vmatpush1.bf16.msra.mxu1 %v7109_v5  ;;  %v2256_v9 = vmax.f32 %v6267_v63, 0.0  ;;  %v2258_v11 = vmax.f32 %v6299_v48, 0.0  ;;  %v7127_v40 = vld [vmem:[#allocation12 + $0x2a8] ss:$16 sps:$4 sm:$0xff]   ;;  %v7135_v48 = vld [vmem:[#allocation12 + $0x2cc] ss:$16 sps:$4 sm:$0xff]  }
 0x338   : > { %v2259_v15 = vmax.f32 %v6268_v53, 0.0  ;;  %v2261_v7 = vmax.f32 %v6300_v55, 0.0  ;;  %3244 = vmatprep.subr.bf16.mxu0 %v7114_v49  ;;  %3470 = vmatprep.subr.bf16.mxu1 %v7117_v45 }
 0x339   : > { %v2260_v12 = vmax.f32 %v6269_v61, 0.0  ;;  %v2262_v13 = vmax.f32 %v6301_v1, 0.0 }
 0x33a   : > { %v2311_v10 = vpack.c.bf16 %v2259_v15, %v2255_v6  ;;  %v8453_v58 = vpack.c.bf16 %v2261_v7, %v2257_v24  ;;  %v7133_v6 = vld [vmem:[#allocation12 + $0x2c8] ss:$16 sps:$4 sm:$0xff]  }
 0x33b   : > { %v2312_v14 = vpack.c.bf16 %v2260_v12, %v2256_v9  ;;  %v8455_v16 = vpack.c.bf16 %v2262_v13, %v2258_v11  ;;  %3245 = vmatpush1.bf16.msra.mxu0 %v7112_v2  ;;  %v1964_v17 = vpop.f32.mrb[44].mxu0  ;;  %v2190_v19 = vpop.f32.mrb[44].mxu1  ;;  %3471 = vmatpush1.bf16.msra.mxu1 %v7115_v3  ;;  %v7138_v9 = vld [vmem:[#allocation12 + $0x2e4] ss:$16 sps:$4 sm:$0xff]   ;;  %v7141_v11 = vld [vmem:[#allocation12 + $0x2ec] ss:$16 sps:$4 sm:$0xff]  }
 0x33c   : > { %v6270_v60 = vadd.f32 %v1964_v17, %v8410_v46  ;;  %v6302_v22 = vadd.f32 %v2190_v19, %v8413_v27  ;;  %v1966_v25 = vpop.f32.mrb[45].mxu0  ;;  %v2192_v26 = vpop.f32.mrb[45].mxu1  ;;  %3246 = vmatprep.subr.bf16.mxu0 %v7120_v4  ;;  %3472 = vmatprep.subr.bf16.mxu1 %v7123_v8  ;;  %v7130_v4 = vld [vmem:[#allocation12 + $0x2c0] ss:$16 sps:$4 sm:$0xff]  }
 0x33d   : > { %v6271_v31 = vadd.f32 %v1966_v25, %v8416_v28  ;;  %v6303_v32 = vadd.f32 %v2192_v26, %v8419_v30  ;;  %v1968_v0 = vpop.f32.mrb[46].mxu0  ;;  %v2194_v23 = vpop.f32.mrb[46].mxu1  ;;  %3177 = vmatprep.mubr.bf16.mxu0 %v2312_v14  ;;  %3403 = vmatprep.mubr.bf16.mxu1 %v2312_v14  ;;  %v7136_v25 = vld [vmem:[#allocation12 + $0x2e0] ss:$16 sps:$4 sm:$0xff]   ;;  %v7139_v26 = vld [vmem:[#allocation12 + $0x2e8] ss:$16 sps:$4 sm:$0xff]  }
 0x33e   : > { %v6272_v33 = vadd.f32 %v1968_v0, %v8410_v46  ;;  %v6304_v35 = vadd.f32 %v2194_v23, %v8413_v27  ;;  %v1970_v37 = vpop.f32.mrb[47].mxu0  ;;  %v2196_v44 = vpop.f32.mrb[47].mxu1  ;;  %3178 = vmatmul.mubr.bf16.gmra.mrb[72].mxu0 %v2311_v10  ;;  %3404 = vmatmul.mubr.bf16.gmra.mrb[72].mxu1 %v2311_v10  ;;  %v2263_v47 = vmax.f32 %v6270_v60, 0.0  ;;  %v2265_v49 = vmax.f32 %v6302_v22, 0.0  ;;  %v7147_v23 = vld [vmem:[#allocation12 + $0x30c] ss:$16 sps:$4 sm:$0xff]  }
 0x33f   : > { %v6273_v18 = vadd.f32 %v1970_v37, %v8416_v28  ;;  %v6305_v5 = vadd.f32 %v2196_v44, %v8419_v30  ;;  %3247 = vmatpush1.bf16.msra.mxu0 %v7118_v56  ;;  %3473 = vmatpush1.bf16.msra.mxu1 %v7121_v21  ;;  %v2264_v50 = vmax.f32 %v6271_v31, 0.0  ;;  %v2266_v52 = vmax.f32 %v6303_v32, 0.0 }
 0x340   : > { %v2267_v45 = vmax.f32 %v6272_v33, 0.0  ;;  %v2269_v63 = vmax.f32 %v6304_v35, 0.0  ;;  %3248 = vmatprep.subr.bf16.mxu0 %v7126_v62  ;;  %3474 = vmatprep.subr.bf16.mxu1 %v7129_v20  ;;  %v7144_v62 = vld [vmem:[#allocation12 + $0x304] ss:$16 sps:$4 sm:$0xff]  }
 0x341   : > { %v2268_v53 = vmax.f32 %v6273_v18, 0.0  ;;  %v2270_v55 = vmax.f32 %v6305_v5, 0.0 }
 0x342   : > { %v2315_v57 = vpack.c.bf16 %v2267_v45, %v2263_v47  ;;  %v8465_v38 = vpack.c.bf16 %v2269_v63, %v2265_v49  ;;  %v7142_v49 = vld [vmem:[#allocation12 + $0x300] ss:$16 sps:$4 sm:$0xff]   ;;  %v7145_v45 = vld [vmem:[#allocation12 + $0x308] ss:$16 sps:$4 sm:$0xff]  }
 0x343   : > { %v2316_v61 = vpack.c.bf16 %v2268_v53, %v2264_v50  ;;  %v8467_v1 = vpack.c.bf16 %v2270_v55, %v2266_v52  ;;  %3249 = vmatpush1.bf16.msra.mxu0 %v7124_v39  ;;  %v1974_v2 = vpop.f32.mrb[48].mxu0  ;;  %v2200_v3 = vpop.f32.mrb[48].mxu1  ;;  %3475 = vmatpush1.bf16.msra.mxu1 %v7127_v40  ;;  %v7150_v53 = vld [vmem:[#allocation12 + $0x324] ss:$16 sps:$4 sm:$0xff]   ;;  %v7153_v55 = vld [vmem:[#allocation12 + $0x32c] ss:$16 sps:$4 sm:$0xff]  }
 0x344   : > { %v6274_v24 = vadd.f32 %v1974_v2, %v8410_v46  ;;  %v6306_v15 = vadd.f32 %v2200_v3, %v8413_v27  ;;  %v1976_v7 = vpop.f32.mrb[49].mxu0  ;;  %v2202_v8 = vpop.f32.mrb[49].mxu1  ;;  %3250 = vmatprep.subr.bf16.mxu0 %v7132_v42  ;;  %3476 = vmatprep.subr.bf16.mxu1 %v7135_v48 }
 0x345   : > { %v6275_v12 = vadd.f32 %v1976_v7, %v8416_v28  ;;  %v6307_v13 = vadd.f32 %v2202_v8, %v8419_v30  ;;  %v1978_v10 = vpop.f32.mrb[50].mxu0  ;;  %v2204_v14 = vpop.f32.mrb[50].mxu1  ;;  %3187 = vmatprep.mubr.bf16.mxu0 %v2316_v61  ;;  %3413 = vmatprep.mubr.bf16.mxu1 %v2316_v61 }
 0x346   : > { %v6276_v17 = vadd.f32 %v1978_v10, %v8410_v46  ;;  %v6308_v19 = vadd.f32 %v2204_v14, %v8413_v27  ;;  %v1980_v56 = vpop.f32.mrb[51].mxu0  ;;  %v2206_v21 = vpop.f32.mrb[51].mxu1  ;;  %3188 = vmatmul.mubr.bf16.gmra.mrb[76].mxu0 %v2315_v57  ;;  %3414 = vmatmul.mubr.bf16.gmra.mrb[76].mxu1 %v2315_v57  ;;  %v2271_v20 = vmax.f32 %v6274_v24, 0.0  ;;  %v2273_v31 = vmax.f32 %v6306_v15, 0.0 }
 0x347   : > { %v6277_v60 = vadd.f32 %v1980_v56, %v8416_v28  ;;  %v6309_v22 = vadd.f32 %v2206_v21, %v8419_v30  ;;  %3251 = vmatpush1.bf16.msra.mxu0 %v7130_v4  ;;  %3477 = vmatpush1.bf16.msra.mxu1 %v7133_v6  ;;  %v2272_v33 = vmax.f32 %v6275_v12, 0.0  ;;  %v2274_v35 = vmax.f32 %v6307_v13, 0.0  ;;  %v7156_v12 = vld [vmem:[#allocation12 + $0x344] ss:$16 sps:$4 sm:$0xff]  }
 0x348   : > { %v2275_v32 = vmax.f32 %v6276_v17, 0.0  ;;  %v2277_v0 = vmax.f32 %v6308_v19, 0.0  ;;  %3252 = vmatprep.subr.bf16.mxu0 %v7138_v9  ;;  %3478 = vmatprep.subr.bf16.mxu1 %v7141_v11  ;;  %v7148_v9 = vld [vmem:[#allocation12 + $0x320] ss:$16 sps:$4 sm:$0xff]   ;;  %v7151_v11 = vld [vmem:[#allocation12 + $0x328] ss:$16 sps:$4 sm:$0xff]  }
 0x349   : > { %v2276_v37 = vmax.f32 %v6277_v60, 0.0  ;;  %v2278_v44 = vmax.f32 %v6309_v22, 0.0  ;;  %v7159_v19 = vld [vmem:[#allocation12 + $0x34c] ss:$16 sps:$4 sm:$0xff]  }
 0x34a   : > { %v2319_v18 = vpack.c.bf16 %v2275_v32, %v2271_v20  ;;  %v8477_v5 = vpack.c.bf16 %v2277_v0, %v2273_v31  ;;  %v7154_v0 = vld [vmem:[#allocation12 + $0x340] ss:$16 sps:$4 sm:$0xff]  }
 0x34b   : > { %v2320_v39 = vpack.c.bf16 %v2276_v37, %v2272_v33  ;;  %v8479_v40 = vpack.c.bf16 %v2278_v44, %v2274_v35  ;;  %3253 = vmatpush1.bf16.msra.mxu0 %v7136_v25  ;;  %v1984_v42 = vpop.f32.mrb[52].mxu0  ;;  %v2210_v47 = vpop.f32.mrb[52].mxu1  ;;  %3479 = vmatpush1.bf16.msra.mxu1 %v7139_v26 }
 0x34c   : > { %v6278_v63 = vadd.f32 %v1984_v42, %v8410_v46  ;;  %v6310_v48 = vadd.f32 %v2210_v47, %v8413_v27  ;;  %v1986_v50 = vpop.f32.mrb[53].mxu0  ;;  %v2212_v52 = vpop.f32.mrb[53].mxu1  ;;  %3254 = vmatprep.subr.bf16.mxu0 %v7144_v62  ;;  %3480 = vmatprep.subr.bf16.mxu1 %v7147_v23  ;;  %v7157_v23 = vld [vmem:[#allocation12 + $0x348] ss:$16 sps:$4 sm:$0xff]  }
 0x34d   : > { %v6279_v57 = vadd.f32 %v1986_v50, %v8416_v28  ;;  %v6311_v61 = vadd.f32 %v2212_v52, %v8419_v30  ;;  %v1988_v2 = vpop.f32.mrb[54].mxu0  ;;  %v2214_v3 = vpop.f32.mrb[54].mxu1  ;;  %3197 = vmatprep.mubr.bf16.mxu0 %v2320_v39  ;;  %3423 = vmatprep.mubr.bf16.mxu1 %v2320_v39  ;;  %v7165_v39 = vld [vmem:[#allocation12 + $0x36c] ss:$16 sps:$4 sm:$0xff]  }
 0x34e   : > { %v6280_v4 = vadd.f32 %v1988_v2, %v8410_v46  ;;  %v6312_v6 = vadd.f32 %v2214_v3, %v8413_v27  ;;  %v1990_v24 = vpop.f32.mrb[55].mxu0  ;;  %v2216_v15 = vpop.f32.mrb[55].mxu1  ;;  %3198 = vmatmul.mubr.bf16.gmra.mrb[80].mxu0 %v2319_v18  ;;  %3424 = vmatmul.mubr.bf16.gmra.mrb[80].mxu1 %v2319_v18  ;;  %v2279_v13 = vmax.f32 %v6278_v63, 0.0  ;;  %v2281_v10 = vmax.f32 %v6310_v48, 0.0  ;;  %v7162_v18 = vld [vmem:[#allocation12 + $0x364] ss:$16 sps:$4 sm:$0xff]  }
 0x34f   : > { %v6281_v7 = vadd.f32 %v1990_v24, %v8416_v28  ;;  %v6313_v8 = vadd.f32 %v2216_v15, %v8419_v30  ;;  %3255 = vmatpush1.bf16.msra.mxu0 %v7142_v49  ;;  %3481 = vmatpush1.bf16.msra.mxu1 %v7145_v45  ;;  %v2280_v56 = vmax.f32 %v6279_v57, 0.0  ;;  %v2282_v21 = vmax.f32 %v6311_v61, 0.0  ;;  %v7160_v57 = vld [vmem:[#allocation12 + $0x360] ss:$16 sps:$4 sm:$0xff]   ;;  %v7163_v61 = vld [vmem:[#allocation12 + $0x368] ss:$16 sps:$4 sm:$0xff]  }
 0x350   : > { %v2283_v14 = vmax.f32 %v6280_v4, 0.0  ;;  %v2285_v17 = vmax.f32 %v6312_v6, 0.0  ;;  %3256 = vmatprep.subr.bf16.mxu0 %v7150_v53  ;;  %3482 = vmatprep.subr.bf16.mxu1 %v7153_v55  ;;  %v7168_v2 = vld [vmem:[#allocation12 + $0x384] ss:$16 sps:$4 sm:$0xff]   ;;  %v7171_v15 = vld [vmem:[#allocation12 + $0x38c] ss:$16 sps:$4 sm:$0xff]  }
 0x351   : > { %v2284_v60 = vmax.f32 %v6281_v7, 0.0  ;;  %v2286_v22 = vmax.f32 %v6313_v8, 0.0 }
 0x352   : > { %v2323_v25 = vpack.c.bf16 %v2283_v14, %v2279_v13  ;;  %v8489_v26 = vpack.c.bf16 %v2285_v17, %v2281_v10 }
 0x353   : > { %v2324_v62 = vpack.c.bf16 %v2284_v60, %v2280_v56  ;;  %v8491_v20 = vpack.c.bf16 %v2286_v22, %v2282_v21  ;;  %3257 = vmatpush1.bf16.msra.mxu0 %v7148_v9  ;;  %v1994_v31 = vpop.f32.mrb[56].mxu0  ;;  %v2220_v32 = vpop.f32.mrb[56].mxu1  ;;  %3483 = vmatpush1.bf16.msra.mxu1 %v7151_v11  ;;  %v7166_v56 = vld [vmem:[#allocation12 + $0x380] ss:$16 sps:$4 sm:$0xff]   ;;  %v7169_v21 = vld [vmem:[#allocation12 + $0x388] ss:$16 sps:$4 sm:$0xff]  }
 0x354   : > { %v6282_v33 = vadd.f32 %v1994_v31, %v8410_v46  ;;  %v6314_v35 = vadd.f32 %v2220_v32, %v8413_v27  ;;  %v1996_v37 = vpop.f32.mrb[57].mxu0  ;;  %v2222_v44 = vpop.f32.mrb[57].mxu1  ;;  %3258 = vmatprep.subr.bf16.mxu0 %v7156_v12  ;;  %3484 = vmatprep.subr.bf16.mxu1 %v7159_v19  ;;  %v7174_v31 = vld [vmem:[#allocation12 + $0x3a4] ss:$16 sps:$4 sm:$0xff]   ;;  %v7177_v32 = vld [vmem:[#allocation12 + $0x3ac] ss:$16 sps:$4 sm:$0xff]  }
 0x355   : > { %v6283_v42 = vadd.f32 %v1996_v37, %v8416_v28  ;;  %v6315_v47 = vadd.f32 %v2222_v44, %v8419_v30  ;;  %v1998_v49 = vpop.f32.mrb[58].mxu0  ;;  %v2224_v45 = vpop.f32.mrb[58].mxu1  ;;  %3207 = vmatprep.mubr.bf16.mxu0 %v2324_v62  ;;  %3433 = vmatprep.mubr.bf16.mxu1 %v2324_v62 }
 0x356   : > { %v6284_v63 = vadd.f32 %v1998_v49, %v8410_v46  ;;  %v6316_v48 = vadd.f32 %v2224_v45, %v8413_v27  ;;  %v2000_v50 = vpop.f32.mrb[59].mxu0  ;;  %v2226_v52 = vpop.f32.mrb[59].mxu1  ;;  %3208 = vmatmul.mubr.bf16.gmra.mrb[84].mxu0 %v2323_v25  ;;  %3434 = vmatmul.mubr.bf16.gmra.mrb[84].mxu1 %v2323_v25  ;;  %v2287_v3 = vmax.f32 %v6282_v33, 0.0  ;;  %v2289_v4 = vmax.f32 %v6314_v35, 0.0  ;;  %v7172_v49 = vld [vmem:[#allocation12 + $0x3a0] ss:$16 sps:$4 sm:$0xff]  }
 0x357   : > { %v6285_v53 = vadd.f32 %v2000_v50, %v8416_v28  ;;  %v6317_v55 = vadd.f32 %v2226_v52, %v8419_v30  ;;  %3259 = vmatpush1.bf16.msra.mxu0 %v7154_v0  ;;  %3485 = vmatpush1.bf16.msra.mxu1 %v7157_v23  ;;  %v2288_v7 = vmax.f32 %v6283_v42, 0.0  ;;  %v2290_v8 = vmax.f32 %v6315_v47, 0.0  ;;  %v7175_v45 = vld [vmem:[#allocation12 + $0x3a8] ss:$16 sps:$4 sm:$0xff]  }
 0x358   : > { %v2291_v6 = vmax.f32 %v6284_v63, 0.0  ;;  %v2293_v24 = vmax.f32 %v6316_v48, 0.0  ;;  %3260 = vmatprep.subr.bf16.mxu0 %v7162_v18  ;;  %3486 = vmatprep.subr.bf16.mxu1 %v7165_v39  ;;  %v7180_v63 = vld [vmem:[#allocation12 + $0x3c4] ss:$16 sps:$4 sm:$0xff]  }
 0x359   : > { %v2292_v9 = vmax.f32 %v6285_v53, 0.0  ;;  %v2294_v11 = vmax.f32 %v6317_v55, 0.0 }
 0x35a   : > { %v2327_v12 = vpack.c.bf16 %v2291_v6, %v2287_v3  ;;  %v8501_v13 = vpack.c.bf16 %v2293_v24, %v2289_v4  ;;  %v7178_v4 = vld [vmem:[#allocation12 + $0x3c0] ss:$16 sps:$4 sm:$0xff]   ;;  %v7181_v6 = vld [vmem:[#allocation12 + $0x3c8] ss:$16 sps:$4 sm:$0xff]   ;;  %v7186_v24 = vld [vmem:[#allocation12 + $0x3e4] ss:$16 sps:$4 sm:$0xff]  }
 0x35b   : > { %v2328_v10 = vpack.c.bf16 %v2292_v9, %v2288_v7  ;;  %v8503_v14 = vpack.c.bf16 %v2294_v11, %v2290_v8  ;;  %3261 = vmatpush1.bf16.msra.mxu0 %v7160_v57  ;;  %v2004_v17 = vpop.f32.mrb[60].mxu0  ;;  %v2230_v19 = vpop.f32.mrb[60].mxu1  ;;  %3487 = vmatpush1.bf16.msra.mxu1 %v7163_v61  ;;  %v7184_v7 = vld [vmem:[#allocation12 + $0x3e0] ss:$16 sps:$4 sm:$0xff]   ;;  %v7187_v8 = vld [vmem:[#allocation12 + $0x3e8] ss:$16 sps:$4 sm:$0xff]  }
 0x35c   : > { %v6286_v60 = vadd.f32 %v2004_v17, %v8410_v46  ;;  %v6318_v22 = vadd.f32 %v2230_v19, %v8413_v27  ;;  %v2006_v25 = vpop.f32.mrb[61].mxu0  ;;  %v2232_v62 = vpop.f32.mrb[61].mxu1  ;;  %3262 = vmatprep.subr.bf16.mxu0 %v7168_v2  ;;  %3488 = vmatprep.subr.bf16.mxu1 %v7171_v15  ;;  %v7189_v15 = vld [vmem:[#allocation12 + $0x3ec] ss:$16 sps:$4 sm:$0xff]   ;;  %v7192_v9 = vld [vmem:[#allocation15 + $0x4] ss:$16 sps:$4 sm:$0xff]  }
 0x35d   : > { %v6287_v0 = vadd.f32 %v2006_v25, %v8416_v28  ;;  %v6319_v23 = vadd.f32 %v2232_v62, %v8419_v30  ;;  %v2008_v33 = vpop.f32.mrb[62].mxu0  ;;  %v2234_v35 = vpop.f32.mrb[62].mxu1  ;;  %3217 = vmatprep.mubr.bf16.mxu0 %v2328_v10  ;;  %3443 = vmatprep.mubr.bf16.mxu1 %v2328_v10  ;;  %v7195_v11 = vld [vmem:[#allocation15 + $0xc] ss:$16 sps:$4 sm:$0xff]   ;;  %v7193_v10 = vld [vmem:[#allocation15 + $0x8] ss:$16 sps:$4 sm:$0xff]  }
 0x35e   : > { %v6288_v37 = vadd.f32 %v2008_v33, %v8410_v46  ;;  %v6320_v44 = vadd.f32 %v2234_v35, %v8413_v27  ;;  %v2010_v18 = vpop.f32.mrb[63].mxu0  ;;  %v2236_v39 = vpop.f32.mrb[63].mxu1  ;;  %3218 = vmatmul.mubr.bf16.gmra.mrb[88].mxu0 %v2327_v12  ;;  %3444 = vmatmul.mubr.bf16.gmra.mrb[88].mxu1 %v2327_v12  ;;  %v2295_v48 = vmax.f32 %v6286_v60, 0.0  ;;  %v2297_v50 = vmax.f32 %v6318_v22, 0.0  ;;  %v7183_v46 = vld [vmem:[#allocation12 + $0x3cc] ss:$16 sps:$4 sm:$0xff]  }
 0x35f   : > { %v6289_v42 = vadd.f32 %v2010_v18, %v8416_v28  ;;  %v6321_v47 = vadd.f32 %v2236_v39, %v8419_v30  ;;  %3263 = vmatpush1.bf16.msra.mxu0 %v7166_v56  ;;  %3489 = vmatpush1.bf16.msra.mxu1 %v7169_v21  ;;  %v2296_v27 = vmax.f32 %v6287_v0, 0.0  ;;  %v2298_v55 = vmax.f32 %v6319_v23, 0.0  ;;  %v7190_v12 = vld [vmem:[#allocation15] ss:$16 sps:$4 sm:$0xff]   ;;  %v7198_v17 = vld [vmem:[#allocation15 + $0x24] ss:$16 sps:$4 sm:$0xff]  }
 0x360   : > { %v2299_v52 = vmax.f32 %v6288_v37, 0.0  ;;  %v2301_v53 = vmax.f32 %v6320_v44, 0.0  ;;  %3264 = vmatprep.subr.bf16.mxu0 %v7174_v31  ;;  %3490 = vmatprep.subr.bf16.mxu1 %v7177_v32  ;;  %v7201_v19 = vld [vmem:[#allocation15 + $0x2c] ss:$16 sps:$4 sm:$0xff]   ;;  %v7199_v56 = vld [vmem:[#allocation15 + $0x28] ss:$16 sps:$4 sm:$0xff]  }
 0x361   : > { %v2300_v57 = vmax.f32 %v6289_v42, 0.0  ;;  %v2302_v61 = vmax.f32 %v6321_v47, 0.0  ;;  %v7204_v21 = vld [vmem:[#allocation15 + $0x44] ss:$16 sps:$4 sm:$0xff]   ;;  %v7207_v60 = vld [vmem:[#allocation15 + $0x4c] ss:$16 sps:$4 sm:$0xff]  }
 0x362   : > { %v2331_v2 = vpack.c.bf16 %v2299_v52, %v2295_v48  ;;  %v8513_v28 = vpack.c.bf16 %v2301_v53, %v2297_v50  ;;  %v7202_v22 = vld [vmem:[#allocation15 + $0x40] ss:$16 sps:$4 sm:$0xff]   ;;  %v7205_v25 = vld [vmem:[#allocation15 + $0x48] ss:$16 sps:$4 sm:$0xff]   ;;  %v7210_v62 = vld [vmem:[#allocation15 + $0x64] ss:$16 sps:$4 sm:$0xff]  }
 0x363   : > { %v2332_v30 = vpack.c.bf16 %v2300_v57, %v2296_v27  ;;  %v8515_v3 = vpack.c.bf16 %v2302_v61, %v2298_v55  ;;  %3265 = vmatpush1.bf16.msra.mxu0 %v7172_v49  ;;  %3491 = vmatpush1.bf16.msra.mxu1 %v7175_v45  ;;  %v7211_v31 = vld [vmem:[#allocation15 + $0x68] ss:$16 sps:$4 sm:$0xff]   ;;  %v7216_v32 = vld [vmem:[#allocation15 + $0x84] ss:$16 sps:$4 sm:$0xff]   ;;  %v7219_v0 = vld [vmem:[#allocation15 + $0x8c] ss:$16 sps:$4 sm:$0xff]  }
 0x364   : > { %3266 = vmatprep.subr.bf16.mxu0 %v7180_v63  ;;  %3492 = vmatprep.subr.bf16.mxu1 %v7183_v46  ;;  %v7214_v23 = vld [vmem:[#allocation15 + $0x80] ss:$16 sps:$4 sm:$0xff]   ;;  %v7217_v33 = vld [vmem:[#allocation15 + $0x88] ss:$16 sps:$4 sm:$0xff]   ;;  %v7222_v35 = vld [vmem:[#allocation15 + $0xa4] ss:$16 sps:$4 sm:$0xff]  }
 0x365   : > { %3227 = vmatprep.mubr.bf16.mxu0 %v2332_v30  ;;  %3453 = vmatprep.mubr.bf16.mxu1 %v2332_v30  ;;  %v7223_v37 = vld [vmem:[#allocation15 + $0xa8] ss:$16 sps:$4 sm:$0xff]   ;;  %v7228_v44 = vld [vmem:[#allocation15 + $0xc4] ss:$16 sps:$4 sm:$0xff]   ;;  %v7231_v18 = vld [vmem:[#allocation15 + $0xcc] ss:$16 sps:$4 sm:$0xff]  }
 0x366   : > { %3228 = vmatmul.mubr.bf16.gmra.mrb[92].mxu0 %v2331_v2  ;;  %3454 = vmatmul.mubr.bf16.gmra.mrb[92].mxu1 %v2331_v2  ;;  %v7226_v39 = vld [vmem:[#allocation15 + $0xc0] ss:$16 sps:$4 sm:$0xff]   ;;  %v7229_v42 = vld [vmem:[#allocation15 + $0xc8] ss:$16 sps:$4 sm:$0xff]   ;;  %v7234_v47 = vld [vmem:[#allocation15 + $0xe4] ss:$16 sps:$4 sm:$0xff]  }
 0x367   : > { %3267 = vmatpush1.bf16.msra.mxu0 %v7178_v4  ;;  %3270 = vmatprep.mubr.bf16.mxu0 %v8431_v29  ;;  %v7235_v49 = vld [vmem:[#allocation15 + $0xe8] ss:$16 sps:$4 sm:$0xff]   ;;  %v7240_v45 = vld [vmem:[#allocation15 + $0x104] ss:$16 sps:$4 sm:$0xff]   ;;  %v7243_v63 = vld [vmem:[#allocation15 + $0x10c] ss:$16 sps:$4 sm:$0xff]  }
 0x368   : > { %3493 = vmatpush1.bf16.msra.mxu1 %v7181_v6  ;;  %3496 = vmatprep.mubr.bf16.mxu1 %v8431_v29  ;;  %v7196_v29 = vld [vmem:[#allocation15 + $0x20] ss:$16 sps:$4 sm:$0xff]   ;;  %v7241_v50 = vld [vmem:[#allocation15 + $0x108] ss:$16 sps:$4 sm:$0xff]   ;;  %v7246_v52 = vld [vmem:[#allocation15 + $0x124] ss:$16 sps:$4 sm:$0xff]  }
 0x369   : > { %3268 = vmatprep.subr.bf16.mxu0 %v7186_v24  ;;  %3494 = vmatprep.subr.bf16.mxu1 %v7189_v15  ;;  %v7238_v48 = vld [vmem:[#allocation15 + $0x100] ss:$16 sps:$4 sm:$0xff]   ;;  %v7247_v53 = vld [vmem:[#allocation15 + $0x128] ss:$16 sps:$4 sm:$0xff]   ;;  %v7252_v46 = vld [vmem:[#allocation15 + $0x144] ss:$16 sps:$4 sm:$0xff]  }
 0x36a   : > { %v7255_v27 = vld [vmem:[#allocation15 + $0x14c] ss:$16 sps:$4 sm:$0xff]   ;;  %v7250_v55 = vld [vmem:[#allocation15 + $0x140] ss:$16 sps:$4 sm:$0xff]   ;;  %v7253_v57 = vld [vmem:[#allocation15 + $0x148] ss:$16 sps:$4 sm:$0xff]  }
 0x36b   : > { %3269 = vmatpush1.bf16.msra.mxu0 %v7184_v7  ;;  %v7258_v61 = vld [vmem:[#allocation15 + $0x164] ss:$16 sps:$4 sm:$0xff]   ;;  %v7259_v2 = vld [vmem:[#allocation15 + $0x168] ss:$16 sps:$4 sm:$0xff]   ;;  %v7267_v4 = vld [vmem:[#allocation15 + $0x18c] ss:$16 sps:$4 sm:$0xff]  }
 0x36c   : > { %3495 = vmatpush1.bf16.msra.mxu1 %v7187_v8  ;;  %4463 = vmatprep.subr.bf16.mxu0 %v7192_v9  ;;  %v7264_v30 = vld [vmem:[#allocation15 + $0x184] ss:$16 sps:$4 sm:$0xff]   ;;  %v7262_v6 = vld [vmem:[#allocation15 + $0x180] ss:$16 sps:$4 sm:$0xff]   ;;  %v7265_v24 = vld [vmem:[#allocation15 + $0x188] ss:$16 sps:$4 sm:$0xff]  }
 0x36d   : > { %4689 = vmatprep.subr.bf16.mxu1 %v7195_v11  ;;  %v7270_v15 = vld [vmem:[#allocation15 + $0x1a4] ss:$16 sps:$4 sm:$0xff]   ;;  %v7271_v7 = vld [vmem:[#allocation15 + $0x1a8] ss:$16 sps:$4 sm:$0xff]   ;;  %v7279_v9 = vld [vmem:[#allocation15 + $0x1cc] ss:$16 sps:$4 sm:$0xff]  }
 0x36e   : > { %3271 = vmatmul.mubr.bf16.vlgmr.msra.gmra.mrb[64].mxu0 %v8429_v59  ;;  %v7276_v8 = vld [vmem:[#allocation15 + $0x1c4] ss:$16 sps:$4 sm:$0xff]   ;;  %v7274_v11 = vld [vmem:[#allocation15 + $0x1c0] ss:$16 sps:$4 sm:$0xff]  }
 0x36f   : > { %3497 = vmatmul.mubr.bf16.vlgmr.msra.gmra.mrb[64].mxu1 %v8429_v59  ;;  %3280 = vmatprep.mubr.bf16.mxu0 %v8443_v36  ;;  %v7213_v59 = vld [vmem:[#allocation15 + $0x6c] ss:$16 sps:$4 sm:$0xff]  }
 0x370   : > { %3506 = vmatprep.mubr.bf16.mxu1 %v8443_v36  ;;  %4464 = vmatpush1.bf16.msra.mxu0 %v7190_v12  ;;  %v7208_v36 = vld [vmem:[#allocation15 + $0x60] ss:$16 sps:$4 sm:$0xff]   ;;  %v7285_v12 = vld [vmem:[#allocation15 + $0x1ec] ss:$16 sps:$4 sm:$0xff]  }
 0x371   : > { %4690 = vmatpush1.bf16.msra.mxu1 %v7193_v10  ;;  %4465 = vmatprep.subr.bf16.mxu0 %v7198_v17  ;;  %v7280_v10 = vld [vmem:[#allocation15 + $0x1e0] ss:$16 sps:$4 sm:$0xff]   ;;  %v7283_v17 = vld [vmem:[#allocation15 + $0x1e8] ss:$16 sps:$4 sm:$0xff]  }
 0x372   : > { %4691 = vmatprep.subr.bf16.mxu1 %v7201_v19  ;;  %v7288_v19 = vld [vmem:[#allocation15 + $0x204] ss:$16 sps:$4 sm:$0xff]  }
 0x374   : > { %4466 = vmatpush1.bf16.msra.mxu0 %v7196_v29  ;;  %v7291_v29 = vld [vmem:[#allocation15 + $0x20c] ss:$16 sps:$4 sm:$0xff]  }
 0x375   : > { %4692 = vmatpush1.bf16.msra.mxu1 %v7199_v56  ;;  %4467 = vmatprep.subr.bf16.mxu0 %v7204_v21 }
 0x376   : > { %3281 = vmatmul.mubr.bf16.gmra.mrb[68].mxu0 %v8441_v34  ;;  %4693 = vmatprep.subr.bf16.mxu1 %v7207_v60 }
 0x377   : > { %3507 = vmatmul.mubr.bf16.gmra.mrb[68].mxu1 %v8441_v34  ;;  %3290 = vmatprep.mubr.bf16.mxu0 %v8455_v16  ;;  %v7225_v34 = vld [vmem:[#allocation15 + $0xac] ss:$16 sps:$4 sm:$0xff]  }
 0x378   : > { %3516 = vmatprep.mubr.bf16.mxu1 %v8455_v16  ;;  %4468 = vmatpush1.bf16.msra.mxu0 %v7202_v22  ;;  %v7220_v16 = vld [vmem:[#allocation15 + $0xa0] ss:$16 sps:$4 sm:$0xff]  }
 0x379   : > { %4694 = vmatpush1.bf16.msra.mxu1 %v7205_v25  ;;  %4469 = vmatprep.subr.bf16.mxu0 %v7210_v62 }
 0x37a   : > { %4695 = vmatprep.subr.bf16.mxu1 %v7213_v59 }
 0x37c   : > { %4470 = vmatpush1.bf16.msra.mxu0 %v7208_v36 }
 0x37d   : > { %4696 = vmatpush1.bf16.msra.mxu1 %v7211_v31  ;;  %4471 = vmatprep.subr.bf16.mxu0 %v7216_v32 }
 0x37e   : > { %3291 = vmatmul.mubr.bf16.gmra.mrb[72].mxu0 %v8453_v58  ;;  %4697 = vmatprep.subr.bf16.mxu1 %v7219_v0 }
 0x37f   : > { %3517 = vmatmul.mubr.bf16.gmra.mrb[72].mxu1 %v8453_v58  ;;  %3300 = vmatprep.mubr.bf16.mxu0 %v8467_v1  ;;  %v7237_v58 = vld [vmem:[#allocation15 + $0xec] ss:$16 sps:$4 sm:$0xff]  }
 0x380   : > { %3526 = vmatprep.mubr.bf16.mxu1 %v8467_v1  ;;  %4472 = vmatpush1.bf16.msra.mxu0 %v7214_v23  ;;  %v7232_v1 = vld [vmem:[#allocation15 + $0xe0] ss:$16 sps:$4 sm:$0xff]  }
 0x381   : > { %4698 = vmatpush1.bf16.msra.mxu1 %v7217_v33  ;;  %4473 = vmatprep.subr.bf16.mxu0 %v7222_v35 }
 0x382   : > { %4699 = vmatprep.subr.bf16.mxu1 %v7225_v34 }
 0x384   : > { %4474 = vmatpush1.bf16.msra.mxu0 %v7220_v16 }
 0x385   : > { %4700 = vmatpush1.bf16.msra.mxu1 %v7223_v37  ;;  %4475 = vmatprep.subr.bf16.mxu0 %v7228_v44 }
 0x386   : > { %3301 = vmatmul.mubr.bf16.gmra.mrb[76].mxu0 %v8465_v38  ;;  %4701 = vmatprep.subr.bf16.mxu1 %v7231_v18 }
 0x387   : > { %3527 = vmatmul.mubr.bf16.gmra.mrb[76].mxu1 %v8465_v38  ;;  %3310 = vmatprep.mubr.bf16.mxu0 %v8479_v40  ;;  %v7249_v38 = vld [vmem:[#allocation15 + $0x12c] ss:$16 sps:$4 sm:$0xff]  }
 0x388   : > { %3536 = vmatprep.mubr.bf16.mxu1 %v8479_v40  ;;  %4476 = vmatpush1.bf16.msra.mxu0 %v7226_v39  ;;  %v7244_v40 = vld [vmem:[#allocation15 + $0x120] ss:$16 sps:$4 sm:$0xff]  }
 0x389   : > { %4702 = vmatpush1.bf16.msra.mxu1 %v7229_v42  ;;  %4477 = vmatprep.subr.bf16.mxu0 %v7234_v47 }
 0x38a   : > { %4703 = vmatprep.subr.bf16.mxu1 %v7237_v58 }
 0x38c   : > { %4478 = vmatpush1.bf16.msra.mxu0 %v7232_v1 }
 0x38d   : > { %4704 = vmatpush1.bf16.msra.mxu1 %v7235_v49  ;;  %4479 = vmatprep.subr.bf16.mxu0 %v7240_v45 }
 0x38e   : > { %3311 = vmatmul.mubr.bf16.gmra.mrb[80].mxu0 %v8477_v5  ;;  %4705 = vmatprep.subr.bf16.mxu1 %v7243_v63 }
 0x38f   : > { %3537 = vmatmul.mubr.bf16.gmra.mrb[80].mxu1 %v8477_v5  ;;  %3320 = vmatprep.mubr.bf16.mxu0 %v8491_v20  ;;  %v7261_v5 = vld [vmem:[#allocation15 + $0x16c] ss:$16 sps:$4 sm:$0xff]  }
 0x390   : > { %3546 = vmatprep.mubr.bf16.mxu1 %v8491_v20  ;;  %4480 = vmatpush1.bf16.msra.mxu0 %v7238_v48  ;;  %v7256_v20 = vld [vmem:[#allocation15 + $0x160] ss:$16 sps:$4 sm:$0xff]  }
 0x391   : > { %4706 = vmatpush1.bf16.msra.mxu1 %v7241_v50  ;;  %4481 = vmatprep.subr.bf16.mxu0 %v7246_v52 }
 0x392   : > { %4707 = vmatprep.subr.bf16.mxu1 %v7249_v38 }
 0x394   : > { %4482 = vmatpush1.bf16.msra.mxu0 %v7244_v40 }
 0x395   : > { %4708 = vmatpush1.bf16.msra.mxu1 %v7247_v53  ;;  %4483 = vmatprep.subr.bf16.mxu0 %v7252_v46  ;;  %v7286_v53 = vld [vmem:[#allocation15 + $0x200] ss:$16 sps:$4 sm:$0xff]   ;;  %v7289_v46 = vld [vmem:[#allocation15 + $0x208] ss:$16 sps:$4 sm:$0xff]  }
 0x396   : > { %3321 = vmatmul.mubr.bf16.gmra.mrb[84].mxu0 %v8489_v26  ;;  %4709 = vmatprep.subr.bf16.mxu1 %v7255_v27 }
 0x397   : > { %3547 = vmatmul.mubr.bf16.gmra.mrb[84].mxu1 %v8489_v26  ;;  %3330 = vmatprep.mubr.bf16.mxu0 %v8503_v14  ;;  %v7273_v26 = vld [vmem:[#allocation15 + $0x1ac] ss:$16 sps:$4 sm:$0xff]  }
 0x398   : > { %3556 = vmatprep.mubr.bf16.mxu1 %v8503_v14  ;;  %4484 = vmatpush1.bf16.msra.mxu0 %v7250_v55  ;;  %v7268_v14 = vld [vmem:[#allocation15 + $0x1a0] ss:$16 sps:$4 sm:$0xff]  }
 0x399   : > { %4710 = vmatpush1.bf16.msra.mxu1 %v7253_v57  ;;  %4485 = vmatprep.subr.bf16.mxu0 %v7258_v61 }
 0x39a   : > { %4711 = vmatprep.subr.bf16.mxu1 %v7261_v5  ;;  %v7294_v5 = vld [vmem:[#allocation15 + $0x224] ss:$16 sps:$4 sm:$0xff]  }
 0x39c   : > { %4486 = vmatpush1.bf16.msra.mxu0 %v7256_v20  ;;  %v7297_v20 = vld [vmem:[#allocation15 + $0x22c] ss:$16 sps:$4 sm:$0xff]  }
 0x39d   : > { %4712 = vmatpush1.bf16.msra.mxu1 %v7259_v2  ;;  %4487 = vmatprep.subr.bf16.mxu0 %v7264_v30 }
 0x39e   : > { %3331 = vmatmul.mubr.bf16.gmra.mrb[88].mxu0 %v8501_v13  ;;  %4713 = vmatprep.subr.bf16.mxu1 %v7267_v4 }
 0x39f   : > { %3557 = vmatmul.mubr.bf16.gmra.mrb[88].mxu1 %v8501_v13  ;;  %3340 = vmatprep.mubr.bf16.mxu0 %v8515_v3  ;;  %v7277_v13 = vld [vmem:[#allocation15 + $0x1c8] ss:$16 sps:$4 sm:$0xff]  }
 0x3a0   : > { %3566 = vmatprep.mubr.bf16.mxu1 %v8515_v3  ;;  %4488 = vmatpush1.bf16.msra.mxu0 %v7262_v6  ;;  %v7282_v3 = vld [vmem:[#allocation15 + $0x1e4] ss:$16 sps:$4 sm:$0xff]  }
 0x3a1   : > { %4714 = vmatpush1.bf16.msra.mxu1 %v7265_v24  ;;  %4489 = vmatprep.subr.bf16.mxu0 %v7270_v15 }
 0x3a2   : > { %4715 = vmatprep.subr.bf16.mxu1 %v7273_v26 }
 0x3a4   : > { %4490 = vmatpush1.bf16.msra.mxu0 %v7268_v14 }
 0x3a5   : > { %4716 = vmatpush1.bf16.msra.mxu1 %v7271_v7  ;;  %4491 = vmatprep.subr.bf16.mxu0 %v7276_v8 }
 0x3a6   : > { %3341 = vmatmul.mubr.bf16.gmra.mrb[92].mxu0 %v8513_v28  ;;  %4717 = vmatprep.subr.bf16.mxu1 %v7279_v9 }
 0x3a7   : > { %3567 = vmatmul.mubr.bf16.gmra.mrb[92].mxu1 %v8513_v28  ;;  %v2463_v28 = vld [vmem:[#allocation14] sm:$0xf] }
 0x3a8   : > { %4492 = vmatpush1.bf16.msra.mxu0 %v7274_v11  ;;  %v8550_v56 = vrot.slane %v2463_v28, %v8261_v41  ;;  %v8553_v21 = vrot.slane %v2463_v28, %v8273_v51  ;;  %v8556_v60 = vrot.slane %v2463_v28, %v8263_v43  ;;  %v8559_v22 = vrot.slane %v2463_v28, %v8276_v54  ;;  %v7292_v11 = vld [vmem:[#allocation15 + $0x220] ss:$16 sps:$4 sm:$0xff]  }
 0x3a9   : > { %4718 = vmatpush1.bf16.msra.mxu1 %v7277_v13  ;;  %4493 = vmatprep.subr.bf16.mxu0 %v7282_v3  ;;  %v7295_v13 = vld [vmem:[#allocation15 + $0x228] ss:$16 sps:$4 sm:$0xff]  }
 0x3aa   : > { %4719 = vmatprep.subr.bf16.mxu1 %v7285_v12 }
 0x3ac   : > { %4494 = vmatpush1.bf16.msra.mxu0 %v7280_v10 }
 0x3ad   : > { %4720 = vmatpush1.bf16.msra.mxu1 %v7283_v17  ;;  %4576 = vmatprep.subr.bf16.mxu0 %v7288_v19  ;;  %v7300_v17 = vld [vmem:[#allocation15 + $0x244] ss:$16 sps:$4 sm:$0xff]   ;;  %v7303_v19 = vld [vmem:[#allocation15 + $0x24c] ss:$16 sps:$4 sm:$0xff]  }
 0x3ae   : > { %4802 = vmatprep.subr.bf16.mxu1 %v7291_v29 }
 0x441   : > { %v3272_v25 = vpop.f32.mrb[64].mxu0 }
 0x442   : > { %v6322_v62 = vadd.f32 %v3272_v25, %v8550_v56  ;;  %v3498_v59 = vpop.f32.mrb[64].mxu1  ;;  %v3274_v36 = vpop.f32.mrb[65].mxu0 }
 0x443   : > { %v6354_v31 = vadd.f32 %v3498_v59, %v8553_v21  ;;  %v6323_v32 = vadd.f32 %v3274_v36, %v8556_v60  ;;  %v3500_v0 = vpop.f32.mrb[65].mxu1  ;;  %v3276_v23 = vpop.f32.mrb[66].mxu0 }
 0x444   : > { %v6355_v33 = vadd.f32 %v3500_v0, %v8559_v22  ;;  %v6324_v35 = vadd.f32 %v3276_v23, %v8550_v56  ;;  %v3502_v34 = vpop.f32.mrb[66].mxu1  ;;  %v3278_v16 = vpop.f32.mrb[67].mxu0  ;;  %v3577_v39 = vmax.f32 %v6322_v62, 0.0 }
 0x445   : > { %v6356_v37 = vadd.f32 %v3502_v34, %v8553_v21  ;;  %v6325_v44 = vadd.f32 %v3278_v16, %v8556_v60  ;;  %v3504_v18 = vpop.f32.mrb[67].mxu1  ;;  %v3579_v58 = vmax.f32 %v6354_v31, 0.0  ;;  %v3578_v1 = vmax.f32 %v6323_v32, 0.0 }
 0x446   : > { %v3581_v42 = vmax.f32 %v6324_v35, 0.0  ;;  %v6357_v47 = vadd.f32 %v3504_v18, %v8559_v22  ;;  %v3580_v63 = vmax.f32 %v6355_v33, 0.0  ;;  %v7298_v33 = vld [vmem:[#allocation15 + $0x240] ss:$16 sps:$4 sm:$0xff]   ;;  %v7301_v35 = vld [vmem:[#allocation15 + $0x248] ss:$16 sps:$4 sm:$0xff]  }
 0x447   : > { %v3583_v49 = vmax.f32 %v6356_v37, 0.0  ;;  %v3582_v45 = vmax.f32 %v6325_v44, 0.0  ;;  %v7306_v18 = vld [vmem:[#allocation15 + $0x264] ss:$16 sps:$4 sm:$0xff]  }
 0x448   : > { %v3641_v48 = vpack.c.bf16 %v3581_v42, %v3577_v39  ;;  %v3584_v50 = vmax.f32 %v6357_v47, 0.0  ;;  %v7309_v39 = vld [vmem:[#allocation15 + $0x26c] ss:$16 sps:$4 sm:$0xff]  }
 0x449   : > { %v8569_v52 = vpack.c.bf16 %v3583_v49, %v3579_v58  ;;  %v3642_v38 = vpack.c.bf16 %v3582_v45, %v3578_v1  ;;  %v3282_v40 = vpop.f32.mrb[68].mxu0 }
 0x44a   : > { %v8571_v27 = vpack.c.bf16 %v3584_v50, %v3580_v63  ;;  %v6326_v55 = vadd.f32 %v3282_v40, %v8550_v56  ;;  %v3508_v57 = vpop.f32.mrb[68].mxu1  ;;  %v3284_v61 = vpop.f32.mrb[69].mxu0 }
 0x44b   : > { %v6358_v2 = vadd.f32 %v3508_v57, %v8553_v21  ;;  %v6327_v30 = vadd.f32 %v3284_v61, %v8556_v60  ;;  %v3510_v4 = vpop.f32.mrb[69].mxu1  ;;  %v3286_v6 = vpop.f32.mrb[70].mxu0  ;;  %4495 = vmatprep.mubr.bf16.mxu0 %v3642_v38  ;;  %4721 = vmatprep.mubr.bf16.mxu1 %v3642_v38 }
 0x44c   : > { %v6359_v24 = vadd.f32 %v3510_v4, %v8559_v22  ;;  %v6328_v15 = vadd.f32 %v3286_v6, %v8550_v56  ;;  %v3512_v26 = vpop.f32.mrb[70].mxu1  ;;  %v3288_v14 = vpop.f32.mrb[71].mxu0  ;;  %4496 = vmatmul.mubr.bf16.vlgmr.msra.gmra.mrb[96].mxu0 %v3641_v48  ;;  %4722 = vmatmul.mubr.bf16.vlgmr.msra.gmra.mrb[96].mxu1 %v3641_v48  ;;  %v3585_v3 = vmax.f32 %v6326_v55, 0.0 }
 0x44d   : > { %v6360_v7 = vadd.f32 %v3512_v26, %v8553_v21  ;;  %v6329_v8 = vadd.f32 %v3288_v14, %v8556_v60  ;;  %v3514_v9 = vpop.f32.mrb[71].mxu1  ;;  %4577 = vmatpush1.bf16.msra.mxu0 %v7286_v53  ;;  %4803 = vmatpush1.bf16.msra.mxu1 %v7289_v46  ;;  %v3587_v29 = vmax.f32 %v6358_v2, 0.0  ;;  %v3586_v28 = vmax.f32 %v6327_v30, 0.0  ;;  %v7304_v53 = vld [vmem:[#allocation15 + $0x260] ss:$16 sps:$4 sm:$0xff]  }
 0x44e   : > { %v3589_v12 = vmax.f32 %v6328_v15, 0.0  ;;  %v6361_v10 = vadd.f32 %v3514_v9, %v8559_v22  ;;  %4578 = vmatprep.subr.bf16.mxu0 %v7294_v5  ;;  %4804 = vmatprep.subr.bf16.mxu1 %v7297_v20  ;;  %v3588_v59 = vmax.f32 %v6359_v24, 0.0  ;;  %v7307_v46 = vld [vmem:[#allocation15 + $0x268] ss:$16 sps:$4 sm:$0xff]   ;;  %v7312_v5 = vld [vmem:[#allocation15 + $0x284] ss:$16 sps:$4 sm:$0xff]  }
 0x44f   : > { %v3591_v25 = vmax.f32 %v6360_v7, 0.0  ;;  %v3590_v62 = vmax.f32 %v6329_v8, 0.0  ;;  %v7315_v20 = vld [vmem:[#allocation15 + $0x28c] ss:$16 sps:$4 sm:$0xff]   ;;  %v7310_v9 = vld [vmem:[#allocation15 + $0x280] ss:$16 sps:$4 sm:$0xff]  }
 0x450   : > { %v3645_v36 = vpack.c.bf16 %v3589_v12, %v3585_v3  ;;  %v3592_v31 = vmax.f32 %v6361_v10, 0.0 }
 0x451   : > { %v8581_v32 = vpack.c.bf16 %v3591_v25, %v3587_v29  ;;  %v3646_v0 = vpack.c.bf16 %v3590_v62, %v3586_v28  ;;  %4579 = vmatpush1.bf16.msra.mxu0 %v7292_v11  ;;  %v3292_v23 = vpop.f32.mrb[72].mxu0  ;;  %4805 = vmatpush1.bf16.msra.mxu1 %v7295_v13  ;;  %v7313_v11 = vld [vmem:[#allocation15 + $0x288] ss:$16 sps:$4 sm:$0xff]  }
 0x452   : > { %v8583_v34 = vpack.c.bf16 %v3592_v31, %v3588_v59  ;;  %v6330_v16 = vadd.f32 %v3292_v23, %v8550_v56  ;;  %v3518_v37 = vpop.f32.mrb[72].mxu1  ;;  %v3294_v44 = vpop.f32.mrb[73].mxu0  ;;  %4580 = vmatprep.subr.bf16.mxu0 %v7300_v17  ;;  %4806 = vmatprep.subr.bf16.mxu1 %v7303_v19  ;;  %v7318_v17 = vld [vmem:[#allocation15 + $0x2a4] ss:$16 sps:$4 sm:$0xff]   ;;  %v7321_v19 = vld [vmem:[#allocation15 + $0x2ac] ss:$16 sps:$4 sm:$0xff]  }
 0x453   : > { %v6362_v42 = vadd.f32 %v3518_v37, %v8553_v21  ;;  %v6331_v47 = vadd.f32 %v3294_v44, %v8556_v60  ;;  %v3520_v58 = vpop.f32.mrb[73].mxu1  ;;  %v3296_v1 = vpop.f32.mrb[74].mxu0  ;;  %4505 = vmatprep.mubr.bf16.mxu0 %v3646_v0  ;;  %4731 = vmatprep.mubr.bf16.mxu1 %v3646_v0  ;;  %v7319_v37 = vld [vmem:[#allocation15 + $0x2a8] ss:$16 sps:$4 sm:$0xff]  }
 0x454   : > { %v6363_v49 = vadd.f32 %v3520_v58, %v8559_v22  ;;  %v6332_v45 = vadd.f32 %v3296_v1, %v8550_v56  ;;  %v3522_v63 = vpop.f32.mrb[74].mxu1  ;;  %v3298_v48 = vpop.f32.mrb[75].mxu0  ;;  %4506 = vmatmul.mubr.bf16.gmra.mrb[100].mxu0 %v3645_v36  ;;  %4732 = vmatmul.mubr.bf16.gmra.mrb[100].mxu1 %v3645_v36  ;;  %v3593_v55 = vmax.f32 %v6330_v16, 0.0  ;;  %v7316_v16 = vld [vmem:[#allocation15 + $0x2a0] ss:$16 sps:$4 sm:$0xff]  }
 0x455   : > { %v6364_v50 = vadd.f32 %v3522_v63, %v8553_v21  ;;  %v6333_v38 = vadd.f32 %v3298_v48, %v8556_v60  ;;  %v3524_v40 = vpop.f32.mrb[75].mxu1  ;;  %4581 = vmatpush1.bf16.msra.mxu0 %v7298_v33  ;;  %4807 = vmatpush1.bf16.msra.mxu1 %v7301_v35  ;;  %v3595_v2 = vmax.f32 %v6362_v42, 0.0  ;;  %v3594_v30 = vmax.f32 %v6331_v47, 0.0  ;;  %v7324_v42 = vld [vmem:[#allocation15 + $0x2c4] ss:$16 sps:$4 sm:$0xff]  }
 0x456   : > { %v3597_v57 = vmax.f32 %v6332_v45, 0.0  ;;  %v6365_v61 = vadd.f32 %v3524_v40, %v8559_v22  ;;  %4582 = vmatprep.subr.bf16.mxu0 %v7306_v18  ;;  %4808 = vmatprep.subr.bf16.mxu1 %v7309_v39  ;;  %v3596_v24 = vmax.f32 %v6363_v49, 0.0  ;;  %v7327_v47 = vld [vmem:[#allocation15 + $0x2cc] ss:$16 sps:$4 sm:$0xff]  }
 0x457   : > { %v3599_v4 = vmax.f32 %v6364_v50, 0.0  ;;  %v3598_v6 = vmax.f32 %v6333_v38, 0.0 }
 0x458   : > { %v3649_v15 = vpack.c.bf16 %v3597_v57, %v3593_v55  ;;  %v3600_v26 = vmax.f32 %v6365_v61, 0.0  ;;  %v7325_v55 = vld [vmem:[#allocation15 + $0x2c8] ss:$16 sps:$4 sm:$0xff]  }
 0x459   : > { %v8593_v14 = vpack.c.bf16 %v3599_v4, %v3595_v2  ;;  %v3650_v7 = vpack.c.bf16 %v3598_v6, %v3594_v30  ;;  %4583 = vmatpush1.bf16.msra.mxu0 %v7304_v53  ;;  %v3302_v8 = vpop.f32.mrb[76].mxu0  ;;  %4809 = vmatpush1.bf16.msra.mxu1 %v7307_v46  ;;  %v7322_v46 = vld [vmem:[#allocation15 + $0x2c0] ss:$16 sps:$4 sm:$0xff]   ;;  %v7330_v2 = vld [vmem:[#allocation15 + $0x2e4] ss:$16 sps:$4 sm:$0xff]  }
 0x45a   : > { %v8595_v13 = vpack.c.bf16 %v3600_v26, %v3596_v24  ;;  %v6334_v3 = vadd.f32 %v3302_v8, %v8550_v56  ;;  %v3528_v12 = vpop.f32.mrb[76].mxu1  ;;  %v3304_v10 = vpop.f32.mrb[77].mxu0  ;;  %4584 = vmatprep.subr.bf16.mxu0 %v7312_v5  ;;  %4810 = vmatprep.subr.bf16.mxu1 %v7315_v20  ;;  %v7333_v30 = vld [vmem:[#allocation15 + $0x2ec] ss:$16 sps:$4 sm:$0xff]  }
 0x45b   : > { %v6366_v29 = vadd.f32 %v3528_v12, %v8553_v21  ;;  %v6335_v28 = vadd.f32 %v3304_v10, %v8556_v60  ;;  %v3530_v25 = vpop.f32.mrb[77].mxu1  ;;  %v3306_v62 = vpop.f32.mrb[78].mxu0  ;;  %4515 = vmatprep.mubr.bf16.mxu0 %v3650_v7  ;;  %4741 = vmatprep.mubr.bf16.mxu1 %v3650_v7  ;;  %v7328_v10 = vld [vmem:[#allocation15 + $0x2e0] ss:$16 sps:$4 sm:$0xff]  }
 0x45c   : > { %v6367_v59 = vadd.f32 %v3530_v25, %v8559_v22  ;;  %v6336_v36 = vadd.f32 %v3306_v62, %v8550_v56  ;;  %v3532_v31 = vpop.f32.mrb[78].mxu1  ;;  %v3308_v0 = vpop.f32.mrb[79].mxu0  ;;  %4516 = vmatmul.mubr.bf16.gmra.mrb[104].mxu0 %v3649_v15  ;;  %4742 = vmatmul.mubr.bf16.gmra.mrb[104].mxu1 %v3649_v15  ;;  %v3601_v44 = vmax.f32 %v6334_v3, 0.0  ;;  %v7336_v25 = vld [vmem:[#allocation15 + $0x304] ss:$16 sps:$4 sm:$0xff]  }
 0x45d   : > { %v6368_v23 = vadd.f32 %v3532_v31, %v8553_v21  ;;  %v6337_v33 = vadd.f32 %v3308_v0, %v8556_v60  ;;  %v3534_v35 = vpop.f32.mrb[79].mxu1  ;;  %4585 = vmatpush1.bf16.msra.mxu0 %v7310_v9  ;;  %4811 = vmatpush1.bf16.msra.mxu1 %v7313_v11  ;;  %v3603_v58 = vmax.f32 %v6366_v29, 0.0  ;;  %v3602_v1 = vmax.f32 %v6335_v28, 0.0  ;;  %v7339_v62 = vld [vmem:[#allocation15 + $0x30c] ss:$16 sps:$4 sm:$0xff]  }
 0x45e   : > { %v3605_v18 = vmax.f32 %v6336_v36, 0.0  ;;  %v6369_v39 = vadd.f32 %v3534_v35, %v8559_v22  ;;  %4586 = vmatprep.subr.bf16.mxu0 %v7318_v17  ;;  %4812 = vmatprep.subr.bf16.mxu1 %v7321_v19  ;;  %v3604_v63 = vmax.f32 %v6367_v59, 0.0  ;;  %v7331_v17 = vld [vmem:[#allocation15 + $0x2e8] ss:$16 sps:$4 sm:$0xff]  }
 0x45f   : > { %v3607_v49 = vmax.f32 %v6368_v23, 0.0  ;;  %v3606_v45 = vmax.f32 %v6337_v33, 0.0 }
 0x460   : > { %v3653_v48 = vpack.c.bf16 %v3605_v18, %v3601_v44  ;;  %v3608_v50 = vmax.f32 %v6369_v39, 0.0  ;;  %v7334_v18 = vld [vmem:[#allocation15 + $0x300] ss:$16 sps:$4 sm:$0xff]   ;;  %v7337_v39 = vld [vmem:[#allocation15 + $0x308] ss:$16 sps:$4 sm:$0xff]  }
 0x461   : > { %v8605_v38 = vpack.c.bf16 %v3607_v49, %v3603_v58  ;;  %v3654_v40 = vpack.c.bf16 %v3606_v45, %v3602_v1  ;;  %4587 = vmatpush1.bf16.msra.mxu0 %v7316_v16  ;;  %v3312_v53 = vpop.f32.mrb[80].mxu0  ;;  %4813 = vmatpush1.bf16.msra.mxu1 %v7319_v37  ;;  %v7342_v49 = vld [vmem:[#allocation15 + $0x324] ss:$16 sps:$4 sm:$0xff]   ;;  %v7345_v45 = vld [vmem:[#allocation15 + $0x32c] ss:$16 sps:$4 sm:$0xff]  }
 0x462   : > { %v8607_v57 = vpack.c.bf16 %v3608_v50, %v3604_v63  ;;  %v6338_v61 = vadd.f32 %v3312_v53, %v8550_v56  ;;  %v3538_v5 = vpop.f32.mrb[80].mxu1  ;;  %v3314_v20 = vpop.f32.mrb[81].mxu0  ;;  %4588 = vmatprep.subr.bf16.mxu0 %v7324_v42  ;;  %4814 = vmatprep.subr.bf16.mxu1 %v7327_v47 }
 0x463   : > { %v6370_v4 = vadd.f32 %v3538_v5, %v8553_v21  ;;  %v6339_v6 = vadd.f32 %v3314_v20, %v8556_v60  ;;  %v3540_v24 = vpop.f32.mrb[81].mxu1  ;;  %v3316_v15 = vpop.f32.mrb[82].mxu0  ;;  %4525 = vmatprep.mubr.bf16.mxu0 %v3654_v40  ;;  %4751 = vmatprep.mubr.bf16.mxu1 %v3654_v40 }
 0x464   : > { %v6371_v26 = vadd.f32 %v3540_v24, %v8559_v22  ;;  %v6340_v7 = vadd.f32 %v3316_v15, %v8550_v56  ;;  %v3542_v8 = vpop.f32.mrb[82].mxu1  ;;  %v3318_v9 = vpop.f32.mrb[83].mxu0  ;;  %4526 = vmatmul.mubr.bf16.gmra.mrb[108].mxu0 %v3653_v48  ;;  %4752 = vmatmul.mubr.bf16.gmra.mrb[108].mxu1 %v3653_v48  ;;  %v3609_v19 = vmax.f32 %v6338_v61, 0.0 }
 0x465   : > { %v6372_v11 = vadd.f32 %v3542_v8, %v8553_v21  ;;  %v6341_v3 = vadd.f32 %v3318_v9, %v8556_v60  ;;  %v3544_v12 = vpop.f32.mrb[83].mxu1  ;;  %4589 = vmatpush1.bf16.msra.mxu0 %v7322_v46  ;;  %4815 = vmatpush1.bf16.msra.mxu1 %v7325_v55  ;;  %v3611_v59 = vmax.f32 %v6370_v4, 0.0  ;;  %v3610_v36 = vmax.f32 %v6339_v6, 0.0  ;;  %v7343_v4 = vld [vmem:[#allocation15 + $0x328] ss:$16 sps:$4 sm:$0xff]  }
 0x466   : > { %v3613_v29 = vmax.f32 %v6340_v7, 0.0  ;;  %v6373_v28 = vadd.f32 %v3544_v12, %v8559_v22  ;;  %4590 = vmatprep.subr.bf16.mxu0 %v7330_v2  ;;  %4816 = vmatprep.subr.bf16.mxu1 %v7333_v30  ;;  %v3612_v23 = vmax.f32 %v6371_v26, 0.0  ;;  %v7340_v30 = vld [vmem:[#allocation15 + $0x320] ss:$16 sps:$4 sm:$0xff]   ;;  %v7348_v26 = vld [vmem:[#allocation15 + $0x344] ss:$16 sps:$4 sm:$0xff]  }
 0x467   : > { %v3615_v31 = vmax.f32 %v6372_v11, 0.0  ;;  %v3614_v0 = vmax.f32 %v6341_v3, 0.0  ;;  %v7351_v7 = vld [vmem:[#allocation15 + $0x34c] ss:$16 sps:$4 sm:$0xff]  }
 0x468   : > { %v3657_v33 = vpack.c.bf16 %v3613_v29, %v3609_v19  ;;  %v3616_v35 = vmax.f32 %v6373_v28, 0.0 }
 0x469   : > { %v8617_v16 = vpack.c.bf16 %v3615_v31, %v3611_v59  ;;  %v3658_v37 = vpack.c.bf16 %v3614_v0, %v3610_v36  ;;  %4591 = vmatpush1.bf16.msra.mxu0 %v7328_v10  ;;  %v3322_v44 = vpop.f32.mrb[84].mxu0  ;;  %4817 = vmatpush1.bf16.msra.mxu1 %v7331_v17 }
 0x46a   : > { %v8619_v42 = vpack.c.bf16 %v3616_v35, %v3612_v23  ;;  %v6342_v47 = vadd.f32 %v3322_v44, %v8550_v56  ;;  %v3548_v58 = vpop.f32.mrb[84].mxu1  ;;  %v3324_v1 = vpop.f32.mrb[85].mxu0  ;;  %4592 = vmatprep.subr.bf16.mxu0 %v7336_v25  ;;  %4818 = vmatprep.subr.bf16.mxu1 %v7339_v62  ;;  %v7346_v25 = vld [vmem:[#allocation15 + $0x340] ss:$16 sps:$4 sm:$0xff]   ;;  %v7349_v62 = vld [vmem:[#allocation15 + $0x348] ss:$16 sps:$4 sm:$0xff]  }
 0x46b   : > { %v6374_v63 = vadd.f32 %v3548_v58, %v8553_v21  ;;  %v6343_v48 = vadd.f32 %v3324_v1, %v8556_v60  ;;  %v3550_v50 = vpop.f32.mrb[85].mxu1  ;;  %v3326_v40 = vpop.f32.mrb[86].mxu0  ;;  %4535 = vmatprep.mubr.bf16.mxu0 %v3658_v37  ;;  %4761 = vmatprep.mubr.bf16.mxu1 %v3658_v37  ;;  %v7354_v23 = vld [vmem:[#allocation15 + $0x364] ss:$16 sps:$4 sm:$0xff]  }
 0x46c   : > { %v6375_v53 = vadd.f32 %v3550_v50, %v8559_v22  ;;  %v6344_v46 = vadd.f32 %v3326_v40, %v8550_v56  ;;  %v3552_v55 = vpop.f32.mrb[86].mxu1  ;;  %v3328_v61 = vpop.f32.mrb[87].mxu0  ;;  %4536 = vmatmul.mubr.bf16.gmra.mrb[112].mxu0 %v3657_v33  ;;  %4762 = vmatmul.mubr.bf16.gmra.mrb[112].mxu1 %v3657_v33  ;;  %v3617_v6 = vmax.f32 %v6342_v47, 0.0  ;;  %v7357_v33 = vld [vmem:[#allocation15 + $0x36c] ss:$16 sps:$4 sm:$0xff]  }
 0x46d   : > { %v6376_v5 = vadd.f32 %v3552_v55, %v8553_v21  ;;  %v6345_v20 = vadd.f32 %v3328_v61, %v8556_v60  ;;  %v3554_v2 = vpop.f32.mrb[87].mxu1  ;;  %4593 = vmatpush1.bf16.msra.mxu0 %v7334_v18  ;;  %4819 = vmatpush1.bf16.msra.mxu1 %v7337_v39  ;;  %v3619_v8 = vmax.f32 %v6374_v63, 0.0  ;;  %v3618_v9 = vmax.f32 %v6343_v48, 0.0  ;;  %v7352_v48 = vld [vmem:[#allocation15 + $0x360] ss:$16 sps:$4 sm:$0xff]  }
 0x46e   : > { %v3621_v24 = vmax.f32 %v6344_v46, 0.0  ;;  %v6377_v15 = vadd.f32 %v3554_v2, %v8559_v22  ;;  %4594 = vmatprep.subr.bf16.mxu0 %v7342_v49  ;;  %4820 = vmatprep.subr.bf16.mxu1 %v7345_v45  ;;  %v3620_v12 = vmax.f32 %v6375_v53, 0.0  ;;  %v7355_v50 = vld [vmem:[#allocation15 + $0x368] ss:$16 sps:$4 sm:$0xff]   ;;  %v7360_v55 = vld [vmem:[#allocation15 + $0x384] ss:$16 sps:$4 sm:$0xff]  }
 0x46f   : > { %v3623_v11 = vmax.f32 %v6376_v5, 0.0  ;;  %v3622_v3 = vmax.f32 %v6345_v20, 0.0  ;;  %v7363_v61 = vld [vmem:[#allocation15 + $0x38c] ss:$16 sps:$4 sm:$0xff]  }
 0x470   : > { %v3661_v10 = vpack.c.bf16 %v3621_v24, %v3617_v6  ;;  %v3624_v17 = vmax.f32 %v6377_v15, 0.0 }
 0x471   : > { %v8629_v19 = vpack.c.bf16 %v3623_v11, %v3619_v8  ;;  %v3662_v29 = vpack.c.bf16 %v3622_v3, %v3618_v9  ;;  %4595 = vmatpush1.bf16.msra.mxu0 %v7340_v30  ;;  %v3332_v28 = vpop.f32.mrb[88].mxu0  ;;  %4821 = vmatpush1.bf16.msra.mxu1 %v7343_v4  ;;  %v7358_v8 = vld [vmem:[#allocation15 + $0x380] ss:$16 sps:$4 sm:$0xff]   ;;  %v7361_v9 = vld [vmem:[#allocation15 + $0x388] ss:$16 sps:$4 sm:$0xff]  }
 0x472   : > { %v8631_v59 = vpack.c.bf16 %v3624_v17, %v3620_v12  ;;  %v6346_v36 = vadd.f32 %v3332_v28, %v8550_v56  ;;  %v3558_v31 = vpop.f32.mrb[88].mxu1  ;;  %v3334_v0 = vpop.f32.mrb[89].mxu0  ;;  %4596 = vmatprep.subr.bf16.mxu0 %v7348_v26  ;;  %4822 = vmatprep.subr.bf16.mxu1 %v7351_v7  ;;  %v7366_v17 = vld [vmem:[#allocation15 + $0x3a4] ss:$16 sps:$4 sm:$0xff]  }
 0x473   : > { %v6378_v35 = vadd.f32 %v3558_v31, %v8553_v21  ;;  %v6347_v37 = vadd.f32 %v3334_v0, %v8556_v60  ;;  %v3560_v44 = vpop.f32.mrb[89].mxu1  ;;  %v3336_v18 = vpop.f32.mrb[90].mxu0  ;;  %4545 = vmatprep.mubr.bf16.mxu0 %v3662_v29  ;;  %4771 = vmatprep.mubr.bf16.mxu1 %v3662_v29  ;;  %v7369_v29 = vld [vmem:[#allocation15 + $0x3ac] ss:$16 sps:$4 sm:$0xff]  }
 0x474   : > { %v6379_v39 = vadd.f32 %v3560_v44, %v8559_v22  ;;  %v6348_v47 = vadd.f32 %v3336_v18, %v8550_v56  ;;  %v3562_v58 = vpop.f32.mrb[90].mxu1  ;;  %v3338_v1 = vpop.f32.mrb[91].mxu0  ;;  %4546 = vmatmul.mubr.bf16.gmra.mrb[116].mxu0 %v3661_v10  ;;  %4772 = vmatmul.mubr.bf16.gmra.mrb[116].mxu1 %v3661_v10  ;;  %v3625_v40 = vmax.f32 %v6346_v36, 0.0  ;;  %v7364_v18 = vld [vmem:[#allocation15 + $0x3a0] ss:$16 sps:$4 sm:$0xff]  }
 0x475   : > { %v6380_v49 = vadd.f32 %v3562_v58, %v8553_v21  ;;  %v6349_v45 = vadd.f32 %v3338_v1, %v8556_v60  ;;  %v3564_v63 = vpop.f32.mrb[91].mxu1  ;;  %4597 = vmatpush1.bf16.msra.mxu0 %v7346_v25  ;;  %4823 = vmatpush1.bf16.msra.mxu1 %v7349_v62  ;;  %v3627_v5 = vmax.f32 %v6378_v35, 0.0  ;;  %v3626_v20 = vmax.f32 %v6347_v37, 0.0 }
 0x476   : > { %v3629_v53 = vmax.f32 %v6348_v47, 0.0  ;;  %v6381_v46 = vadd.f32 %v3564_v63, %v8559_v22  ;;  %4598 = vmatprep.subr.bf16.mxu0 %v7354_v23  ;;  %4824 = vmatprep.subr.bf16.mxu1 %v7357_v33  ;;  %v3628_v4 = vmax.f32 %v6379_v39, 0.0  ;;  %v7367_v39 = vld [vmem:[#allocation15 + $0x3a8] ss:$16 sps:$4 sm:$0xff]  }
 0x477   : > { %v3631_v2 = vmax.f32 %v6380_v49, 0.0  ;;  %v3630_v30 = vmax.f32 %v6349_v45, 0.0  ;;  %v7375_v49 = vld [vmem:[#allocation15 + $0x3cc] ss:$16 sps:$4 sm:$0xff]  }
 0x478   : > { %v3665_v6 = vpack.c.bf16 %v3629_v53, %v3625_v40  ;;  %v3632_v24 = vmax.f32 %v6381_v46, 0.0 }
 0x479   : > { %v8641_v15 = vpack.c.bf16 %v3631_v2, %v3627_v5  ;;  %v3666_v26 = vpack.c.bf16 %v3630_v30, %v3626_v20  ;;  %4599 = vmatpush1.bf16.msra.mxu0 %v7352_v48  ;;  %v3342_v7 = vpop.f32.mrb[92].mxu0  ;;  %4825 = vmatpush1.bf16.msra.mxu1 %v7355_v50  ;;  %v7378_v5 = vld [vmem:[#allocation15 + $0x3e4] ss:$16 sps:$4 sm:$0xff]   ;;  %v7381_v20 = vld [vmem:[#allocation15 + $0x3ec] ss:$16 sps:$4 sm:$0xff]  }
 0x47a   : > { %v8643_v11 = vpack.c.bf16 %v3632_v24, %v3628_v4  ;;  %v6350_v3 = vadd.f32 %v3342_v7, %v8550_v56  ;;  %v3568_v12 = vpop.f32.mrb[92].mxu1  ;;  %v3344_v10 = vpop.f32.mrb[93].mxu0  ;;  %4600 = vmatprep.subr.bf16.mxu0 %v7360_v55  ;;  %4826 = vmatprep.subr.bf16.mxu1 %v7363_v61  ;;  %v7370_v55 = vld [vmem:[#allocation15 + $0x3c0] ss:$16 sps:$4 sm:$0xff]   ;;  %v7379_v30 = vld [vmem:[#allocation15 + $0x3e8] ss:$16 sps:$4 sm:$0xff]  }
 0x47b   : > { %v6382_v28 = vadd.f32 %v3568_v12, %v8553_v21  ;;  %v6351_v25 = vadd.f32 %v3344_v10, %v8556_v60  ;;  %v3570_v62 = vpop.f32.mrb[93].mxu1  ;;  %v3346_v36 = vpop.f32.mrb[94].mxu0  ;;  %4555 = vmatprep.mubr.bf16.mxu0 %v3666_v26  ;;  %4781 = vmatprep.mubr.bf16.mxu1 %v3666_v26  ;;  %v7376_v2 = vld [vmem:[#allocation15 + $0x3e0] ss:$16 sps:$4 sm:$0xff]   ;;  %v7382_v4 = vld [vmem:[#allocation18 + $0x40] sm:$0xff]   ;;  %v7392_v12 = vld [vmem:[#allocation18 + $0xd0] sm:$0xff]  }
 0x47c   : > { %v6383_v31 = vadd.f32 %v3570_v62, %v8559_v22  ;;  %v6352_v0 = vadd.f32 %v3346_v36, %v8550_v56  ;;  %v3572_v23 = vpop.f32.mrb[94].mxu1  ;;  %v3348_v33 = vpop.f32.mrb[95].mxu0  ;;  %4556 = vmatmul.mubr.bf16.gmra.mrb[120].mxu0 %v3665_v6  ;;  %4782 = vmatmul.mubr.bf16.gmra.mrb[120].mxu1 %v3665_v6  ;;  %v3633_v47 = vmax.f32 %v6350_v3, 0.0  ;;  %v7372_v56 = vld [vmem:[#allocation15 + $0x3c4] ss:$16 sps:$4 sm:$0xff]   ;;  %v7386_v7 = vld [vmem:[#allocation18 + $0x48] sm:$0xff]  }
 0x47d   : > { %v6384_v35 = vadd.f32 %v3572_v23, %v8553_v21  ;;  %v6353_v37 = vadd.f32 %v3348_v33, %v8556_v60  ;;  %v3574_v44 = vpop.f32.mrb[95].mxu1  ;;  %4601 = vmatpush1.bf16.msra.mxu0 %v7358_v8  ;;  %4827 = vmatpush1.bf16.msra.mxu1 %v7361_v9  ;;  %v3635_v45 = vmax.f32 %v6382_v28, 0.0  ;;  %v3634_v63 = vmax.f32 %v6351_v25, 0.0  ;;  %v7384_v6 = vld [vmem:[#allocation18 + $0xc0] sm:$0xff]   ;;  %v7388_v8 = vld [vmem:[#allocation18 + $0xc8] sm:$0xff]   ;;  %v7390_v3 = vld [vmem:[#allocation18 + $0x50] sm:$0xff]  }
 0x47e   : > { %v3637_v58 = vmax.f32 %v6352_v0, 0.0  ;;  %v6385_v1 = vadd.f32 %v3574_v44, %v8559_v22  ;;  %4602 = vmatprep.subr.bf16.mxu0 %v7366_v17  ;;  %4828 = vmatprep.subr.bf16.mxu1 %v7369_v29  ;;  %v3636_v21 = vmax.f32 %v6383_v31, 0.0  ;;  %v7373_v22 = vld [vmem:[#allocation15 + $0x3c8] ss:$16 sps:$4 sm:$0xff]   ;;  %v7389_v9 = vld [vmem:[#allocation18 + $0x88] sm:$0xff]   ;;  %v7394_v29 = vld [vmem:[#allocation18 + $0x58] sm:$0xff]  }
 0x47f   : > { %v3639_v48 = vmax.f32 %v6384_v35, 0.0  ;;  %v3638_v50 = vmax.f32 %v6353_v37, 0.0  ;;  %v7383_v24 = vld [vmem:[#allocation18] sm:$0xff]   ;;  %v7391_v10 = vld [vmem:[#allocation18 + $0x10] sm:$0xff]   ;;  %v7397_v28 = vld [vmem:[#allocation18 + $0x98] sm:$0xff]  }
 0x480   : > { %v3669_v40 = vpack.c.bf16 %v3637_v58, %v3633_v47  ;;  %v3640_v60 = vmax.f32 %v6385_v1, 0.0  ;;  %v7385_v26 = vld [vmem:[#allocation18 + $0x80] sm:$0xff]   ;;  %v7393_v17 = vld [vmem:[#allocation18 + $0x90] sm:$0xff]   ;;  %v7402_v0 = vld [vmem:[#allocation18 + $0x68] sm:$0xff]  }
 0x481   : > { %v8653_v53 = vpack.c.bf16 %v3639_v48, %v3635_v45  ;;  %v3670_v46 = vpack.c.bf16 %v3638_v50, %v3634_v63  ;;  %4603 = vmatpush1.bf16.msra.mxu0 %v7364_v18  ;;  %4829 = vmatpush1.bf16.msra.mxu1 %v7367_v39  ;;  %v7398_v25 = vld [vmem:[#allocation18 + $0x60] sm:$0xff]   ;;  %v7405_v23 = vld [vmem:[#allocation18 + $0xa8] sm:$0xff]   ;;  %v7406_v33 = vld [vmem:[#allocation18 + $0x70] sm:$0xff]  }
 0x482   : > { %v8655_v61 = vpack.c.bf16 %v3640_v60, %v3636_v21  ;;  %4604 = vmatprep.subr.bf16.mxu0 %v7372_v56  ;;  %4830 = vmatprep.subr.bf16.mxu1 %v7375_v49  ;;  %v7400_v62 = vld [vmem:[#allocation18 + $0xe0] sm:$0xff]   ;;  %v7408_v35 = vld [vmem:[#allocation18 + $0xf0] sm:$0xff]  }
 0x483   : > { %4565 = vmatprep.mubr.bf16.mxu0 %v3670_v46  ;;  %4791 = vmatprep.mubr.bf16.mxu1 %v3670_v46  ;;  %v7399_v36 = vld [vmem:[#allocation18 + $0x20] sm:$0xff]   ;;  %v7407_v37 = vld [vmem:[#allocation18 + $0x30] sm:$0xff]  }
 0x484   : > { %4566 = vmatmul.mubr.bf16.gmra.mrb[124].mxu0 %v3669_v40  ;;  %4792 = vmatmul.mubr.bf16.gmra.mrb[124].mxu1 %v3669_v40  ;;  %v7401_v31 = vld [vmem:[#allocation18 + $0xa0] sm:$0xff]   ;;  %v7409_v44 = vld [vmem:[#allocation18 + $0xb0] sm:$0xff]  }
 0x485   : > { %4605 = vmatpush1.bf16.msra.mxu0 %v7370_v55  ;;  %4608 = vmatprep.mubr.bf16.mxu0 %v8571_v27 }
 0x486   : > { %4831 = vmatpush1.bf16.msra.mxu1 %v7373_v22  ;;  %4834 = vmatprep.mubr.bf16.mxu1 %v8571_v27  ;;  %v7387_v27 = vld [vmem:[#allocation18 + $0x8] sm:$0xff]  }
 0x487   : > { %4606 = vmatprep.subr.bf16.mxu0 %v7378_v5  ;;  %4832 = vmatprep.subr.bf16.mxu1 %v7381_v20 }
 0x489   : > { %4607 = vmatpush1.bf16.msra.mxu0 %v7376_v2 }
 0x48a   : > { %4833 = vmatpush1.bf16.msra.mxu1 %v7379_v30  ;;  %6130 = vmatprep.subr.bf16.mxu0 %v7382_v4 }
 0x48b   : > { %6194 = vmatprep.subr.bf16.mxu1 %v7384_v6 }
 0x48c   : > { %4609 = vmatmul.mubr.bf16.vlgmr.msra.gmra.mrb[96].mxu0 %v8569_v52 }
 0x48d   : > { %4835 = vmatmul.mubr.bf16.vlgmr.msra.gmra.mrb[96].mxu1 %v8569_v52  ;;  %4618 = vmatprep.mubr.bf16.mxu0 %v8583_v34  ;;  %v7396_v52 = vld [vmem:[#allocation18 + $0xd8] sm:$0xff]  }
 0x48e   : > { %4844 = vmatprep.mubr.bf16.mxu1 %v8583_v34  ;;  %6131 = vmatpush3.bf16.msra.mxu0 %v7383_v24  ;;  %v7395_v34 = vld [vmem:[#allocation18 + $0x18] sm:$0xff]  }
 0x48f   : > { %6195 = vmatpush3.bf16.msra.mxu1 %v7385_v26  ;;  %6132 = vmatprep.subr.bf16.mxu0 %v7386_v7 }
 0x490   : > { %6196 = vmatprep.subr.bf16.mxu1 %v7388_v8 }
 0x492   : > { %6133 = vmatpush3.bf16.msra.mxu0 %v7387_v27 }
 0x493   : > { %6197 = vmatpush3.bf16.msra.mxu1 %v7389_v9  ;;  %6134 = vmatprep.subr.bf16.mxu0 %v7390_v3 }
 0x494   : > { %4619 = vmatmul.mubr.bf16.gmra.mrb[100].mxu0 %v8581_v32  ;;  %6198 = vmatprep.subr.bf16.mxu1 %v7392_v12 }
 0x495   : > { %4845 = vmatmul.mubr.bf16.gmra.mrb[100].mxu1 %v8581_v32  ;;  %4628 = vmatprep.mubr.bf16.mxu0 %v8595_v13  ;;  %v7404_v32 = vld [vmem:[#allocation18 + $0xe8] sm:$0xff]  }
 0x496   : > { %4854 = vmatprep.mubr.bf16.mxu1 %v8595_v13  ;;  %6135 = vmatpush3.bf16.msra.mxu0 %v7391_v10  ;;  %v7403_v13 = vld [vmem:[#allocation18 + $0x28] sm:$0xff]  }
 0x497   : > { %6199 = vmatpush3.bf16.msra.mxu1 %v7393_v17  ;;  %6136 = vmatprep.subr.bf16.mxu0 %v7394_v29 }
 0x498   : > { %6200 = vmatprep.subr.bf16.mxu1 %v7396_v52 }
 0x49a   : > { %6137 = vmatpush3.bf16.msra.mxu0 %v7395_v34 }
 0x49b   : > { %6201 = vmatpush3.bf16.msra.mxu1 %v7397_v28  ;;  %6138 = vmatprep.subr.bf16.mxu0 %v7398_v25 }
 0x49c   : > { %4629 = vmatmul.mubr.bf16.gmra.mrb[104].mxu0 %v8593_v14  ;;  %6202 = vmatprep.subr.bf16.mxu1 %v7400_v62 }
 0x49d   : > { %4855 = vmatmul.mubr.bf16.gmra.mrb[104].mxu1 %v8593_v14  ;;  %4638 = vmatprep.mubr.bf16.mxu0 %v8607_v57  ;;  %v7410_v14 = vld [vmem:[#allocation18 + $0x78] sm:$0xff]  }
 0x49e   : > { %4864 = vmatprep.mubr.bf16.mxu1 %v8607_v57  ;;  %6139 = vmatpush3.bf16.msra.mxu0 %v7399_v36  ;;  %v7411_v57 = vld [vmem:[#allocation18 + $0x38] sm:$0xff]  }
 0x49f   : > { %6203 = vmatpush3.bf16.msra.mxu1 %v7401_v31  ;;  %6140 = vmatprep.subr.bf16.mxu0 %v7402_v0 }
 0x4a0   : > { %6204 = vmatprep.subr.bf16.mxu1 %v7404_v32 }
 0x4a2   : > { %6141 = vmatpush3.bf16.msra.mxu0 %v7403_v13 }
 0x4a3   : > { %6205 = vmatpush3.bf16.msra.mxu1 %v7405_v23  ;;  %6142 = vmatprep.subr.bf16.mxu0 %v7406_v33 }
 0x4a4   : > { %4639 = vmatmul.mubr.bf16.gmra.mrb[108].mxu0 %v8605_v38  ;;  %6206 = vmatprep.subr.bf16.mxu1 %v7408_v35 }
 0x4a5   : > { %4865 = vmatmul.mubr.bf16.gmra.mrb[108].mxu1 %v8605_v38  ;;  %4648 = vmatprep.mubr.bf16.mxu0 %v8619_v42  ;;  %v7412_v38 = vld [vmem:[#allocation18 + $0xf8] sm:$0xff]  }
 0x4a6   : > { %4874 = vmatprep.mubr.bf16.mxu1 %v8619_v42  ;;  %6143 = vmatpush3.bf16.msra.mxu0 %v7407_v37  ;;  %v3801_v42 = vld [vmem:[#allocation17] sm:$0xf] }
 0x4a7   : > { %6207 = vmatpush3.bf16.msra.mxu1 %v7409_v44  ;;  %6144 = vmatprep.subr.bf16.mxu0 %v7410_v14 }
 0x4a8   : > { %6208 = vmatprep.subr.bf16.mxu1 %v7412_v38 }
 0x4aa   : > { %6145 = vmatpush3.bf16.msra.mxu0 %v7411_v57 }
 0x4ac   : > { %4649 = vmatmul.mubr.bf16.gmra.mrb[112].mxu0 %v8617_v16 }
 0x4ad   : > { %4875 = vmatmul.mubr.bf16.gmra.mrb[112].mxu1 %v8617_v16  ;;  %4658 = vmatprep.mubr.bf16.mxu0 %v8631_v59  ;;  %v7413_v16 = vld [vmem:[#allocation18 + $0xb8] sm:$0xff]  }
 0x4ae   : > { %4884 = vmatprep.mubr.bf16.mxu1 %v8631_v59  ;;  %6209 = vmatpush3.bf16.msra.mxu1 %v7413_v16  ;;  %v8693_v59 = vrot.slane %v3801_v42, %v8273_v51 }
 0x4b4   : > { %4659 = vmatmul.mubr.bf16.gmra.mrb[116].mxu0 %v8629_v19 }
 0x4b5   : > { %4885 = vmatmul.mubr.bf16.gmra.mrb[116].mxu1 %v8629_v19  ;;  %4668 = vmatprep.mubr.bf16.mxu0 %v8643_v11  ;;  %v8690_v19 = vrot.slane %v3801_v42, %v8261_v41 }
 0x4b6   : > { %4894 = vmatprep.mubr.bf16.mxu1 %v8643_v11  ;;  %v8699_v11 = vrot.slane %v3801_v42, %v8276_v54 }
 0x4bc   : > { %4669 = vmatmul.mubr.bf16.gmra.mrb[120].mxu0 %v8641_v15 }
 0x4bd   : > { %4895 = vmatmul.mubr.bf16.gmra.mrb[120].mxu1 %v8641_v15  ;;  %4678 = vmatprep.mubr.bf16.mxu0 %v8655_v61  ;;  %v8696_v15 = vrot.slane %v3801_v42, %v8263_v43 }
 0x4be   : > { %4904 = vmatprep.mubr.bf16.mxu1 %v8655_v61 }
 0x4c4   : > { %4679 = vmatmul.mubr.bf16.gmra.mrb[124].mxu0 %v8653_v53 }
 0x4c5   : > { %4905 = vmatmul.mubr.bf16.gmra.mrb[124].mxu1 %v8653_v53 }
 0x55f   : > { %v4610_v18 = vpop.f32.mrb[96].mxu0 }
 0x560   : > { %v6386_v39 = vadd.f32 %v4610_v18, %v8690_v19  ;;  %v4836_v47 = vpop.f32.mrb[96].mxu1  ;;  %v4612_v58 = vpop.f32.mrb[97].mxu0 }
 0x561   : > { %v6418_v1 = vadd.f32 %v4836_v47, %v8693_v59  ;;  %v6387_v56 = vadd.f32 %v4612_v58, %v8696_v15  ;;  %v4838_v41 = vpop.f32.mrb[97].mxu1  ;;  %v4614_v49 = vpop.f32.mrb[98].mxu0 }
 0x562   : > { %v6419_v51 = vadd.f32 %v4838_v41, %v8699_v11  ;;  %v6388_v45 = vadd.f32 %v4614_v49, %v8690_v19  ;;  %v4840_v43 = vpop.f32.mrb[98].mxu1  ;;  %v4616_v63 = vpop.f32.mrb[99].mxu0  ;;  %v4915_v21 = vmax.f32 %v6386_v39, 0.0 }
 0x563   : > { %v6420_v54 = vadd.f32 %v4840_v43, %v8693_v59  ;;  %v6389_v48 = vadd.f32 %v4616_v63, %v8696_v15  ;;  %v4842_v50 = vpop.f32.mrb[99].mxu1  ;;  %v4917_v53 = vmax.f32 %v6418_v1, 0.0  ;;  %v4916_v46 = vmax.f32 %v6387_v56, 0.0 }
 0x564   : > { %v4919_v40 = vmax.f32 %v6388_v45, 0.0  ;;  %v6421_v60 = vadd.f32 %v4842_v50, %v8699_v11  ;;  %v4918_v22 = vmax.f32 %v6419_v51, 0.0 }
 0x565   : > { %v4921_v55 = vmax.f32 %v6420_v54, 0.0  ;;  %v4920_v61 = vmax.f32 %v6389_v48, 0.0 }
 0x566   : > { %v4979_v5 = vpack.c.bf16 %v4919_v40, %v4915_v21  ;;  %v4922_v20 = vmax.f32 %v6421_v60, 0.0 }
 0x567   : > { %v4981_v2 = vpack.c.bf16 %v4921_v55, %v4917_v53  ;;  %v4980_v30 = vpack.c.bf16 %v4920_v61, %v4916_v46  ;;  %v4620_v4 = vpop.f32.mrb[100].mxu0 }
 0x568   : > { %v4982_v6 = vpack.c.bf16 %v4922_v20, %v4918_v22  ;;  %v6390_v24 = vadd.f32 %v4620_v4, %v8690_v19  ;;  %v4846_v26 = vpop.f32.mrb[100].mxu1  ;;  %v4622_v7 = vpop.f32.mrb[101].mxu0 }
 0x569   : > { %v6422_v8 = vadd.f32 %v4846_v26, %v8693_v59  ;;  %v6391_v27 = vadd.f32 %v4622_v7, %v8696_v15  ;;  %v4848_v9 = vpop.f32.mrb[101].mxu1  ;;  %v4624_v3 = vpop.f32.mrb[102].mxu0  ;;  %5301 = vmatprep.mubr.bf16.mxu0 %v4980_v30 }
 0x56a   : > { %v6423_v12 = vadd.f32 %v4848_v9, %v8699_v11  ;;  %v6392_v10 = vadd.f32 %v4624_v3, %v8690_v19  ;;  %v4850_v17 = vpop.f32.mrb[102].mxu1  ;;  %5398 = vmatprep.mubr.bf16.mxu1 %v4982_v6  ;;  %v4626_v29 = vpop.f32.mrb[103].mxu0  ;;  %5302 = vmatmul.mubr.bf16.vlgmr.msra.gmra.mrb[128].mxu0 %v4979_v5  ;;  %v4923_v25 = vmax.f32 %v6390_v24, 0.0 }
 0x56b   : > { %v6424_v52 = vadd.f32 %v4850_v17, %v8693_v59  ;;  %v6393_v34 = vadd.f32 %v4626_v29, %v8696_v15  ;;  %v4852_v28 = vpop.f32.mrb[103].mxu1  ;;  %5399 = vmatmul.mubr.bf16.vlgmr.msra.gmra.mrb[128].mxu1 %v4981_v2  ;;  %v4925_v31 = vmax.f32 %v6422_v8, 0.0  ;;  %v4924_v0 = vmax.f32 %v6391_v27, 0.0 }
 0x56c   : > { %v4927_v62 = vmax.f32 %v6392_v10, 0.0  ;;  %v6425_v36 = vadd.f32 %v4852_v28, %v8699_v11  ;;  %v4926_v23 = vmax.f32 %v6423_v12, 0.0 }
 0x56d   : > { %v4929_v32 = vmax.f32 %v6424_v52, 0.0  ;;  %v4928_v13 = vmax.f32 %v6393_v34, 0.0 }
 0x56e   : > { %v4983_v33 = vpack.c.bf16 %v4927_v62, %v4923_v25  ;;  %v4930_v35 = vmax.f32 %v6425_v36, 0.0 }
 0x56f   : > { %v4985_v37 = vpack.c.bf16 %v4929_v32, %v4925_v31  ;;  %v4984_v44 = vpack.c.bf16 %v4928_v13, %v4924_v0  ;;  %v4630_v14 = vpop.f32.mrb[104].mxu0 }
 0x570   : > { %v4986_v38 = vpack.c.bf16 %v4930_v35, %v4926_v23  ;;  %v6394_v57 = vadd.f32 %v4630_v14, %v8690_v19  ;;  %v4856_v16 = vpop.f32.mrb[104].mxu1  ;;  %v4632_v42 = vpop.f32.mrb[105].mxu0 }
 0x571   : > { %v6426_v18 = vadd.f32 %v4856_v16, %v8693_v59  ;;  %v6395_v39 = vadd.f32 %v4632_v42, %v8696_v15  ;;  %v4858_v47 = vpop.f32.mrb[105].mxu1  ;;  %v4634_v58 = vpop.f32.mrb[106].mxu0  ;;  %5309 = vmatprep.mubr.bf16.mxu0 %v4984_v44 }
 0x572   : > { %v6427_v1 = vadd.f32 %v4858_v47, %v8699_v11  ;;  %v6396_v56 = vadd.f32 %v4634_v58, %v8690_v19  ;;  %v4860_v41 = vpop.f32.mrb[106].mxu1  ;;  %5406 = vmatprep.mubr.bf16.mxu1 %v4986_v38  ;;  %v4636_v49 = vpop.f32.mrb[107].mxu0  ;;  %5310 = vmatmul.mubr.bf16.gmra.mrb[132].mxu0 %v4983_v33  ;;  %v4931_v63 = vmax.f32 %v6394_v57, 0.0 }
 0x573   : > { %v6428_v51 = vadd.f32 %v4860_v41, %v8693_v59  ;;  %v6397_v45 = vadd.f32 %v4636_v49, %v8696_v15  ;;  %v4862_v43 = vpop.f32.mrb[107].mxu1  ;;  %5407 = vmatmul.mubr.bf16.gmra.mrb[132].mxu1 %v4985_v37  ;;  %v4933_v50 = vmax.f32 %v6426_v18, 0.0  ;;  %v4932_v21 = vmax.f32 %v6395_v39, 0.0 }
 0x574   : > { %v4935_v54 = vmax.f32 %v6396_v56, 0.0  ;;  %v6429_v48 = vadd.f32 %v4862_v43, %v8699_v11  ;;  %v4934_v53 = vmax.f32 %v6427_v1, 0.0 }
 0x575   : > { %v4937_v40 = vmax.f32 %v6428_v51, 0.0  ;;  %v4936_v60 = vmax.f32 %v6397_v45, 0.0 }
 0x576   : > { %v4987_v46 = vpack.c.bf16 %v4935_v54, %v4931_v63  ;;  %v4938_v55 = vmax.f32 %v6429_v48, 0.0 }
 0x577   : > { %v4989_v61 = vpack.c.bf16 %v4937_v40, %v4933_v50  ;;  %v4988_v22 = vpack.c.bf16 %v4936_v60, %v4932_v21  ;;  %v4640_v5 = vpop.f32.mrb[108].mxu0 }
 0x578   : > { %v4990_v20 = vpack.c.bf16 %v4938_v55, %v4934_v53  ;;  %v6398_v2 = vadd.f32 %v4640_v5, %v8690_v19  ;;  %v4866_v30 = vpop.f32.mrb[108].mxu1  ;;  %v4642_v4 = vpop.f32.mrb[109].mxu0 }
 0x579   : > { %v6430_v6 = vadd.f32 %v4866_v30, %v8693_v59  ;;  %v6399_v24 = vadd.f32 %v4642_v4, %v8696_v15  ;;  %v4868_v26 = vpop.f32.mrb[109].mxu1  ;;  %v4644_v7 = vpop.f32.mrb[110].mxu0  ;;  %5317 = vmatprep.mubr.bf16.mxu0 %v4988_v22 }
 0x57a   : > { %v6431_v8 = vadd.f32 %v4868_v26, %v8699_v11  ;;  %v6400_v27 = vadd.f32 %v4644_v7, %v8690_v19  ;;  %v4870_v9 = vpop.f32.mrb[110].mxu1  ;;  %5414 = vmatprep.mubr.bf16.mxu1 %v4990_v20  ;;  %v4646_v3 = vpop.f32.mrb[111].mxu0  ;;  %5318 = vmatmul.mubr.bf16.gmra.mrb[136].mxu0 %v4987_v46  ;;  %v4939_v29 = vmax.f32 %v6398_v2, 0.0 }
 0x57b   : > { %v6432_v12 = vadd.f32 %v4870_v9, %v8693_v59  ;;  %v6401_v10 = vadd.f32 %v4646_v3, %v8696_v15  ;;  %v4872_v17 = vpop.f32.mrb[111].mxu1  ;;  %5415 = vmatmul.mubr.bf16.gmra.mrb[136].mxu1 %v4989_v61  ;;  %v4941_v28 = vmax.f32 %v6430_v6, 0.0  ;;  %v4940_v25 = vmax.f32 %v6399_v24, 0.0 }
 0x57c   : > { %v4943_v52 = vmax.f32 %v6400_v27, 0.0  ;;  %v6433_v34 = vadd.f32 %v4872_v17, %v8699_v11  ;;  %v4942_v31 = vmax.f32 %v6431_v8, 0.0 }
 0x57d   : > { %v4945_v62 = vmax.f32 %v6432_v12, 0.0  ;;  %v4944_v36 = vmax.f32 %v6401_v10, 0.0 }
 0x57e   : > { %v4991_v0 = vpack.c.bf16 %v4943_v52, %v4939_v29  ;;  %v4946_v32 = vmax.f32 %v6433_v34, 0.0 }
 0x57f   : > { %v4993_v13 = vpack.c.bf16 %v4945_v62, %v4941_v28  ;;  %v4992_v23 = vpack.c.bf16 %v4944_v36, %v4940_v25  ;;  %v4650_v33 = vpop.f32.mrb[112].mxu0 }
 0x580   : > { %v4994_v35 = vpack.c.bf16 %v4946_v32, %v4942_v31  ;;  %v6402_v37 = vadd.f32 %v4650_v33, %v8690_v19  ;;  %v4876_v44 = vpop.f32.mrb[112].mxu1  ;;  %v4652_v14 = vpop.f32.mrb[113].mxu0 }
 0x581   : > { %v6434_v38 = vadd.f32 %v4876_v44, %v8693_v59  ;;  %v6403_v57 = vadd.f32 %v4652_v14, %v8696_v15  ;;  %v4878_v16 = vpop.f32.mrb[113].mxu1  ;;  %v4654_v42 = vpop.f32.mrb[114].mxu0  ;;  %5325 = vmatprep.mubr.bf16.mxu0 %v4992_v23 }
 0x582   : > { %v6435_v18 = vadd.f32 %v4878_v16, %v8699_v11  ;;  %v6404_v39 = vadd.f32 %v4654_v42, %v8690_v19  ;;  %v4880_v47 = vpop.f32.mrb[114].mxu1  ;;  %5422 = vmatprep.mubr.bf16.mxu1 %v4994_v35  ;;  %v4656_v58 = vpop.f32.mrb[115].mxu0  ;;  %5326 = vmatmul.mubr.bf16.gmra.mrb[140].mxu0 %v4991_v0  ;;  %v4947_v49 = vmax.f32 %v6402_v37, 0.0 }
 0x583   : > { %v6436_v1 = vadd.f32 %v4880_v47, %v8693_v59  ;;  %v6405_v56 = vadd.f32 %v4656_v58, %v8696_v15  ;;  %v4882_v41 = vpop.f32.mrb[115].mxu1  ;;  %5423 = vmatmul.mubr.bf16.gmra.mrb[140].mxu1 %v4993_v13  ;;  %v4949_v43 = vmax.f32 %v6434_v38, 0.0  ;;  %v4948_v63 = vmax.f32 %v6403_v57, 0.0 }
 0x584   : > { %v4951_v51 = vmax.f32 %v6404_v39, 0.0  ;;  %v6437_v45 = vadd.f32 %v4882_v41, %v8699_v11  ;;  %v4950_v50 = vmax.f32 %v6435_v18, 0.0 }
 0x585   : > { %v4953_v54 = vmax.f32 %v6436_v1, 0.0  ;;  %v4952_v48 = vmax.f32 %v6405_v56, 0.0 }
 0x586   : > { %v4995_v21 = vpack.c.bf16 %v4951_v51, %v4947_v49  ;;  %v4954_v40 = vmax.f32 %v6437_v45, 0.0 }
 0x587   : > { %v4997_v60 = vpack.c.bf16 %v4953_v54, %v4949_v43  ;;  %v4996_v53 = vpack.c.bf16 %v4952_v48, %v4948_v63  ;;  %v4660_v46 = vpop.f32.mrb[116].mxu0 }
 0x588   : > { %v4998_v55 = vpack.c.bf16 %v4954_v40, %v4950_v50  ;;  %v6406_v61 = vadd.f32 %v4660_v46, %v8690_v19  ;;  %v4886_v22 = vpop.f32.mrb[116].mxu1  ;;  %v4662_v5 = vpop.f32.mrb[117].mxu0 }
 0x589   : > { %v6438_v20 = vadd.f32 %v4886_v22, %v8693_v59  ;;  %v6407_v2 = vadd.f32 %v4662_v5, %v8696_v15  ;;  %v4888_v30 = vpop.f32.mrb[117].mxu1  ;;  %v4664_v4 = vpop.f32.mrb[118].mxu0  ;;  %5333 = vmatprep.mubr.bf16.mxu0 %v4996_v53 }
 0x58a   : > { %v6439_v6 = vadd.f32 %v4888_v30, %v8699_v11  ;;  %v6408_v24 = vadd.f32 %v4664_v4, %v8690_v19  ;;  %v4890_v26 = vpop.f32.mrb[118].mxu1  ;;  %5430 = vmatprep.mubr.bf16.mxu1 %v4998_v55  ;;  %v4666_v7 = vpop.f32.mrb[119].mxu0  ;;  %5334 = vmatmul.mubr.bf16.gmra.mrb[144].mxu0 %v4995_v21  ;;  %v4955_v3 = vmax.f32 %v6406_v61, 0.0 }
 0x58b   : > { %v6440_v8 = vadd.f32 %v4890_v26, %v8693_v59  ;;  %v6409_v27 = vadd.f32 %v4666_v7, %v8696_v15  ;;  %v4892_v9 = vpop.f32.mrb[119].mxu1  ;;  %5431 = vmatmul.mubr.bf16.gmra.mrb[144].mxu1 %v4997_v60  ;;  %v4957_v17 = vmax.f32 %v6438_v20, 0.0  ;;  %v4956_v29 = vmax.f32 %v6407_v2, 0.0 }
 0x58c   : > { %v4959_v12 = vmax.f32 %v6408_v24, 0.0  ;;  %v6441_v10 = vadd.f32 %v4892_v9, %v8699_v11  ;;  %v4958_v28 = vmax.f32 %v6439_v6, 0.0 }
 0x58d   : > { %v4961_v52 = vmax.f32 %v6440_v8, 0.0  ;;  %v4960_v34 = vmax.f32 %v6409_v27, 0.0 }
 0x58e   : > { %v4999_v25 = vpack.c.bf16 %v4959_v12, %v4955_v3  ;;  %v4962_v62 = vmax.f32 %v6441_v10, 0.0 }
 0x58f   : > { %v5001_v36 = vpack.c.bf16 %v4961_v52, %v4957_v17  ;;  %v5000_v31 = vpack.c.bf16 %v4960_v34, %v4956_v29  ;;  %v4670_v0 = vpop.f32.mrb[120].mxu0 }
 0x590   : > { %v5002_v32 = vpack.c.bf16 %v4962_v62, %v4958_v28  ;;  %v6410_v13 = vadd.f32 %v4670_v0, %v8690_v19  ;;  %v4896_v23 = vpop.f32.mrb[120].mxu1  ;;  %v4672_v33 = vpop.f32.mrb[121].mxu0 }
 0x591   : > { %v6442_v35 = vadd.f32 %v4896_v23, %v8693_v59  ;;  %v6411_v37 = vadd.f32 %v4672_v33, %v8696_v15  ;;  %v4898_v44 = vpop.f32.mrb[121].mxu1  ;;  %v4674_v14 = vpop.f32.mrb[122].mxu0  ;;  %5341 = vmatprep.mubr.bf16.mxu0 %v5000_v31 }
 0x592   : > { %v6443_v38 = vadd.f32 %v4898_v44, %v8699_v11  ;;  %v6412_v57 = vadd.f32 %v4674_v14, %v8690_v19  ;;  %v4900_v16 = vpop.f32.mrb[122].mxu1  ;;  %5438 = vmatprep.mubr.bf16.mxu1 %v5002_v32  ;;  %v4676_v42 = vpop.f32.mrb[123].mxu0  ;;  %5342 = vmatmul.mubr.bf16.gmra.mrb[148].mxu0 %v4999_v25  ;;  %v4963_v58 = vmax.f32 %v6410_v13, 0.0  ;;  %v8765_v25 = vstv %s5075_s28 }
 0x593   : > { %v6444_v18 = vadd.f32 %v4900_v16, %v8693_v59  ;;  %v6413_v39 = vadd.f32 %v4676_v42, %v8696_v15  ;;  %v4902_v47 = vpop.f32.mrb[123].mxu1  ;;  %5439 = vmatmul.mubr.bf16.gmra.mrb[148].mxu1 %v5001_v36  ;;  %v4965_v41 = vmax.f32 %v6442_v35, 0.0  ;;  %v4964_v49 = vmax.f32 %v6411_v37, 0.0 }
 0x594   : > { %v4967_v1 = vmax.f32 %v6412_v57, 0.0  ;;  %v6445_v56 = vadd.f32 %v4902_v47, %v8699_v11  ;;  %v4966_v43 = vmax.f32 %v6443_v38, 0.0 }
 0x595   : > { %v4969_v51 = vmax.f32 %v6444_v18, 0.0  ;;  %v4968_v45 = vmax.f32 %v6413_v39, 0.0 }
 0x596   : > { %v5003_v63 = vpack.c.bf16 %v4967_v1, %v4963_v58  ;;  %v4970_v54 = vmax.f32 %v6445_v56, 0.0 }
 0x597   : > { %v5005_v48 = vpack.c.bf16 %v4969_v51, %v4965_v41  ;;  %v5004_v50 = vpack.c.bf16 %v4968_v45, %v4964_v49  ;;  %v4680_v21 = vpop.f32.mrb[124].mxu0 }
 0x598   : > { %v5006_v40 = vpack.c.bf16 %v4970_v54, %v4966_v43  ;;  %v6414_v60 = vadd.f32 %v4680_v21, %v8690_v19  ;;  %v4906_v53 = vpop.f32.mrb[124].mxu1  ;;  %v4682_v46 = vpop.f32.mrb[125].mxu0 }
 0x599   : > { %v6446_v55 = vadd.f32 %v4906_v53, %v8693_v59  ;;  %v6415_v61 = vadd.f32 %v4682_v46, %v8696_v15  ;;  %v4908_v22 = vpop.f32.mrb[125].mxu1  ;;  %v4684_v5 = vpop.f32.mrb[126].mxu0  ;;  %5349 = vmatprep.mubr.bf16.mxu0 %v5004_v50 }
 0x59a   : > { %v6447_v20 = vadd.f32 %v4908_v22, %v8699_v11  ;;  %v6416_v2 = vadd.f32 %v4684_v5, %v8690_v19  ;;  %v4910_v30 = vpop.f32.mrb[126].mxu1  ;;  %5446 = vmatprep.mubr.bf16.mxu1 %v5006_v40  ;;  %v4686_v4 = vpop.f32.mrb[127].mxu0  ;;  %5350 = vmatmul.mubr.bf16.gmra.mrb[152].mxu0 %v5003_v63  ;;  %v4971_v7 = vmax.f32 %v6414_v60, 0.0 }
 0x59b   : > { %v6448_v6 = vadd.f32 %v4910_v30, %v8693_v59  ;;  %v6417_v24 = vadd.f32 %v4686_v4, %v8696_v15  ;;  %v4912_v26 = vpop.f32.mrb[127].mxu1  ;;  %5447 = vmatmul.mubr.bf16.gmra.mrb[152].mxu1 %v5005_v48  ;;  %v4973_v9 = vmax.f32 %v6446_v55, 0.0  ;;  %v4972_v3 = vmax.f32 %v6415_v61, 0.0 }
 0x59c   : > { %v4975_v8 = vmax.f32 %v6416_v2, 0.0  ;;  %v6449_v27 = vadd.f32 %v4912_v26, %v8699_v11  ;;  %v4974_v17 = vmax.f32 %v6447_v20, 0.0 }
 0x59d   : > { %v4977_v12 = vmax.f32 %v6448_v6, 0.0  ;;  %v4976_v10 = vmax.f32 %v6417_v24, 0.0 }
 0x59e   : > { %v5007_v19 = vpack.c.bf16 %v4975_v8, %v4971_v7  ;;  %v4978_v29 = vmax.f32 %v6449_v27, 0.0 }
 0x59f   : > { %v5009_v52 = vpack.c.bf16 %v4977_v12, %v4973_v9  ;;  %v5008_v34 = vpack.c.bf16 %v4976_v10, %v4972_v3 }
 0x5a0   : > { %v5010_v28 = vpack.c.bf16 %v4978_v29, %v4974_v17 }
 0x5a1   : > { %5357 = vmatprep.mubr.bf16.mxu0 %v5008_v34 }
 0x5a2   : > { %5454 = vmatprep.mubr.bf16.mxu1 %v5010_v28  ;;  %5358 = vmatmul.mubr.bf16.gmra.mrb[156].mxu0 %v5007_v19 }
 0x5a3   : > { %5455 = vmatmul.mubr.bf16.gmra.mrb[156].mxu1 %v5009_v52 }
 0x63d   : > { %v6146_v59 = vpop.f32.mrb[128].mxu0 }
 0x63e   : > { %v6210_v15 = vpop.f32.mrb[128].mxu1  ;;  %v6147_v11 = vpop.f32.mrb[129].mxu0 }
 0x63f   : > { %v6148_v62 = vadd.f32 %v6147_v11, %v6146_v59  ;;  %v6211_v36 = vpop.f32.mrb[129].mxu1  ;;  %v6149_v31 = vpop.f32.mrb[130].mxu0 }
 0x640   : > { %v6212_v0 = vadd.f32 %v6211_v36, %v6210_v15  ;;  %v6213_v32 = vpop.f32.mrb[130].mxu1  ;;  %v6150_v13 = vpop.f32.mrb[131].mxu0 }
 0x641   : > { %v5304_v23 = vadd.f32 %v6148_v62, %v8765_v25  ;;  %v6151_v33 = vadd.f32 %v6150_v13, %v6149_v31  ;;  %v6214_v35 = vpop.f32.mrb[131].mxu1 }
 0x642   : > { %v6215_v37 = vadd.f32 %v6214_v35, %v6213_v32 }
 0x643   : > { %v5401_v44 = vadd.f32 %v6212_v0, %v5304_v23  ;;  %v5307_v14 = vadd.f32 %v6151_v33, %v8765_v25 }
 0x645   : > { %5463 = vst [vmem:[%s8771_s15] sm:$0xff] %v5401_v44  ;;  %v5404_v38 = vadd.f32 %v6215_v37, %v5307_v14  ;;  %v6152_v57 = vpop.f32.mrb[132].mxu0 }
 0x646   : > { %v6216_v16 = vpop.f32.mrb[132].mxu1  ;;  %v6153_v42 = vpop.f32.mrb[133].mxu0 }
 0x647   : > { %5464 = vst [vmem:[%s8771_s15 + $0x8] sm:$0xff] %v5404_v38  ;;  %v6154_v18 = vadd.f32 %v6153_v42, %v6152_v57  ;;  %v6217_v39 = vpop.f32.mrb[133].mxu1  ;;  %v6155_v47 = vpop.f32.mrb[134].mxu0 }
 0x648   : > { %v6218_v58 = vadd.f32 %v6217_v39, %v6216_v16  ;;  %v6219_v1 = vpop.f32.mrb[134].mxu1  ;;  %v6156_v56 = vpop.f32.mrb[135].mxu0 }
 0x649   : > { %v5312_v41 = vadd.f32 %v6154_v18, %v8765_v25  ;;  %v6157_v49 = vadd.f32 %v6156_v56, %v6155_v47  ;;  %v6220_v51 = vpop.f32.mrb[135].mxu1 }
 0x64a   : > { %v6221_v45 = vadd.f32 %v6220_v51, %v6219_v1 }
 0x64b   : > { %v5409_v43 = vadd.f32 %v6218_v58, %v5312_v41  ;;  %v5315_v63 = vadd.f32 %v6157_v49, %v8765_v25 }
 0x64d   : > { %5465 = vst [vmem:[%s8771_s15 + $0x10] sm:$0xff] %v5409_v43  ;;  %v5412_v54 = vadd.f32 %v6221_v45, %v5315_v63  ;;  %v6158_v48 = vpop.f32.mrb[136].mxu0 }
 0x64e   : > { %v6222_v50 = vpop.f32.mrb[136].mxu1  ;;  %v6159_v21 = vpop.f32.mrb[137].mxu0 }
 0x64f   : > { %5466 = vst [vmem:[%s8771_s15 + $0x18] sm:$0xff] %v5412_v54  ;;  %v6160_v40 = vadd.f32 %v6159_v21, %v6158_v48  ;;  %v6223_v60 = vpop.f32.mrb[137].mxu1  ;;  %v6161_v53 = vpop.f32.mrb[138].mxu0 }
 0x650   : > { %v6224_v46 = vadd.f32 %v6223_v60, %v6222_v50  ;;  %v6225_v55 = vpop.f32.mrb[138].mxu1  ;;  %v6162_v61 = vpop.f32.mrb[139].mxu0 }
 0x651   : > { %v5320_v22 = vadd.f32 %v6160_v40, %v8765_v25  ;;  %v6163_v5 = vadd.f32 %v6162_v61, %v6161_v53  ;;  %v6226_v20 = vpop.f32.mrb[139].mxu1 }
 0x652   : > { %v6227_v2 = vadd.f32 %v6226_v20, %v6225_v55 }
 0x653   : > { %v5417_v30 = vadd.f32 %v6224_v46, %v5320_v22  ;;  %v5323_v4 = vadd.f32 %v6163_v5, %v8765_v25 }
 0x655   : > { %5467 = vst [vmem:[%s8771_s15 + $0x20] sm:$0xff] %v5417_v30  ;;  %v5420_v6 = vadd.f32 %v6227_v2, %v5323_v4  ;;  %v6164_v24 = vpop.f32.mrb[140].mxu0 }
 0x656   : > { %v6228_v26 = vpop.f32.mrb[140].mxu1  ;;  %v6165_v7 = vpop.f32.mrb[141].mxu0 }
 0x657   : > { %5468 = vst [vmem:[%s8771_s15 + $0x28] sm:$0xff] %v5420_v6  ;;  %v6166_v8 = vadd.f32 %v6165_v7, %v6164_v24  ;;  %v6229_v27 = vpop.f32.mrb[141].mxu1  ;;  %v6167_v9 = vpop.f32.mrb[142].mxu0 }
 0x658   : > { %v6230_v3 = vadd.f32 %v6229_v27, %v6228_v26  ;;  %v6231_v12 = vpop.f32.mrb[142].mxu1  ;;  %v6168_v10 = vpop.f32.mrb[143].mxu0 }
 0x659   : > { %v5328_v17 = vadd.f32 %v6166_v8, %v8765_v25  ;;  %v6169_v19 = vadd.f32 %v6168_v10, %v6167_v9  ;;  %v6232_v29 = vpop.f32.mrb[143].mxu1 }
 0x65a   : > { %v6233_v52 = vadd.f32 %v6232_v29, %v6231_v12 }
 0x65b   : > { %v5425_v34 = vadd.f32 %v6230_v3, %v5328_v17  ;;  %v5331_v28 = vadd.f32 %v6169_v19, %v8765_v25 }
 0x65d   : > { %5469 = vst [vmem:[%s8771_s15 + $0x30] sm:$0xff] %v5425_v34  ;;  %v5428_v59 = vadd.f32 %v6233_v52, %v5331_v28  ;;  %v6170_v15 = vpop.f32.mrb[144].mxu0 }
 0x65e   : > { %v6234_v11 = vpop.f32.mrb[144].mxu1  ;;  %v6171_v62 = vpop.f32.mrb[145].mxu0 }
 0x65f   : > { %5470 = vst [vmem:[%s8771_s15 + $0x38] sm:$0xff] %v5428_v59  ;;  %v6172_v36 = vadd.f32 %v6171_v62, %v6170_v15  ;;  %v6235_v31 = vpop.f32.mrb[145].mxu1  ;;  %v6173_v0 = vpop.f32.mrb[146].mxu0 }
 0x660   : > { %v6236_v32 = vadd.f32 %v6235_v31, %v6234_v11  ;;  %v6237_v13 = vpop.f32.mrb[146].mxu1  ;;  %v6174_v23 = vpop.f32.mrb[147].mxu0 }
 0x661   : > { %v5336_v33 = vadd.f32 %v6172_v36, %v8765_v25  ;;  %v6175_v35 = vadd.f32 %v6174_v23, %v6173_v0  ;;  %v6238_v37 = vpop.f32.mrb[147].mxu1 }
 0x662   : > { %v6239_v44 = vadd.f32 %v6238_v37, %v6237_v13 }
 0x663   : > { %v5433_v14 = vadd.f32 %v6236_v32, %v5336_v33  ;;  %v5339_v38 = vadd.f32 %v6175_v35, %v8765_v25 }
 0x665   : > { %5471 = vst [vmem:[%s8771_s15 + $0x40] sm:$0xff] %v5433_v14  ;;  %v5436_v57 = vadd.f32 %v6239_v44, %v5339_v38  ;;  %v6176_v16 = vpop.f32.mrb[148].mxu0 }
 0x666   : > { %v6240_v42 = vpop.f32.mrb[148].mxu1  ;;  %v6177_v18 = vpop.f32.mrb[149].mxu0 }
 0x667   : > { %5472 = vst [vmem:[%s8771_s15 + $0x48] sm:$0xff] %v5436_v57  ;;  %v6178_v39 = vadd.f32 %v6177_v18, %v6176_v16  ;;  %v6241_v47 = vpop.f32.mrb[149].mxu1  ;;  %v6179_v58 = vpop.f32.mrb[150].mxu0 }
 0x668   : > { %v6242_v1 = vadd.f32 %v6241_v47, %v6240_v42  ;;  %v6243_v56 = vpop.f32.mrb[150].mxu1  ;;  %v6180_v41 = vpop.f32.mrb[151].mxu0 }
 0x669   : > { %v5344_v49 = vadd.f32 %v6178_v39, %v8765_v25  ;;  %v6181_v51 = vadd.f32 %v6180_v41, %v6179_v58  ;;  %v6244_v45 = vpop.f32.mrb[151].mxu1 }
 0x66a   : > { %v6245_v43 = vadd.f32 %v6244_v45, %v6243_v56 }
 0x66b   : > { %v5441_v63 = vadd.f32 %v6242_v1, %v5344_v49  ;;  %v5347_v54 = vadd.f32 %v6181_v51, %v8765_v25 }
 0x66d   : > { %5473 = vst [vmem:[%s8771_s15 + $0x50] sm:$0xff] %v5441_v63  ;;  %v5444_v48 = vadd.f32 %v6245_v43, %v5347_v54  ;;  %v6182_v50 = vpop.f32.mrb[152].mxu0 }
 0x66e   : > { %v6246_v21 = vpop.f32.mrb[152].mxu1  ;;  %v6183_v40 = vpop.f32.mrb[153].mxu0 }
 0x66f   : > { %5474 = vst [vmem:[%s8771_s15 + $0x58] sm:$0xff] %v5444_v48  ;;  %v6184_v60 = vadd.f32 %v6183_v40, %v6182_v50  ;;  %v6247_v53 = vpop.f32.mrb[153].mxu1  ;;  %v6185_v46 = vpop.f32.mrb[154].mxu0 }
 0x670   : > { %v6248_v55 = vadd.f32 %v6247_v53, %v6246_v21  ;;  %v6249_v61 = vpop.f32.mrb[154].mxu1  ;;  %v6186_v22 = vpop.f32.mrb[155].mxu0 }
 0x671   : > { %v5352_v5 = vadd.f32 %v6184_v60, %v8765_v25  ;;  %v6187_v20 = vadd.f32 %v6186_v22, %v6185_v46  ;;  %v6250_v2 = vpop.f32.mrb[155].mxu1 }
 0x672   : > { %v6251_v30 = vadd.f32 %v6250_v2, %v6249_v61 }
 0x673   : > { %v5449_v4 = vadd.f32 %v6248_v55, %v5352_v5  ;;  %v5355_v6 = vadd.f32 %v6187_v20, %v8765_v25 }
 0x675   : > { %5475 = vst [vmem:[%s8771_s15 + $0x60] sm:$0xff] %v5449_v4  ;;  %v5452_v24 = vadd.f32 %v6251_v30, %v5355_v6  ;;  %v6188_v26 = vpop.f32.mrb[156].mxu0 }
 0x676   : > { %v6252_v7 = vpop.f32.mrb[156].mxu1  ;;  %v6189_v8 = vpop.f32.mrb[157].mxu0 }
 0x677   : > { %5476 = vst [vmem:[%s8771_s15 + $0x68] sm:$0xff] %v5452_v24  ;;  %v6190_v27 = vadd.f32 %v6189_v8, %v6188_v26  ;;  %v6253_v9 = vpop.f32.mrb[157].mxu1  ;;  %v6191_v3 = vpop.f32.mrb[158].mxu0 }
 0x678   : > { %v6254_v12 = vadd.f32 %v6253_v9, %v6252_v7  ;;  %v6255_v10 = vpop.f32.mrb[158].mxu1  ;;  %v6192_v17 = vpop.f32.mrb[159].mxu0 }
 0x679   : > { %v5360_v19 = vadd.f32 %v6190_v27, %v8765_v25  ;;  %v6193_v29 = vadd.f32 %v6192_v17, %v6191_v3  ;;  %v6256_v52 = vpop.f32.mrb[159].mxu1 }
 0x67a   : > { %v6257_v34 = vadd.f32 %v6256_v52, %v6255_v10 }
 0x67b   : > { %v5457_v28 = vadd.f32 %v6254_v12, %v5360_v19  ;;  %v5363_v59 = vadd.f32 %v6193_v29, %v8765_v25 }
 0x67d   : > { %5477 = vst [vmem:[%s8771_s15 + $0x70] sm:$0xff] %v5457_v28  ;;  %v5460_v15 = vadd.f32 %v6257_v34, %v5363_v59 }
 0x67f   : > { %5478 = vst [vmem:[%s8771_s15 + $0x78] sm:$0xff] %v5460_v15 }
 0x680   : > { %7709 = shalt.err (!%p7706_p3)
}
 0x681   : > { %s7710_s28 = scalar_lea.hbm %s8806_s1, 2048  ;;  %s7714_s11 = scalar_lea.hbm %s8894_s30, 8192 }
 0x682   : > { %p7711_p4 = scmp.ne.s32.totalorder %s8806_s1, %s7710_s28  ;;  %p7715_p9 = scmp.lt.u32.totalorder %s8806_s1, %s8894_s30 }
 0x683   : > { %p7716_p12 = scmp.lt.u32.totalorder %s7714_s11, %s7710_s28  ;;  %p7718_p13 = scmp.lt.u32.totalorder %s7710_s28, %s8806_s1 }
 0x684   : > { %p7712_p8 = pnand %p7711_p4, %p8895_p0 }
 0x685   : > { %p7717_p1 = por %p7716_p12, %p7715_p9 }
 0x686   : > { %p7713_p6 = pneg %p7712_p8 }
 0x687   : > { %p7719_p2 = por %p7718_p13, %p7717_p1 }
 0x689   : > { %p7720_p7 = pnand %p7719_p2, %p7713_p6 }
 0x68b   : > { %7723 = shalt.err (!%p7720_p7)
}
 0x68c   : > { %s7802_s24 = smov 128   ;;  %s7803_s17 = smov 8  }
 0x68d   : > { %6680 = dma.vmem_to_hbm [thread:$0]  (%p8895_p0), %s8808_s18, 2048, %s8806_s1, %s5480_s25, %s7802_s24, %s7802_s24, %s7803_s17  }
 0x68e PF: > { %p6737_p5 = scmp.ge.s32.totalorder %s7782_s22, 2  ;;  %s5508_s26 = sand.u32 1, %s7770_s19  }
 0x68f   : > { %p8896_p10 = scmp.ne.s32.totalorder %s8880_s12, 0  ;;  %s5509_s28 = scalar_lea.sflag [#allocation5], %s5508_s26 }
 0x691   : > { %p6715_p11 = pnand %p6737_p5, %p8896_p10 }
 0x693   : > { %7765 = dma.done.wait (!%p6715_p11), %s5509_s28, 2048  }
 0x694   : > { %7767 = vsyncadd (!%p6715_p11), %s5509_s28, 4294965248  ;;  %p30_p3 = scmp.ge.s32.totalorder %s8108_s10, 6   ;;  %s8897_s19 = smov %s7774_s20 }
 0x695   : > { %s8898_s20 = smov %s7778_s21  ;;  %s8899_s21 = smov %s8120_s27 }
 0x696   : > { %s8900_s22 = smov %s8108_s10  ;;  %32 = sbr.rel (!%p30_p3) target bundleno = 14 (0xe), region = 145 }
 0x69d   :  { %5514 = vsyncpa [#allocation4], 1 }
 0x69e   :  { %5516 = vsyncpa [#allocation4 + $0x1], 1 }
 0x69f   :  { %5517 = vsyncpa [#allocation7], 1 }
 0x6a0   :  { %5518 = vsyncpa [#allocation10], 1 }
 0x6a1   :  { %5519 = vsyncpa [#allocation13], 1 }
 0x6a2   :  { %5520 = vsyncpa [#allocation16], 1 }
 0x6a3   :  { %5521 = vsyncpa [#allocation19], 1 }
 0x6a4   :  { %5522 = vsyncpa [#allocation5], 1 }
 0x6a5   :  { %5524 = vsyncpa [#allocation5 + $0x1], 1 }

</bundles_post_ra>
